<compile_context>
chip_gen: v5e
topology: v5e:2x2
jax: 0.10.0
libtpu: 0.0.40
codegen_flags: <defaults>
</compile_context>

<pallas_src>
import math
import functools

import jax
import jax.numpy as jnp
from jax import lax
from jax.experimental import pallas as pl
from jax.experimental.pallas import tpu as pltpu

_LANE = 128
_SUBLANE = 8


def _round_up(x, m):
    return (x + m - 1) // m * m


def _sigmoid(x):
    # sigmoid(x) = 0.5*tanh(0.5*x) + 0.5 : one EUP transcendental instead of exp+recip.
    return 0.5 * jnp.tanh(0.5 * x) + 0.5


def _bidir_lstm_kernel(gx_ref, whh_ref, y_ref, h_out_ref, c_out_ref, h_sc, c_sc,
                       *, seq_len, unroll):
    """Fused (both-direction) LSTM recurrence over one time block.

    grid = (num_dirs, n_time_blocks)
      axis 0 'parallel'  : direction (maps onto the 2 TensorCores on v7x)
      axis 1 'arbitrary' : time blocks (sequential recurrence)

    The backward direction (d==1) reverses the time-block order in the index_map and
    the within-block order here, so the recurrence body is identical for both.

    gx_ref  : (TT, B, 4H) bf16   x_t @ W_ih^T + b_ih + b_hh for this original block
    whh_ref : (H, 4H)     bf16   hidden-to-hidden weights (transposed, gate-padded)
    y_ref   : (TT, B, H)  bf16   per-timestep hidden outputs (original time order)
    h_out_ref, c_out_ref : (B, H) f32 final states (written on the last grid step)
    h_sc, c_sc : f32 VMEM scratch carrying h/c across time blocks
    """
    d = pl.program_id(0)
    tb = pl.program_id(1)
    n_tb = pl.num_programs(1)
    tt = gx_ref.shape[0]
    h_pad = whh_ref.shape[0]
    needs_guard = (seq_len % tt) != 0          # static: is the last block ragged?

    @pl.when(tb == 0)
    def _():
        h_sc[...] = jnp.zeros_like(h_sc)
        c_sc[...] = jnp.zeros_like(c_sc)

    whh = whh_ref[...]                          # bf16 weights, loaded once per block
    ob = tb + d * (n_tb - 1 - 2 * tb)           # original time-block index

    def step(i, carry):
        h, c = carry
        pos = i + d * (tt - 1 - 2 * i)          # within-block position (reversed d==1)
        # Only the truly-recurrent matmul lives in the loop (bf16 x bf16 -> f32, MXU).
        gates = gx_ref[pos].astype(jnp.float32) + jnp.dot(
            h.astype(jnp.bfloat16), whh, preferred_element_type=jnp.float32)
        i_g = _sigmoid(gates[:, 0 * h_pad:1 * h_pad])
        f_g = _sigmoid(gates[:, 1 * h_pad:2 * h_pad])
        g_g = jnp.tanh(gates[:, 2 * h_pad:3 * h_pad])
        o_g = _sigmoid(gates[:, 3 * h_pad:4 * h_pad])
        c_new = f_g * c + i_g * g_g
        h_new = o_g * jnp.tanh(c_new)
        if needs_guard:
            # Steps past the true sequence end (ragged last block) must not touch the
            # carried state; their y rows land in the padded tail and are sliced off.
            valid = (ob * tt + pos) < seq_len
            h_new = jnp.where(valid, h_new, h)
            c_new = jnp.where(valid, c_new, c)
        y_ref[pos] = h_new.astype(y_ref.dtype)
        return h_new, c_new

    h, c = lax.fori_loop(0, tt, step, (h_sc[...], c_sc[...]), unroll=unroll)
    h_sc[...] = h
    c_sc[...] = c

    # Final states written once, on the last grid step of each direction.
    @pl.when(tb == n_tb - 1)
    def _():
        h_out_ref[...] = h
        c_out_ref[...] = c


def _run_layer(x, w_ih, w_hh_t, bias, *, seq_len, H_pad, tt, unroll):
    """One LSTM layer, both directions fused into a single pallas_call.

    x       : (T_pad, B_pad, Din) time-major, time/batch pre-padded
    w_ih    : (D, 4*H_pad, Din)   bf16
    w_hh_t  : (D, H_pad, 4*H_pad) bf16
    bias    : (D, 4*H_pad)        f32 (b_ih + b_hh, gate-padded)
    Returns y (D, T_pad, B_pad, H_pad) bf16 (original time order for both directions),
            h_n, c_n (D, B_pad, H_pad) f32.
    """
    T_pad, B_pad, _ = x.shape
    D = w_ih.shape[0]
    n_tb = T_pad // tt

    # Hoisted input projection for every timestep & direction: one big MXU matmul with
    # bf16 operands, f32 accumulation, bias folded in, stored bf16 (largest HBM stream).
    gx = (jnp.einsum("tbi,doi->dtbo", x.astype(jnp.bfloat16), w_ih,
                     preferred_element_type=jnp.float32)
          + bias[:, None, None, :]).astype(jnp.bfloat16)

    # Backward direction reads its time blocks (and steps, in-kernel) in reverse order:
    # no XLA-side reverse/stack/un-reverse copies of gx / y.
    def gx_y_map(dd, t):
        return (dd, t + dd * (n_tb - 1 - 2 * t), 0, 0)

    def dir_only_map(dd, t):
        return (dd, 0, 0)

    whh_block = (None, H_pad, 4 * H_pad)
    try:
        # W_hh block index is constant along the time axis -> a single buffer suffices
        # (halves weight VMEM; matters at H_pad~1024 on v7x's 64 MiB VMEM).
        whh_spec = pl.BlockSpec(whh_block, dir_only_map, pipeline_mode=pl.Buffered(1))
    except Exception:   # older jax without pipeline_mode / Buffered
        whh_spec = pl.BlockSpec(whh_block, dir_only_map)

    # Explicit VMEM budget: 2x gx block + 2x y block + weights + states/scratch + slack.
    est = (2 * tt * B_pad * 4 * H_pad * 2 + 2 * tt * B_pad * H_pad * 2
           + 2 * H_pad * 4 * H_pad * 2 + 4 * B_pad * H_pad * 4
           + 2 * B_pad * H_pad * 4)
    vmem_limit = int(min(64 * 1024 * 1024, max(32 * 1024 * 1024, 2 * est)))

    kernel = functools.partial(_bidir_lstm_kernel, seq_len=seq_len, unroll=unroll)

    y, h_n, c_n = pl.pallas_call(
        kernel,
        out_shape=(
            jax.ShapeDtypeStruct((D, T_pad, B_pad, H_pad), jnp.bfloat16),
            jax.ShapeDtypeStruct((D, B_pad, H_pad), jnp.float32),
            jax.ShapeDtypeStruct((D, B_pad, H_pad), jnp.float32),
        ),
        grid_spec=pltpu.PrefetchScalarGridSpec(
            num_scalar_prefetch=0,
            grid=(D, n_tb),
            in_specs=[
                pl.BlockSpec((None, tt, B_pad, 4 * H_pad), gx_y_map),
                whh_spec,
            ],
            out_specs=[
                pl.BlockSpec((None, tt, B_pad, H_pad), gx_y_map),
                pl.BlockSpec((None, B_pad, H_pad), dir_only_map),
                pl.BlockSpec((None, B_pad, H_pad), dir_only_map),
            ],
            scratch_shapes=[
                pltpu.VMEM((B_pad, H_pad), jnp.float32),
                pltpu.VMEM((B_pad, H_pad), jnp.float32),
            ],
        ),
        # TODO(synk): verify with xprof that the 'parallel' direction axis shards across
        # v7x's 2 TensorCores; if not, switch to CORE_PARALLEL / pl.core_map.
        compiler_params=pltpu.CompilerParams(
            dimension_semantics=("parallel", "arbitrary"),
            vmem_limit_bytes=vmem_limit),
    )(gx, w_hh_t)
    return y, h_n, c_n


def init_lstm_params(key, input_size, hidden_size, n_layers, bidirectional=True):
    """Raw nn.LSTM parameters: U(-1/sqrt(H), 1/sqrt(H)), PyTorch gate order (i,f,g,o).

    Returns a list (over layers) of lists (over directions) of dicts with
    w_ih (4H, Din), w_hh (4H, H), b_ih (4H,), b_hh (4H,) -- all f32.
    """
    D = 2 if bidirectional else 1
    H = hidden_size
    k = 1.0 / math.sqrt(H)
    layers = []
    for layer in range(n_layers):
        d_in = input_size if layer == 0 else D * H
        dirs = []
        for _ in range(D):
            key, k1, k2, k3, k4 = jax.random.split(key, 5)
            dirs.append({
                "w_ih": jax.random.uniform(k1, (4 * H, d_in), jnp.float32, -k, k),
                "w_hh": jax.random.uniform(k2, (4 * H, H), jnp.float32, -k, k),
                "b_ih": jax.random.uniform(k3, (4 * H,), jnp.float32, -k, k),
                "b_hh": jax.random.uniform(k4, (4 * H,), jnp.float32, -k, k),
            })
        layers.append(dirs)
    return layers


def pack_params(raw_params, hidden_size):
    """Convert raw nn.LSTM params to the padded kernel layout (bf16 weights).

    Per layer:
      w_ih   : (D, 4*H_pad, Din)    bf16, gate-block rows padded H -> H_pad
      w_hh_t : (D, H_pad, 4*H_pad)  bf16, transposed, gate-padded
      bias   : (D, 4*H_pad)         f32,  b_ih + b_hh, gate-padded
    """
    # TODO(synk): per-gate padding H -> 128 wastes MXU/HBM work for H << 128; a
    # contiguous-4H gate layout would avoid it if small hidden sizes are a real target.
    H = hidden_size
    H_pad = _round_up(H, _LANE)
    packed = []
    for dirs in raw_params:
        w_ih_l, w_hh_l, b_l = [], [], []
        for p in dirs:
            d_in = p["w_ih"].shape[1]
            w_ih_p = jnp.zeros((4 * H_pad, d_in), jnp.float32)
            w_hh_p = jnp.zeros((4 * H_pad, H_pad), jnp.float32)
            b_p = jnp.zeros((4 * H_pad,), jnp.float32)
            for g in range(4):
                w_ih_p = w_ih_p.at[g * H_pad:g * H_pad + H, :].set(
                    p["w_ih"][g * H:(g + 1) * H, :])
                w_hh_p = w_hh_p.at[g * H_pad:g * H_pad + H, :H].set(
                    p["w_hh"][g * H:(g + 1) * H, :])
                b_p = b_p.at[g * H_pad:g * H_pad + H].set(
                    p["b_ih"][g * H:(g + 1) * H] + p["b_hh"][g * H:(g + 1) * H])
            w_ih_l.append(w_ih_p.astype(jnp.bfloat16))
            w_hh_l.append(w_hh_p.T.astype(jnp.bfloat16))
            b_l.append(b_p)
        packed.append({"w_ih": jnp.stack(w_ih_l),
                       "w_hh_t": jnp.stack(w_hh_l),
                       "bias": jnp.stack(b_l)})
    return packed


@functools.partial(jax.jit, static_argnames=("hidden_size", "n_layers", "bidirectional",
                                              "time_block", "unroll"))
def lstm_forward(x_btf, params, *, hidden_size, n_layers, bidirectional=True,
                 time_block=32, unroll=8):
    """x_btf: (B, T, input_size). Returns (output, (h_n, c_n)) like nn.LSTM (eval,
    zero initial state, batch_first)."""
    H = hidden_size
    H_pad = _round_up(H, _LANE)
    D = 2 if bidirectional else 1
    B, T, _ = x_btf.shape
    B_pad = _round_up(B, _SUBLANE)
    tt = max(1, min(time_block, T))
    n_tb = pl.cdiv(T, tt)
    T_pad = n_tb * tt

    # Time-major; pad batch to a sublane multiple and time (at the end, with zeros) up
    # to whole time blocks.  Padded timesteps are excluded from the recurrent state by
    # the in-kernel guard, so no HBM-sized pad of gx is ever materialized.
    x = jnp.transpose(x_btf, (1, 0, 2)).astype(jnp.bfloat16)
    x = jnp.pad(x, ((0, T_pad - T), (0, B_pad - B), (0, 0)))

    h_all, c_all = [], []
    for lp in params:
        y, h_n, c_n = _run_layer(x, lp["w_ih"], lp["w_hh_t"], lp["bias"],
                                 seq_len=T, H_pad=H_pad, tt=tt,
                                 unroll=max(1, min(unroll, tt)))
        # Inter-layer activation stays bf16 (halves the y write + next-layer read).
        x = jnp.concatenate([y[d, :, :, :H] for d in range(D)], axis=-1)
        h_all.append(h_n[:, :B, :H])
        c_all.append(c_n[:, :B, :H])
        # TODO(synk): inter-layer dropout (p=0.5, training mode) omitted (eval semantics).

    output = jnp.transpose(x[:T, :B, :], (1, 0, 2)).astype(jnp.float32)  # (B, T, D*H)
    h_n = jnp.concatenate(h_all, axis=0)                                 # (L*D, B, H)
    c_n = jnp.concatenate(c_all, axis=0)
    return output, (h_n, c_n)


def lstm_reference(x_btf, raw_params, *, hidden_size, bidirectional=True):
    """Pure-JAX f32 reference matching torch.nn.LSTM(batch_first=True, eval, h0=c0=0)."""
    H = hidden_size
    B = x_btf.shape[0]
    x = x_btf.astype(jnp.float32)
    h_all, c_all = [], []
    for dirs in raw_params:
        outs = []
        for d, p in enumerate(dirs):
            xs = x[:, ::-1] if d == 1 else x

            def step(carry, xt, p=p):
                h, c = carry
                g = xt @ p["w_ih"].T + h @ p["w_hh"].T + p["b_ih"] + p["b_hh"]
                i_g = jax.nn.sigmoid(g[:, 0 * H:1 * H])
                f_g = jax.nn.sigmoid(g[:, 1 * H:2 * H])
                g_g = jnp.tanh(g[:, 2 * H:3 * H])
                o_g = jax.nn.sigmoid(g[:, 3 * H:4 * H])
                c2 = f_g * c + i_g * g_g
                h2 = o_g * jnp.tanh(c2)
                return (h2, c2), h2

            init = (jnp.zeros((B, H), jnp.float32), jnp.zeros((B, H), jnp.float32))
            (hT, cT), ys = lax.scan(step, init, jnp.swapaxes(xs, 0, 1))
            ys = jnp.swapaxes(ys, 0, 1)
            if d == 1:
                ys = ys[:, ::-1]
            outs.append(ys)
            h_all.append(hT)
            c_all.append(cT)
        x = jnp.concatenate(outs, axis=-1)
    return x, (jnp.stack(h_all), jnp.stack(c_all))


if __name__ == "__main__":
    B, T = 2, 8
    input_size, hidden_size, n_layers = 16, 32, 2
    bidirectional = True
    D = 2 if bidirectional else 1

    key = jax.random.PRNGKey(0)
    key, xk, pk, xk2 = jax.random.split(key, 4)
    x = jax.random.normal(xk, (B, T, input_size), jnp.float32)
    raw_params = init_lstm_params(pk, input_size, hidden_size, n_layers,
                                  bidirectional=bidirectional)
    params = pack_params(raw_params, hidden_size)

    output, (h_n, c_n) = lstm_forward(x, params, hidden_size=hidden_size,
                                      n_layers=n_layers, bidirectional=bidirectional)
    jax.block_until_ready((output, h_n, c_n))

    assert output.shape == (B, T, D * hidden_size)
    assert h_n.shape == (n_layers * D, B, hidden_size)
    assert c_n.shape == (n_layers * D, B, hidden_size)
    assert bool(jnp.all(jnp.isfinite(output)))

    # Numerics check vs. a pure-JAX f32 reference (loose tol: bf16 MXU / bf16 storage).
    ref_out, (ref_h, ref_c) = lstm_reference(x, raw_params, hidden_size=hidden_size,
                                             bidirectional=bidirectional)
    assert bool(jnp.allclose(output, ref_out, atol=7.5e-2)), \
        float(jnp.abs(output - ref_out).max())
    assert bool(jnp.allclose(h_n, ref_h, atol=7.5e-2))
    assert bool(jnp.allclose(c_n, ref_c, atol=7.5e-2))

    # Exercise the multi-time-block + reversed-index-map + ragged-tail kernel paths.
    T2 = 11
    x2 = jax.random.normal(xk2, (B, T2, input_size), jnp.float32)
    out2, (h2, c2) = lstm_forward(x2, params, hidden_size=hidden_size,
                                  n_layers=n_layers, bidirectional=bidirectional,
                                  time_block=4)
    jax.block_until_ready((out2, h2, c2))
    ref2, (rh2, rc2) = lstm_reference(x2, raw_params, hidden_size=hidden_size,
                                      bidirectional=bidirectional)
    assert bool(jnp.allclose(out2, ref2, atol=7.5e-2)), \
        float(jnp.abs(out2 - ref2).max())
    assert bool(jnp.allclose(h2, rh2, atol=7.5e-2))
    assert bool(jnp.allclose(c2, rc2, atol=7.5e-2))

    print("KERNEL_OK")
</pallas_src>

<mosaic_0001>
module attributes {stable_mosaic.version = 11 : i64} {
  func.func @_bidir_lstm_kernel(%arg0: i32, %arg1: i32, %arg2: memref<1x8x8x512xbf16, #tpu.memory_space<vmem>>, %arg3: memref<1x128x512xbf16, #tpu.memory_space<vmem>>, %arg4: memref<1x8x8x128xbf16, #tpu.memory_space<vmem>>, %arg5: memref<1x8x128xf32, #tpu.memory_space<vmem>>, %arg6: memref<1x8x128xf32, #tpu.memory_space<vmem>>, %arg7: memref<8x128xf32, #tpu.memory_space<vmem>>, %arg8: memref<8x128xf32, #tpu.memory_space<vmem>>) attributes {dimension_semantics = [#tpu.dimension_semantics<parallel>, #tpu.dimension_semantics<arbitrary>], iteration_bounds = array<i64: 2, 1>, scalar_prefetch = 0 : i64, scratch_operands = 2 : i64, tpu.core_type = #tpu.core_type<tc>, window_params = [{transform_indices = @transform_0, window_bounds = array<i64: 1, 8, 8, 512>}, {pipeline_mode = #tpu.pipeline_mode<synchronous>, transform_indices = @transform_1, window_bounds = array<i64: 1, 128, 512>}, {transform_indices = @transform_2, window_bounds = array<i64: 1, 8, 8, 128>}, {transform_indices = @transform_3, window_bounds = array<i64: 1, 8, 128>}, {transform_indices = @transform_4, window_bounds = array<i64: 1, 8, 128>}]} {
    %c0_i32 = arith.constant 0 : i32
    %0 = arith.cmpi eq, %arg1, %c0_i32 : i32
    %1 = arith.extui %0 : i1 to i32
    %c0_i32_0 = arith.constant 0 : i32
    %2 = arith.cmpi ne, %1, %c0_i32_0 : i32
    scf.if %2 {
      %cst_157 = arith.constant 0.000000e+00 : f32
      %388 = vector.broadcast %cst_157 : f32 to vector<8x128xf32>
      %c0_158 = arith.constant 0 : index
      %c0_159 = arith.constant 0 : index
      %389 = vector.load %arg7[%c0_158, %c0_159] : memref<8x128xf32, #tpu.memory_space<vmem>>, vector<8x128xf32>
      tpu.vector_store %arg7[%c0_158, %c0_159], %388 {strides = array<i32>} : memref<8x128xf32, #tpu.memory_space<vmem>>, vector<8x128xf32>,
      %cst_160 = arith.constant 0.000000e+00 : f32
      %390 = vector.broadcast %cst_160 : f32 to vector<8x128xf32>
      %c0_161 = arith.constant 0 : index
      %c0_162 = arith.constant 0 : index
      %391 = vector.load %arg8[%c0_161, %c0_162] : memref<8x128xf32, #tpu.memory_space<vmem>>, vector<8x128xf32>
      tpu.vector_store %arg8[%c0_161, %c0_162], %390 {strides = array<i32>} : memref<8x128xf32, #tpu.memory_space<vmem>>, vector<8x128xf32>,
    } else {
    }
    %c0 = arith.constant 0 : index
    %c0_1 = arith.constant 0 : index
    %c0_2 = arith.constant 0 : index
    %3 = vector.load %arg3[%c0, %c0_1, %c0_2] : memref<1x128x512xbf16, #tpu.memory_space<vmem>>, vector<1x128x512xbf16>
    %4 = vector.shape_cast %3 : vector<1x128x512xbf16> to vector<128x512xbf16>
    %c0_3 = arith.constant 0 : index
    %c0_4 = arith.constant 0 : index
    %5 = vector.load %arg7[%c0_3, %c0_4] : memref<8x128xf32, #tpu.memory_space<vmem>>, vector<8x128xf32>
    %c0_5 = arith.constant 0 : index
    %c0_6 = arith.constant 0 : index
    %6 = vector.load %arg8[%c0_5, %c0_6] : memref<8x128xf32, #tpu.memory_space<vmem>>, vector<8x128xf32>
    %c0_i32_7 = arith.constant 0 : i32
    %c2_i32 = arith.constant 2 : i32
    %7 = arith.muli %c2_i32, %c0_i32_7 : i32
    %c7_i32 = arith.constant 7 : i32
    %8 = arith.subi %c7_i32, %7 : i32
    %9 = arith.muli %arg0, %8 : i32
    %10 = arith.addi %c0_i32_7, %9 : i32
    %c0_8 = arith.constant 0 : index
    %11 = arith.index_cast %10 : i32 to index
    %c0_9 = arith.constant 0 : index
    %c0_10 = arith.constant 0 : index
    %12 = vector.load %arg2[%c0_8, %11, %c0_9, %c0_10] : memref<1x8x8x512xbf16, #tpu.memory_space<vmem>>, vector<1x1x8x512xbf16>
    %13 = vector.shape_cast %12 : vector<1x1x8x512xbf16> to vector<8x512xbf16>
    %14 = arith.extf %13 : vector<8x512xbf16> to vector<8x512xf32>
    %15 = arith.truncf %5 : vector<8x128xf32> to vector<8x128xbf16>
    %cst = arith.constant dense<0.000000e+00> : vector<8x512xf32>
    %16 = tpu.matmul %15, %4, %cst {dimension_numbers = #tpu.dot_dimension_numbers<[1], [0], [0], [1], [0, 0, 1, 1], [], []>} : vector<8x128xbf16>, vector<128x512xbf16>, vector<8x512xf32> -> vector<8x512xf32>
    %17 = arith.addf %14, %16 : vector<8x512xf32>
    %18 = vector.extract_strided_slice %17 {offsets = [0, 0], sizes = [8, 128], strides = [1, 1]} : vector<8x512xf32> to vector<8x128xf32>
    %cst_11 = arith.constant 5.000000e-01 : f32
    %19 = vector.broadcast %cst_11 : f32 to vector<8x128xf32>
    %20 = arith.mulf %19, %18 : vector<8x128xf32>
    %21 = math.tanh %20 : vector<8x128xf32>
    %cst_12 = arith.constant 5.000000e-01 : f32
    %22 = vector.broadcast %cst_12 : f32 to vector<8x128xf32>
    %23 = arith.mulf %22, %21 : vector<8x128xf32>
    %cst_13 = arith.constant 5.000000e-01 : f32
    %24 = vector.broadcast %cst_13 : f32 to vector<8x128xf32>
    %25 = arith.addf %23, %24 : vector<8x128xf32>
    %26 = vector.extract_strided_slice %17 {offsets = [0, 128], sizes = [8, 128], strides = [1, 1]} : vector<8x512xf32> to vector<8x128xf32>
    %cst_14 = arith.constant 5.000000e-01 : f32
    %27 = vector.broadcast %cst_14 : f32 to vector<8x128xf32>
    %28 = arith.mulf %27, %26 : vector<8x128xf32>
    %29 = math.tanh %28 : vector<8x128xf32>
    %cst_15 = arith.constant 5.000000e-01 : f32
    %30 = vector.broadcast %cst_15 : f32 to vector<8x128xf32>
    %31 = arith.mulf %30, %29 : vector<8x128xf32>
    %cst_16 = arith.constant 5.000000e-01 : f32
    %32 = vector.broadcast %cst_16 : f32 to vector<8x128xf32>
    %33 = arith.addf %31, %32 : vector<8x128xf32>
    %34 = vector.extract_strided_slice %17 {offsets = [0, 256], sizes = [8, 128], strides = [1, 1]} : vector<8x512xf32> to vector<8x128xf32>
    %35 = math.tanh %34 : vector<8x128xf32>
    %36 = vector.extract_strided_slice %17 {offsets = [0, 384], sizes = [8, 128], strides = [1, 1]} : vector<8x512xf32> to vector<8x128xf32>
    %cst_17 = arith.constant 5.000000e-01 : f32
    %37 = vector.broadcast %cst_17 : f32 to vector<8x128xf32>
    %38 = arith.mulf %37, %36 : vector<8x128xf32>
    %39 = math.tanh %38 : vector<8x128xf32>
    %cst_18 = arith.constant 5.000000e-01 : f32
    %40 = vector.broadcast %cst_18 : f32 to vector<8x128xf32>
    %41 = arith.mulf %40, %39 : vector<8x128xf32>
    %cst_19 = arith.constant 5.000000e-01 : f32
    %42 = vector.broadcast %cst_19 : f32 to vector<8x128xf32>
    %43 = arith.addf %41, %42 : vector<8x128xf32>
    %44 = arith.mulf %33, %6 : vector<8x128xf32>
    %45 = arith.mulf %25, %35 : vector<8x128xf32>
    %46 = arith.addf %44, %45 : vector<8x128xf32>
    %47 = math.tanh %46 : vector<8x128xf32>
    %48 = arith.mulf %43, %47 : vector<8x128xf32>
    %49 = arith.truncf %48 : vector<8x128xf32> to vector<8x128xbf16>
    %c0_20 = arith.constant 0 : index
    %50 = arith.index_cast %10 : i32 to index
    %c0_21 = arith.constant 0 : index
    %c0_22 = arith.constant 0 : index
    %51 = vector.load %arg4[%c0_20, %50, %c0_21, %c0_22] : memref<1x8x8x128xbf16, #tpu.memory_space<vmem>>, vector<1x1x8x128xbf16>
    %52 = vector.shape_cast %51 : vector<1x1x8x128xbf16> to vector<8x128xbf16>
    %53 = vector.shape_cast %49 : vector<8x128xbf16> to vector<1x1x8x128xbf16>
    tpu.vector_store %arg4[%c0_20, %50, %c0_21, %c0_22], %53 {strides = array<i32>} : memref<1x8x8x128xbf16, #tpu.memory_space<vmem>>, vector<1x1x8x128xbf16>,
    %c1_i32 = arith.constant 1 : i32
    %c2_i32_23 = arith.constant 2 : i32
    %54 = arith.muli %c2_i32_23, %c1_i32 : i32
    %c7_i32_24 = arith.constant 7 : i32
    %55 = arith.subi %c7_i32_24, %54 : i32
    %56 = arith.muli %arg0, %55 : i32
    %57 = arith.addi %c1_i32, %56 : i32
    %c0_25 = arith.constant 0 : index
    %58 = arith.index_cast %57 : i32 to index
    %c0_26 = arith.constant 0 : index
    %c0_27 = arith.constant 0 : index
    %59 = vector.load %arg2[%c0_25, %58, %c0_26, %c0_27] : memref<1x8x8x512xbf16, #tpu.memory_space<vmem>>, vector<1x1x8x512xbf16>
    %60 = vector.shape_cast %59 : vector<1x1x8x512xbf16> to vector<8x512xbf16>
    %61 = arith.extf %60 : vector<8x512xbf16> to vector<8x512xf32>
    %62 = arith.truncf %48 : vector<8x128xf32> to vector<8x128xbf16>
    %cst_28 = arith.constant dense<0.000000e+00> : vector<8x512xf32>
    %63 = tpu.matmul %62, %4, %cst_28 {dimension_numbers = #tpu.dot_dimension_numbers<[1], [0], [0], [1], [0, 0, 1, 1], [], []>} : vector<8x128xbf16>, vector<128x512xbf16>, vector<8x512xf32> -> vector<8x512xf32>
    %64 = arith.addf %61, %63 : vector<8x512xf32>
    %65 = vector.extract_strided_slice %64 {offsets = [0, 0], sizes = [8, 128], strides = [1, 1]} : vector<8x512xf32> to vector<8x128xf32>
    %cst_29 = arith.constant 5.000000e-01 : f32
    %66 = vector.broadcast %cst_29 : f32 to vector<8x128xf32>
    %67 = arith.mulf %66, %65 : vector<8x128xf32>
    %68 = math.tanh %67 : vector<8x128xf32>
    %cst_30 = arith.constant 5.000000e-01 : f32
    %69 = vector.broadcast %cst_30 : f32 to vector<8x128xf32>
    %70 = arith.mulf %69, %68 : vector<8x128xf32>
    %cst_31 = arith.constant 5.000000e-01 : f32
    %71 = vector.broadcast %cst_31 : f32 to vector<8x128xf32>
    %72 = arith.addf %70, %71 : vector<8x128xf32>
    %73 = vector.extract_strided_slice %64 {offsets = [0, 128], sizes = [8, 128], strides = [1, 1]} : vector<8x512xf32> to vector<8x128xf32>
    %cst_32 = arith.constant 5.000000e-01 : f32
    %74 = vector.broadcast %cst_32 : f32 to vector<8x128xf32>
    %75 = arith.mulf %74, %73 : vector<8x128xf32>
    %76 = math.tanh %75 : vector<8x128xf32>
    %cst_33 = arith.constant 5.000000e-01 : f32
    %77 = vector.broadcast %cst_33 : f32 to vector<8x128xf32>
    %78 = arith.mulf %77, %76 : vector<8x128xf32>
    %cst_34 = arith.constant 5.000000e-01 : f32
    %79 = vector.broadcast %cst_34 : f32 to vector<8x128xf32>
    %80 = arith.addf %78, %79 : vector<8x128xf32>
    %81 = vector.extract_strided_slice %64 {offsets = [0, 256], sizes = [8, 128], strides = [1, 1]} : vector<8x512xf32> to vector<8x128xf32>
    %82 = math.tanh %81 : vector<8x128xf32>
    %83 = vector.extract_strided_slice %64 {offsets = [0, 384], sizes = [8, 128], strides = [1, 1]} : vector<8x512xf32> to vector<8x128xf32>
    %cst_35 = arith.constant 5.000000e-01 : f32
    %84 = vector.broadcast %cst_35 : f32 to vector<8x128xf32>
    %85 = arith.mulf %84, %83 : vector<8x128xf32>
    %86 = math.tanh %85 : vector<8x128xf32>
    %cst_36 = arith.constant 5.000000e-01 : f32
    %87 = vector.broadcast %cst_36 : f32 to vector<8x128xf32>
    %88 = arith.mulf %87, %86 : vector<8x128xf32>
    %cst_37 = arith.constant 5.000000e-01 : f32
    %89 = vector.broadcast %cst_37 : f32 to vector<8x128xf32>
    %90 = arith.addf %88, %89 : vector<8x128xf32>
    %91 = arith.mulf %80, %46 : vector<8x128xf32>
    %92 = arith.mulf %72, %82 : vector<8x128xf32>
    %93 = arith.addf %91, %92 : vector<8x128xf32>
    %94 = math.tanh %93 : vector<8x128xf32>
    %95 = arith.mulf %90, %94 : vector<8x128xf32>
    %96 = arith.truncf %95 : vector<8x128xf32> to vector<8x128xbf16>
    %c0_38 = arith.constant 0 : index
    %97 = arith.index_cast %57 : i32 to index
    %c0_39 = arith.constant 0 : index
    %c0_40 = arith.constant 0 : index
    %98 = vector.load %arg4[%c0_38, %97, %c0_39, %c0_40] : memref<1x8x8x128xbf16, #tpu.memory_space<vmem>>, vector<1x1x8x128xbf16>
    %99 = vector.shape_cast %98 : vector<1x1x8x128xbf16> to vector<8x128xbf16>
    %100 = vector.shape_cast %96 : vector<8x128xbf16> to vector<1x1x8x128xbf16>
    tpu.vector_store %arg4[%c0_38, %97, %c0_39, %c0_40], %100 {strides = array<i32>} : memref<1x8x8x128xbf16, #tpu.memory_space<vmem>>, vector<1x1x8x128xbf16>,
    %c2_i32_41 = arith.constant 2 : i32
    %c2_i32_42 = arith.constant 2 : i32
    %101 = arith.muli %c2_i32_42, %c2_i32_41 : i32
    %c7_i32_43 = arith.constant 7 : i32
    %102 = arith.subi %c7_i32_43, %101 : i32
    %103 = arith.muli %arg0, %102 : i32
    %104 = arith.addi %c2_i32_41, %103 : i32
    %c0_44 = arith.constant 0 : index
    %105 = arith.index_cast %104 : i32 to index
    %c0_45 = arith.constant 0 : index
    %c0_46 = arith.constant 0 : index
    %106 = vector.load %arg2[%c0_44, %105, %c0_45, %c0_46] : memref<1x8x8x512xbf16, #tpu.memory_space<vmem>>, vector<1x1x8x512xbf16>
    %107 = vector.shape_cast %106 : vector<1x1x8x512xbf16> to vector<8x512xbf16>
    %108 = arith.extf %107 : vector<8x512xbf16> to vector<8x512xf32>
    %109 = arith.truncf %95 : vector<8x128xf32> to vector<8x128xbf16>
    %cst_47 = arith.constant dense<0.000000e+00> : vector<8x512xf32>
    %110 = tpu.matmul %109, %4, %cst_47 {dimension_numbers = #tpu.dot_dimension_numbers<[1], [0], [0], [1], [0, 0, 1, 1], [], []>} : vector<8x128xbf16>, vector<128x512xbf16>, vector<8x512xf32> -> vector<8x512xf32>
    %111 = arith.addf %108, %110 : vector<8x512xf32>
    %112 = vector.extract_strided_slice %111 {offsets = [0, 0], sizes = [8, 128], strides = [1, 1]} : vector<8x512xf32> to vector<8x128xf32>
    %cst_48 = arith.constant 5.000000e-01 : f32
    %113 = vector.broadcast %cst_48 : f32 to vector<8x128xf32>
    %114 = arith.mulf %113, %112 : vector<8x128xf32>
    %115 = math.tanh %114 : vector<8x128xf32>
    %cst_49 = arith.constant 5.000000e-01 : f32
    %116 = vector.broadcast %cst_49 : f32 to vector<8x128xf32>
    %117 = arith.mulf %116, %115 : vector<8x128xf32>
    %cst_50 = arith.constant 5.000000e-01 : f32
    %118 = vector.broadcast %cst_50 : f32 to vector<8x128xf32>
    %119 = arith.addf %117, %118 : vector<8x128xf32>
    %120 = vector.extract_strided_slice %111 {offsets = [0, 128], sizes = [8, 128], strides = [1, 1]} : vector<8x512xf32> to vector<8x128xf32>
    %cst_51 = arith.constant 5.000000e-01 : f32
    %121 = vector.broadcast %cst_51 : f32 to vector<8x128xf32>
    %122 = arith.mulf %121, %120 : vector<8x128xf32>
    %123 = math.tanh %122 : vector<8x128xf32>
    %cst_52 = arith.constant 5.000000e-01 : f32
    %124 = vector.broadcast %cst_52 : f32 to vector<8x128xf32>
    %125 = arith.mulf %124, %123 : vector<8x128xf32>
    %cst_53 = arith.constant 5.000000e-01 : f32
    %126 = vector.broadcast %cst_53 : f32 to vector<8x128xf32>
    %127 = arith.addf %125, %126 : vector<8x128xf32>
    %128 = vector.extract_strided_slice %111 {offsets = [0, 256], sizes = [8, 128], strides = [1, 1]} : vector<8x512xf32> to vector<8x128xf32>
    %129 = math.tanh %128 : vector<8x128xf32>
    %130 = vector.extract_strided_slice %111 {offsets = [0, 384], sizes = [8, 128], strides = [1, 1]} : vector<8x512xf32> to vector<8x128xf32>
    %cst_54 = arith.constant 5.000000e-01 : f32
    %131 = vector.broadcast %cst_54 : f32 to vector<8x128xf32>
    %132 = arith.mulf %131, %130 : vector<8x128xf32>
    %133 = math.tanh %132 : vector<8x128xf32>
    %cst_55 = arith.constant 5.000000e-01 : f32
    %134 = vector.broadcast %cst_55 : f32 to vector<8x128xf32>
    %135 = arith.mulf %134, %133 : vector<8x128xf32>
    %cst_56 = arith.constant 5.000000e-01 : f32
    %136 = vector.broadcast %cst_56 : f32 to vector<8x128xf32>
    %137 = arith.addf %135, %136 : vector<8x128xf32>
    %138 = arith.mulf %127, %93 : vector<8x128xf32>
    %139 = arith.mulf %119, %129 : vector<8x128xf32>
    %140 = arith.addf %138, %139 : vector<8x128xf32>
    %141 = math.tanh %140 : vector<8x128xf32>
    %142 = arith.mulf %137, %141 : vector<8x128xf32>
    %143 = arith.truncf %142 : vector<8x128xf32> to vector<8x128xbf16>
    %c0_57 = arith.constant 0 : index
    %144 = arith.index_cast %104 : i32 to index
    %c0_58 = arith.constant 0 : index
    %c0_59 = arith.constant 0 : index
    %145 = vector.load %arg4[%c0_57, %144, %c0_58, %c0_59] : memref<1x8x8x128xbf16, #tpu.memory_space<vmem>>, vector<1x1x8x128xbf16>
    %146 = vector.shape_cast %145 : vector<1x1x8x128xbf16> to vector<8x128xbf16>
    %147 = vector.shape_cast %143 : vector<8x128xbf16> to vector<1x1x8x128xbf16>
    tpu.vector_store %arg4[%c0_57, %144, %c0_58, %c0_59], %147 {strides = array<i32>} : memref<1x8x8x128xbf16, #tpu.memory_space<vmem>>, vector<1x1x8x128xbf16>,
    %c3_i32 = arith.constant 3 : i32
    %c2_i32_60 = arith.constant 2 : i32
    %148 = arith.muli %c2_i32_60, %c3_i32 : i32
    %c7_i32_61 = arith.constant 7 : i32
    %149 = arith.subi %c7_i32_61, %148 : i32
    %150 = arith.muli %arg0, %149 : i32
    %151 = arith.addi %c3_i32, %150 : i32
    %c0_62 = arith.constant 0 : index
    %152 = arith.index_cast %151 : i32 to index
    %c0_63 = arith.constant 0 : index
    %c0_64 = arith.constant 0 : index
    %153 = vector.load %arg2[%c0_62, %152, %c0_63, %c0_64] : memref<1x8x8x512xbf16, #tpu.memory_space<vmem>>, vector<1x1x8x512xbf16>
    %154 = vector.shape_cast %153 : vector<1x1x8x512xbf16> to vector<8x512xbf16>
    %155 = arith.extf %154 : vector<8x512xbf16> to vector<8x512xf32>
    %156 = arith.truncf %142 : vector<8x128xf32> to vector<8x128xbf16>
    %cst_65 = arith.constant dense<0.000000e+00> : vector<8x512xf32>
    %157 = tpu.matmul %156, %4, %cst_65 {dimension_numbers = #tpu.dot_dimension_numbers<[1], [0], [0], [1], [0, 0, 1, 1], [], []>} : vector<8x128xbf16>, vector<128x512xbf16>, vector<8x512xf32> -> vector<8x512xf32>
    %158 = arith.addf %155, %157 : vector<8x512xf32>
    %159 = vector.extract_strided_slice %158 {offsets = [0, 0], sizes = [8, 128], strides = [1, 1]} : vector<8x512xf32> to vector<8x128xf32>
    %cst_66 = arith.constant 5.000000e-01 : f32
    %160 = vector.broadcast %cst_66 : f32 to vector<8x128xf32>
    %161 = arith.mulf %160, %159 : vector<8x128xf32>
    %162 = math.tanh %161 : vector<8x128xf32>
    %cst_67 = arith.constant 5.000000e-01 : f32
    %163 = vector.broadcast %cst_67 : f32 to vector<8x128xf32>
    %164 = arith.mulf %163, %162 : vector<8x128xf32>
    %cst_68 = arith.constant 5.000000e-01 : f32
    %165 = vector.broadcast %cst_68 : f32 to vector<8x128xf32>
    %166 = arith.addf %164, %165 : vector<8x128xf32>
    %167 = vector.extract_strided_slice %158 {offsets = [0, 128], sizes = [8, 128], strides = [1, 1]} : vector<8x512xf32> to vector<8x128xf32>
    %cst_69 = arith.constant 5.000000e-01 : f32
    %168 = vector.broadcast %cst_69 : f32 to vector<8x128xf32>
    %169 = arith.mulf %168, %167 : vector<8x128xf32>
    %170 = math.tanh %169 : vector<8x128xf32>
    %cst_70 = arith.constant 5.000000e-01 : f32
    %171 = vector.broadcast %cst_70 : f32 to vector<8x128xf32>
    %172 = arith.mulf %171, %170 : vector<8x128xf32>
    %cst_71 = arith.constant 5.000000e-01 : f32
    %173 = vector.broadcast %cst_71 : f32 to vector<8x128xf32>
    %174 = arith.addf %172, %173 : vector<8x128xf32>
    %175 = vector.extract_strided_slice %158 {offsets = [0, 256], sizes = [8, 128], strides = [1, 1]} : vector<8x512xf32> to vector<8x128xf32>
    %176 = math.tanh %175 : vector<8x128xf32>
    %177 = vector.extract_strided_slice %158 {offsets = [0, 384], sizes = [8, 128], strides = [1, 1]} : vector<8x512xf32> to vector<8x128xf32>
    %cst_72 = arith.constant 5.000000e-01 : f32
    %178 = vector.broadcast %cst_72 : f32 to vector<8x128xf32>
    %179 = arith.mulf %178, %177 : vector<8x128xf32>
    %180 = math.tanh %179 : vector<8x128xf32>
    %cst_73 = arith.constant 5.000000e-01 : f32
    %181 = vector.broadcast %cst_73 : f32 to vector<8x128xf32>
    %182 = arith.mulf %181, %180 : vector<8x128xf32>
    %cst_74 = arith.constant 5.000000e-01 : f32
    %183 = vector.broadcast %cst_74 : f32 to vector<8x128xf32>
    %184 = arith.addf %182, %183 : vector<8x128xf32>
    %185 = arith.mulf %174, %140 : vector<8x128xf32>
    %186 = arith.mulf %166, %176 : vector<8x128xf32>
    %187 = arith.addf %185, %186 : vector<8x128xf32>
    %188 = math.tanh %187 : vector<8x128xf32>
    %189 = arith.mulf %184, %188 : vector<8x128xf32>
    %190 = arith.truncf %189 : vector<8x128xf32> to vector<8x128xbf16>
    %c0_75 = arith.constant 0 : index
    %191 = arith.index_cast %151 : i32 to index
    %c0_76 = arith.constant 0 : index
    %c0_77 = arith.constant 0 : index
    %192 = vector.load %arg4[%c0_75, %191, %c0_76, %c0_77] : memref<1x8x8x128xbf16, #tpu.memory_space<vmem>>, vector<1x1x8x128xbf16>
    %193 = vector.shape_cast %192 : vector<1x1x8x128xbf16> to vector<8x128xbf16>
    %194 = vector.shape_cast %190 : vector<8x128xbf16> to vector<1x1x8x128xbf16>
    tpu.vector_store %arg4[%c0_75, %191, %c0_76, %c0_77], %194 {strides = array<i32>} : memref<1x8x8x128xbf16, #tpu.memory_space<vmem>>, vector<1x1x8x128xbf16>,
    %c4_i32 = arith.constant 4 : i32
    %c2_i32_78 = arith.constant 2 : i32
    %195 = arith.muli %c2_i32_78, %c4_i32 : i32
    %c7_i32_79 = arith.constant 7 : i32
    %196 = arith.subi %c7_i32_79, %195 : i32
    %197 = arith.muli %arg0, %196 : i32
    %198 = arith.addi %c4_i32, %197 : i32
    %c0_80 = arith.constant 0 : index
    %199 = arith.index_cast %198 : i32 to index
    %c0_81 = arith.constant 0 : index
    %c0_82 = arith.constant 0 : index
    %200 = vector.load %arg2[%c0_80, %199, %c0_81, %c0_82] : memref<1x8x8x512xbf16, #tpu.memory_space<vmem>>, vector<1x1x8x512xbf16>
    %201 = vector.shape_cast %200 : vector<1x1x8x512xbf16> to vector<8x512xbf16>
    %202 = arith.extf %201 : vector<8x512xbf16> to vector<8x512xf32>
    %203 = arith.truncf %189 : vector<8x128xf32> to vector<8x128xbf16>
    %cst_83 = arith.constant dense<0.000000e+00> : vector<8x512xf32>
    %204 = tpu.matmul %203, %4, %cst_83 {dimension_numbers = #tpu.dot_dimension_numbers<[1], [0], [0], [1], [0, 0, 1, 1], [], []>} : vector<8x128xbf16>, vector<128x512xbf16>, vector<8x512xf32> -> vector<8x512xf32>
    %205 = arith.addf %202, %204 : vector<8x512xf32>
    %206 = vector.extract_strided_slice %205 {offsets = [0, 0], sizes = [8, 128], strides = [1, 1]} : vector<8x512xf32> to vector<8x128xf32>
    %cst_84 = arith.constant 5.000000e-01 : f32
    %207 = vector.broadcast %cst_84 : f32 to vector<8x128xf32>
    %208 = arith.mulf %207, %206 : vector<8x128xf32>
    %209 = math.tanh %208 : vector<8x128xf32>
    %cst_85 = arith.constant 5.000000e-01 : f32
    %210 = vector.broadcast %cst_85 : f32 to vector<8x128xf32>
    %211 = arith.mulf %210, %209 : vector<8x128xf32>
    %cst_86 = arith.constant 5.000000e-01 : f32
    %212 = vector.broadcast %cst_86 : f32 to vector<8x128xf32>
    %213 = arith.addf %211, %212 : vector<8x128xf32>
    %214 = vector.extract_strided_slice %205 {offsets = [0, 128], sizes = [8, 128], strides = [1, 1]} : vector<8x512xf32> to vector<8x128xf32>
    %cst_87 = arith.constant 5.000000e-01 : f32
    %215 = vector.broadcast %cst_87 : f32 to vector<8x128xf32>
    %216 = arith.mulf %215, %214 : vector<8x128xf32>
    %217 = math.tanh %216 : vector<8x128xf32>
    %cst_88 = arith.constant 5.000000e-01 : f32
    %218 = vector.broadcast %cst_88 : f32 to vector<8x128xf32>
    %219 = arith.mulf %218, %217 : vector<8x128xf32>
    %cst_89 = arith.constant 5.000000e-01 : f32
    %220 = vector.broadcast %cst_89 : f32 to vector<8x128xf32>
    %221 = arith.addf %219, %220 : vector<8x128xf32>
    %222 = vector.extract_strided_slice %205 {offsets = [0, 256], sizes = [8, 128], strides = [1, 1]} : vector<8x512xf32> to vector<8x128xf32>
    %223 = math.tanh %222 : vector<8x128xf32>
    %224 = vector.extract_strided_slice %205 {offsets = [0, 384], sizes = [8, 128], strides = [1, 1]} : vector<8x512xf32> to vector<8x128xf32>
    %cst_90 = arith.constant 5.000000e-01 : f32
    %225 = vector.broadcast %cst_90 : f32 to vector<8x128xf32>
    %226 = arith.mulf %225, %224 : vector<8x128xf32>
    %227 = math.tanh %226 : vector<8x128xf32>
    %cst_91 = arith.constant 5.000000e-01 : f32
    %228 = vector.broadcast %cst_91 : f32 to vector<8x128xf32>
    %229 = arith.mulf %228, %227 : vector<8x128xf32>
    %cst_92 = arith.constant 5.000000e-01 : f32
    %230 = vector.broadcast %cst_92 : f32 to vector<8x128xf32>
    %231 = arith.addf %229, %230 : vector<8x128xf32>
    %232 = arith.mulf %221, %187 : vector<8x128xf32>
    %233 = arith.mulf %213, %223 : vector<8x128xf32>
    %234 = arith.addf %232, %233 : vector<8x128xf32>
    %235 = math.tanh %234 : vector<8x128xf32>
    %236 = arith.mulf %231, %235 : vector<8x128xf32>
    %237 = arith.truncf %236 : vector<8x128xf32> to vector<8x128xbf16>
    %c0_93 = arith.constant 0 : index
    %238 = arith.index_cast %198 : i32 to index
    %c0_94 = arith.constant 0 : index
    %c0_95 = arith.constant 0 : index
    %239 = vector.load %arg4[%c0_93, %238, %c0_94, %c0_95] : memref<1x8x8x128xbf16, #tpu.memory_space<vmem>>, vector<1x1x8x128xbf16>
    %240 = vector.shape_cast %239 : vector<1x1x8x128xbf16> to vector<8x128xbf16>
    %241 = vector.shape_cast %237 : vector<8x128xbf16> to vector<1x1x8x128xbf16>
    tpu.vector_store %arg4[%c0_93, %238, %c0_94, %c0_95], %241 {strides = array<i32>} : memref<1x8x8x128xbf16, #tpu.memory_space<vmem>>, vector<1x1x8x128xbf16>,
    %c5_i32 = arith.constant 5 : i32
    %c2_i32_96 = arith.constant 2 : i32
    %242 = arith.muli %c2_i32_96, %c5_i32 : i32
    %c7_i32_97 = arith.constant 7 : i32
    %243 = arith.subi %c7_i32_97, %242 : i32
    %244 = arith.muli %arg0, %243 : i32
    %245 = arith.addi %c5_i32, %244 : i32
    %c0_98 = arith.constant 0 : index
    %246 = arith.index_cast %245 : i32 to index
    %c0_99 = arith.constant 0 : index
    %c0_100 = arith.constant 0 : index
    %247 = vector.load %arg2[%c0_98, %246, %c0_99, %c0_100] : memref<1x8x8x512xbf16, #tpu.memory_space<vmem>>, vector<1x1x8x512xbf16>
    %248 = vector.shape_cast %247 : vector<1x1x8x512xbf16> to vector<8x512xbf16>
    %249 = arith.extf %248 : vector<8x512xbf16> to vector<8x512xf32>
    %250 = arith.truncf %236 : vector<8x128xf32> to vector<8x128xbf16>
    %cst_101 = arith.constant dense<0.000000e+00> : vector<8x512xf32>
    %251 = tpu.matmul %250, %4, %cst_101 {dimension_numbers = #tpu.dot_dimension_numbers<[1], [0], [0], [1], [0, 0, 1, 1], [], []>} : vector<8x128xbf16>, vector<128x512xbf16>, vector<8x512xf32> -> vector<8x512xf32>
    %252 = arith.addf %249, %251 : vector<8x512xf32>
    %253 = vector.extract_strided_slice %252 {offsets = [0, 0], sizes = [8, 128], strides = [1, 1]} : vector<8x512xf32> to vector<8x128xf32>
    %cst_102 = arith.constant 5.000000e-01 : f32
    %254 = vector.broadcast %cst_102 : f32 to vector<8x128xf32>
    %255 = arith.mulf %254, %253 : vector<8x128xf32>
    %256 = math.tanh %255 : vector<8x128xf32>
    %cst_103 = arith.constant 5.000000e-01 : f32
    %257 = vector.broadcast %cst_103 : f32 to vector<8x128xf32>
    %258 = arith.mulf %257, %256 : vector<8x128xf32>
    %cst_104 = arith.constant 5.000000e-01 : f32
    %259 = vector.broadcast %cst_104 : f32 to vector<8x128xf32>
    %260 = arith.addf %258, %259 : vector<8x128xf32>
    %261 = vector.extract_strided_slice %252 {offsets = [0, 128], sizes = [8, 128], strides = [1, 1]} : vector<8x512xf32> to vector<8x128xf32>
    %cst_105 = arith.constant 5.000000e-01 : f32
    %262 = vector.broadcast %cst_105 : f32 to vector<8x128xf32>
    %263 = arith.mulf %262, %261 : vector<8x128xf32>
    %264 = math.tanh %263 : vector<8x128xf32>
    %cst_106 = arith.constant 5.000000e-01 : f32
    %265 = vector.broadcast %cst_106 : f32 to vector<8x128xf32>
    %266 = arith.mulf %265, %264 : vector<8x128xf32>
    %cst_107 = arith.constant 5.000000e-01 : f32
    %267 = vector.broadcast %cst_107 : f32 to vector<8x128xf32>
    %268 = arith.addf %266, %267 : vector<8x128xf32>
    %269 = vector.extract_strided_slice %252 {offsets = [0, 256], sizes = [8, 128], strides = [1, 1]} : vector<8x512xf32> to vector<8x128xf32>
    %270 = math.tanh %269 : vector<8x128xf32>
    %271 = vector.extract_strided_slice %252 {offsets = [0, 384], sizes = [8, 128], strides = [1, 1]} : vector<8x512xf32> to vector<8x128xf32>
    %cst_108 = arith.constant 5.000000e-01 : f32
    %272 = vector.broadcast %cst_108 : f32 to vector<8x128xf32>
    %273 = arith.mulf %272, %271 : vector<8x128xf32>
    %274 = math.tanh %273 : vector<8x128xf32>
    %cst_109 = arith.constant 5.000000e-01 : f32
    %275 = vector.broadcast %cst_109 : f32 to vector<8x128xf32>
    %276 = arith.mulf %275, %274 : vector<8x128xf32>
    %cst_110 = arith.constant 5.000000e-01 : f32
    %277 = vector.broadcast %cst_110 : f32 to vector<8x128xf32>
    %278 = arith.addf %276, %277 : vector<8x128xf32>
    %279 = arith.mulf %268, %234 : vector<8x128xf32>
    %280 = arith.mulf %260, %270 : vector<8x128xf32>
    %281 = arith.addf %279, %280 : vector<8x128xf32>
    %282 = math.tanh %281 : vector<8x128xf32>
    %283 = arith.mulf %278, %282 : vector<8x128xf32>
    %284 = arith.truncf %283 : vector<8x128xf32> to vector<8x128xbf16>
    %c0_111 = arith.constant 0 : index
    %285 = arith.index_cast %245 : i32 to index
    %c0_112 = arith.constant 0 : index
    %c0_113 = arith.constant 0 : index
    %286 = vector.load %arg4[%c0_111, %285, %c0_112, %c0_113] : memref<1x8x8x128xbf16, #tpu.memory_space<vmem>>, vector<1x1x8x128xbf16>
    %287 = vector.shape_cast %286 : vector<1x1x8x128xbf16> to vector<8x128xbf16>
    %288 = vector.shape_cast %284 : vector<8x128xbf16> to vector<1x1x8x128xbf16>
    tpu.vector_store %arg4[%c0_111, %285, %c0_112, %c0_113], %288 {strides = array<i32>} : memref<1x8x8x128xbf16, #tpu.memory_space<vmem>>, vector<1x1x8x128xbf16>,
    %c6_i32 = arith.constant 6 : i32
    %c2_i32_114 = arith.constant 2 : i32
    %289 = arith.muli %c2_i32_114, %c6_i32 : i32
    %c7_i32_115 = arith.constant 7 : i32
    %290 = arith.subi %c7_i32_115, %289 : i32
    %291 = arith.muli %arg0, %290 : i32
    %292 = arith.addi %c6_i32, %291 : i32
    %c0_116 = arith.constant 0 : index
    %293 = arith.index_cast %292 : i32 to index
    %c0_117 = arith.constant 0 : index
    %c0_118 = arith.constant 0 : index
    %294 = vector.load %arg2[%c0_116, %293, %c0_117, %c0_118] : memref<1x8x8x512xbf16, #tpu.memory_space<vmem>>, vector<1x1x8x512xbf16>
    %295 = vector.shape_cast %294 : vector<1x1x8x512xbf16> to vector<8x512xbf16>
    %296 = arith.extf %295 : vector<8x512xbf16> to vector<8x512xf32>
    %297 = arith.truncf %283 : vector<8x128xf32> to vector<8x128xbf16>
    %cst_119 = arith.constant dense<0.000000e+00> : vector<8x512xf32>
    %298 = tpu.matmul %297, %4, %cst_119 {dimension_numbers = #tpu.dot_dimension_numbers<[1], [0], [0], [1], [0, 0, 1, 1], [], []>} : vector<8x128xbf16>, vector<128x512xbf16>, vector<8x512xf32> -> vector<8x512xf32>
    %299 = arith.addf %296, %298 : vector<8x512xf32>
    %300 = vector.extract_strided_slice %299 {offsets = [0, 0], sizes = [8, 128], strides = [1, 1]} : vector<8x512xf32> to vector<8x128xf32>
    %cst_120 = arith.constant 5.000000e-01 : f32
    %301 = vector.broadcast %cst_120 : f32 to vector<8x128xf32>
    %302 = arith.mulf %301, %300 : vector<8x128xf32>
    %303 = math.tanh %302 : vector<8x128xf32>
    %cst_121 = arith.constant 5.000000e-01 : f32
    %304 = vector.broadcast %cst_121 : f32 to vector<8x128xf32>
    %305 = arith.mulf %304, %303 : vector<8x128xf32>
    %cst_122 = arith.constant 5.000000e-01 : f32
    %306 = vector.broadcast %cst_122 : f32 to vector<8x128xf32>
    %307 = arith.addf %305, %306 : vector<8x128xf32>
    %308 = vector.extract_strided_slice %299 {offsets = [0, 128], sizes = [8, 128], strides = [1, 1]} : vector<8x512xf32> to vector<8x128xf32>
    %cst_123 = arith.constant 5.000000e-01 : f32
    %309 = vector.broadcast %cst_123 : f32 to vector<8x128xf32>
    %310 = arith.mulf %309, %308 : vector<8x128xf32>
    %311 = math.tanh %310 : vector<8x128xf32>
    %cst_124 = arith.constant 5.000000e-01 : f32
    %312 = vector.broadcast %cst_124 : f32 to vector<8x128xf32>
    %313 = arith.mulf %312, %311 : vector<8x128xf32>
    %cst_125 = arith.constant 5.000000e-01 : f32
    %314 = vector.broadcast %cst_125 : f32 to vector<8x128xf32>
    %315 = arith.addf %313, %314 : vector<8x128xf32>
    %316 = vector.extract_strided_slice %299 {offsets = [0, 256], sizes = [8, 128], strides = [1, 1]} : vector<8x512xf32> to vector<8x128xf32>
    %317 = math.tanh %316 : vector<8x128xf32>
    %318 = vector.extract_strided_slice %299 {offsets = [0, 384], sizes = [8, 128], strides = [1, 1]} : vector<8x512xf32> to vector<8x128xf32>
    %cst_126 = arith.constant 5.000000e-01 : f32
    %319 = vector.broadcast %cst_126 : f32 to vector<8x128xf32>
    %320 = arith.mulf %319, %318 : vector<8x128xf32>
    %321 = math.tanh %320 : vector<8x128xf32>
    %cst_127 = arith.constant 5.000000e-01 : f32
    %322 = vector.broadcast %cst_127 : f32 to vector<8x128xf32>
    %323 = arith.mulf %322, %321 : vector<8x128xf32>
    %cst_128 = arith.constant 5.000000e-01 : f32
    %324 = vector.broadcast %cst_128 : f32 to vector<8x128xf32>
    %325 = arith.addf %323, %324 : vector<8x128xf32>
    %326 = arith.mulf %315, %281 : vector<8x128xf32>
    %327 = arith.mulf %307, %317 : vector<8x128xf32>
    %328 = arith.addf %326, %327 : vector<8x128xf32>
    %329 = math.tanh %328 : vector<8x128xf32>
    %330 = arith.mulf %325, %329 : vector<8x128xf32>
    %331 = arith.truncf %330 : vector<8x128xf32> to vector<8x128xbf16>
    %c0_129 = arith.constant 0 : index
    %332 = arith.index_cast %292 : i32 to index
    %c0_130 = arith.constant 0 : index
    %c0_131 = arith.constant 0 : index
    %333 = vector.load %arg4[%c0_129, %332, %c0_130, %c0_131] : memref<1x8x8x128xbf16, #tpu.memory_space<vmem>>, vector<1x1x8x128xbf16>
    %334 = vector.shape_cast %333 : vector<1x1x8x128xbf16> to vector<8x128xbf16>
    %335 = vector.shape_cast %331 : vector<8x128xbf16> to vector<1x1x8x128xbf16>
    tpu.vector_store %arg4[%c0_129, %332, %c0_130, %c0_131], %335 {strides = array<i32>} : memref<1x8x8x128xbf16, #tpu.memory_space<vmem>>, vector<1x1x8x128xbf16>,
    %c7_i32_132 = arith.constant 7 : i32
    %c2_i32_133 = arith.constant 2 : i32
    %336 = arith.muli %c2_i32_133, %c7_i32_132 : i32
    %c7_i32_134 = arith.constant 7 : i32
    %337 = arith.subi %c7_i32_134, %336 : i32
    %338 = arith.muli %arg0, %337 : i32
    %339 = arith.addi %c7_i32_132, %338 : i32
    %c0_135 = arith.constant 0 : index
    %340 = arith.index_cast %339 : i32 to index
    %c0_136 = arith.constant 0 : index
    %c0_137 = arith.constant 0 : index
    %341 = vector.load %arg2[%c0_135, %340, %c0_136, %c0_137] : memref<1x8x8x512xbf16, #tpu.memory_space<vmem>>, vector<1x1x8x512xbf16>
    %342 = vector.shape_cast %341 : vector<1x1x8x512xbf16> to vector<8x512xbf16>
    %343 = arith.extf %342 : vector<8x512xbf16> to vector<8x512xf32>
    %344 = arith.truncf %330 : vector<8x128xf32> to vector<8x128xbf16>
    %cst_138 = arith.constant dense<0.000000e+00> : vector<8x512xf32>
    %345 = tpu.matmul %344, %4, %cst_138 {dimension_numbers = #tpu.dot_dimension_numbers<[1], [0], [0], [1], [0, 0, 1, 1], [], []>} : vector<8x128xbf16>, vector<128x512xbf16>, vector<8x512xf32> -> vector<8x512xf32>
    %346 = arith.addf %343, %345 : vector<8x512xf32>
    %347 = vector.extract_strided_slice %346 {offsets = [0, 0], sizes = [8, 128], strides = [1, 1]} : vector<8x512xf32> to vector<8x128xf32>
    %cst_139 = arith.constant 5.000000e-01 : f32
    %348 = vector.broadcast %cst_139 : f32 to vector<8x128xf32>
    %349 = arith.mulf %348, %347 : vector<8x128xf32>
    %350 = math.tanh %349 : vector<8x128xf32>
    %cst_140 = arith.constant 5.000000e-01 : f32
    %351 = vector.broadcast %cst_140 : f32 to vector<8x128xf32>
    %352 = arith.mulf %351, %350 : vector<8x128xf32>
    %cst_141 = arith.constant 5.000000e-01 : f32
    %353 = vector.broadcast %cst_141 : f32 to vector<8x128xf32>
    %354 = arith.addf %352, %353 : vector<8x128xf32>
    %355 = vector.extract_strided_slice %346 {offsets = [0, 128], sizes = [8, 128], strides = [1, 1]} : vector<8x512xf32> to vector<8x128xf32>
    %cst_142 = arith.constant 5.000000e-01 : f32
    %356 = vector.broadcast %cst_142 : f32 to vector<8x128xf32>
    %357 = arith.mulf %356, %355 : vector<8x128xf32>
    %358 = math.tanh %357 : vector<8x128xf32>
    %cst_143 = arith.constant 5.000000e-01 : f32
    %359 = vector.broadcast %cst_143 : f32 to vector<8x128xf32>
    %360 = arith.mulf %359, %358 : vector<8x128xf32>
    %cst_144 = arith.constant 5.000000e-01 : f32
    %361 = vector.broadcast %cst_144 : f32 to vector<8x128xf32>
    %362 = arith.addf %360, %361 : vector<8x128xf32>
    %363 = vector.extract_strided_slice %346 {offsets = [0, 256], sizes = [8, 128], strides = [1, 1]} : vector<8x512xf32> to vector<8x128xf32>
    %364 = math.tanh %363 : vector<8x128xf32>
    %365 = vector.extract_strided_slice %346 {offsets = [0, 384], sizes = [8, 128], strides = [1, 1]} : vector<8x512xf32> to vector<8x128xf32>
    %cst_145 = arith.constant 5.000000e-01 : f32
    %366 = vector.broadcast %cst_145 : f32 to vector<8x128xf32>
    %367 = arith.mulf %366, %365 : vector<8x128xf32>
    %368 = math.tanh %367 : vector<8x128xf32>
    %cst_146 = arith.constant 5.000000e-01 : f32
    %369 = vector.broadcast %cst_146 : f32 to vector<8x128xf32>
    %370 = arith.mulf %369, %368 : vector<8x128xf32>
    %cst_147 = arith.constant 5.000000e-01 : f32
    %371 = vector.broadcast %cst_147 : f32 to vector<8x128xf32>
    %372 = arith.addf %370, %371 : vector<8x128xf32>
    %373 = arith.mulf %362, %328 : vector<8x128xf32>
    %374 = arith.mulf %354, %364 : vector<8x128xf32>
    %375 = arith.addf %373, %374 : vector<8x128xf32>
    %376 = math.tanh %375 : vector<8x128xf32>
    %377 = arith.mulf %372, %376 : vector<8x128xf32>
    %378 = arith.truncf %377 : vector<8x128xf32> to vector<8x128xbf16>
    %c0_148 = arith.constant 0 : index
    %379 = arith.index_cast %339 : i32 to index
    %c0_149 = arith.constant 0 : index
    %c0_150 = arith.constant 0 : index
    %380 = vector.load %arg4[%c0_148, %379, %c0_149, %c0_150] : memref<1x8x8x128xbf16, #tpu.memory_space<vmem>>, vector<1x1x8x128xbf16>
    %381 = vector.shape_cast %380 : vector<1x1x8x128xbf16> to vector<8x128xbf16>
    %382 = vector.shape_cast %378 : vector<8x128xbf16> to vector<1x1x8x128xbf16>
    tpu.vector_store %arg4[%c0_148, %379, %c0_149, %c0_150], %382 {strides = array<i32>} : memref<1x8x8x128xbf16, #tpu.memory_space<vmem>>, vector<1x1x8x128xbf16>,
    %c8_i32 = arith.constant 8 : i32
    %c0_151 = arith.constant 0 : index
    %c0_152 = arith.constant 0 : index
    %383 = vector.load %arg7[%c0_151, %c0_152] : memref<8x128xf32, #tpu.memory_space<vmem>>, vector<8x128xf32>
    tpu.vector_store %arg7[%c0_151, %c0_152], %377 {strides = array<i32>} : memref<8x128xf32, #tpu.memory_space<vmem>>, vector<8x128xf32>,
    %c0_153 = arith.constant 0 : index
    %c0_154 = arith.constant 0 : index
    %384 = vector.load %arg8[%c0_153, %c0_154] : memref<8x128xf32, #tpu.memory_space<vmem>>, vector<8x128xf32>
    tpu.vector_store %arg8[%c0_153, %c0_154], %375 {strides = array<i32>} : memref<8x128xf32, #tpu.memory_space<vmem>>, vector<8x128xf32>,
    %c0_i32_155 = arith.constant 0 : i32
    %385 = arith.cmpi eq, %arg1, %c0_i32_155 : i32
    %386 = arith.extui %385 : i1 to i32
    %c0_i32_156 = arith.constant 0 : i32
    %387 = arith.cmpi ne, %386, %c0_i32_156 : i32
    scf.if %387 {
      %c0_157 = arith.constant 0 : index
      %c0_158 = arith.constant 0 : index
      %c0_159 = arith.constant 0 : index
      %388 = vector.load %arg5[%c0_157, %c0_158, %c0_159] : memref<1x8x128xf32, #tpu.memory_space<vmem>>, vector<1x8x128xf32>
      %389 = vector.shape_cast %388 : vector<1x8x128xf32> to vector<8x128xf32>
      %390 = vector.shape_cast %377 : vector<8x128xf32> to vector<1x8x128xf32>
      tpu.vector_store %arg5[%c0_157, %c0_158, %c0_159], %390 {strides = array<i32>} : memref<1x8x128xf32, #tpu.memory_space<vmem>>, vector<1x8x128xf32>,
      %c0_160 = arith.constant 0 : index
      %c0_161 = arith.constant 0 : index
      %c0_162 = arith.constant 0 : index
      %391 = vector.load %arg6[%c0_160, %c0_161, %c0_162] : memref<1x8x128xf32, #tpu.memory_space<vmem>>, vector<1x8x128xf32>
      %392 = vector.shape_cast %391 : vector<1x8x128xf32> to vector<8x128xf32>
      %393 = vector.shape_cast %375 : vector<8x128xf32> to vector<1x8x128xf32>
      tpu.vector_store %arg6[%c0_160, %c0_161, %c0_162], %393 {strides = array<i32>} : memref<1x8x128xf32, #tpu.memory_space<vmem>>, vector<1x8x128xf32>,
    } else {
    }
    return
  }
  func.func @transform_0(%arg0: i32, %arg1: i32) -> (i32, i32, i32, i32) {
    %c2_i32 = arith.constant 2 : i32
    %0 = arith.muli %c2_i32, %arg1 : i32
    %c0_i32 = arith.constant 0 : i32
    %1 = arith.subi %c0_i32, %0 : i32
    %2 = arith.muli %arg0, %1 : i32
    %3 = arith.addi %arg1, %2 : i32
    %c0_i32_0 = arith.constant 0 : i32
    %c0_i32_1 = arith.constant 0 : i32
    %c0_i32_2 = arith.constant 0 : i32
    return %arg0, %3, %c0_i32_0, %c0_i32_1 : i32, i32, i32, i32
  }
  func.func @transform_1(%arg0: i32, %arg1: i32) -> (i32, i32, i32) {
    %c0_i32 = arith.constant 0 : i32
    %c0_i32_0 = arith.constant 0 : i32
    %c0_i32_1 = arith.constant 0 : i32
    return %arg0, %c0_i32, %c0_i32_0 : i32, i32, i32
  }
  func.func @transform_2(%arg0: i32, %arg1: i32) -> (i32, i32, i32, i32) {
    %c2_i32 = arith.constant 2 : i32
    %0 = arith.muli %c2_i32, %arg1 : i32
    %c0_i32 = arith.constant 0 : i32
    %1 = arith.subi %c0_i32, %0 : i32
    %2 = arith.muli %arg0, %1 : i32
    %3 = arith.addi %arg1, %2 : i32
    %c0_i32_0 = arith.constant 0 : i32
    %c0_i32_1 = arith.constant 0 : i32
    %c0_i32_2 = arith.constant 0 : i32
    return %arg0, %3, %c0_i32_0, %c0_i32_1 : i32, i32, i32, i32
  }
  func.func @transform_3(%arg0: i32, %arg1: i32) -> (i32, i32, i32) {
    %c0_i32 = arith.constant 0 : i32
    %c0_i32_0 = arith.constant 0 : i32
    %c0_i32_1 = arith.constant 0 : i32
    return %arg0, %c0_i32, %c0_i32_0 : i32, i32, i32
  }
  func.func @transform_4(%arg0: i32, %arg1: i32) -> (i32, i32, i32) {
    %c0_i32 = arith.constant 0 : i32
    %c0_i32_0 = arith.constant 0 : i32
    %c0_i32_1 = arith.constant 0 : i32
    return %arg0, %c0_i32, %c0_i32_0 : i32, i32, i32
  }
}

module attributes {stable_mosaic.version = 11 : i64} {
  func.func @_bidir_lstm_kernel(%arg0: i32, %arg1: i32, %arg2: memref<1x8x8x512xbf16, #tpu.memory_space<vmem>>, %arg3: memref<1x128x512xbf16, #tpu.memory_space<vmem>>, %arg4: memref<1x8x8x128xbf16, #tpu.memory_space<vmem>>, %arg5: memref<1x8x128xf32, #tpu.memory_space<vmem>>, %arg6: memref<1x8x128xf32, #tpu.memory_space<vmem>>, %arg7: memref<8x128xf32, #tpu.memory_space<vmem>>, %arg8: memref<8x128xf32, #tpu.memory_space<vmem>>) attributes {dimension_semantics = [#tpu.dimension_semantics<parallel>, #tpu.dimension_semantics<arbitrary>], iteration_bounds = array<i64: 2, 1>, scalar_prefetch = 0 : i64, scratch_operands = 2 : i64, tpu.core_type = #tpu.core_type<tc>, window_params = [{transform_indices = @transform_0, window_bounds = array<i64: 1, 8, 8, 512>}, {pipeline_mode = #tpu.pipeline_mode<synchronous>, transform_indices = @transform_1, window_bounds = array<i64: 1, 128, 512>}, {transform_indices = @transform_2, window_bounds = array<i64: 1, 8, 8, 128>}, {transform_indices = @transform_3, window_bounds = array<i64: 1, 8, 128>}, {transform_indices = @transform_4, window_bounds = array<i64: 1, 8, 128>}]} {
    %c0_i32 = arith.constant 0 : i32
    %0 = arith.cmpi eq, %arg1, %c0_i32 : i32
    %1 = arith.extui %0 : i1 to i32
    %c0_i32_0 = arith.constant 0 : i32
    %2 = arith.cmpi ne, %1, %c0_i32_0 : i32
    scf.if %2 {
      %cst_157 = arith.constant 0.000000e+00 : f32
      %388 = vector.broadcast %cst_157 : f32 to vector<8x128xf32>
      %c0_158 = arith.constant 0 : index
      %c0_159 = arith.constant 0 : index
      %389 = vector.load %arg7[%c0_158, %c0_159] : memref<8x128xf32, #tpu.memory_space<vmem>>, vector<8x128xf32>
      tpu.vector_store %arg7[%c0_158, %c0_159], %388 {strides = array<i32>} : memref<8x128xf32, #tpu.memory_space<vmem>>, vector<8x128xf32>,
      %cst_160 = arith.constant 0.000000e+00 : f32
      %390 = vector.broadcast %cst_160 : f32 to vector<8x128xf32>
      %c0_161 = arith.constant 0 : index
      %c0_162 = arith.constant 0 : index
      %391 = vector.load %arg8[%c0_161, %c0_162] : memref<8x128xf32, #tpu.memory_space<vmem>>, vector<8x128xf32>
      tpu.vector_store %arg8[%c0_161, %c0_162], %390 {strides = array<i32>} : memref<8x128xf32, #tpu.memory_space<vmem>>, vector<8x128xf32>,
    } else {
    }
    %c0 = arith.constant 0 : index
    %c0_1 = arith.constant 0 : index
    %c0_2 = arith.constant 0 : index
    %3 = vector.load %arg3[%c0, %c0_1, %c0_2] : memref<1x128x512xbf16, #tpu.memory_space<vmem>>, vector<1x128x512xbf16>
    %4 = vector.shape_cast %3 : vector<1x128x512xbf16> to vector<128x512xbf16>
    %c0_3 = arith.constant 0 : index
    %c0_4 = arith.constant 0 : index
    %5 = vector.load %arg7[%c0_3, %c0_4] : memref<8x128xf32, #tpu.memory_space<vmem>>, vector<8x128xf32>
    %c0_5 = arith.constant 0 : index
    %c0_6 = arith.constant 0 : index
    %6 = vector.load %arg8[%c0_5, %c0_6] : memref<8x128xf32, #tpu.memory_space<vmem>>, vector<8x128xf32>
    %c0_i32_7 = arith.constant 0 : i32
    %c2_i32 = arith.constant 2 : i32
    %7 = arith.muli %c2_i32, %c0_i32_7 : i32
    %c7_i32 = arith.constant 7 : i32
    %8 = arith.subi %c7_i32, %7 : i32
    %9 = arith.muli %arg0, %8 : i32
    %10 = arith.addi %c0_i32_7, %9 : i32
    %c0_8 = arith.constant 0 : index
    %11 = arith.index_cast %10 : i32 to index
    %c0_9 = arith.constant 0 : index
    %c0_10 = arith.constant 0 : index
    %12 = vector.load %arg2[%c0_8, %11, %c0_9, %c0_10] : memref<1x8x8x512xbf16, #tpu.memory_space<vmem>>, vector<1x1x8x512xbf16>
    %13 = vector.shape_cast %12 : vector<1x1x8x512xbf16> to vector<8x512xbf16>
    %14 = arith.extf %13 : vector<8x512xbf16> to vector<8x512xf32>
    %15 = arith.truncf %5 : vector<8x128xf32> to vector<8x128xbf16>
    %cst = arith.constant dense<0.000000e+00> : vector<8x512xf32>
    %16 = tpu.matmul %15, %4, %cst {dimension_numbers = #tpu.dot_dimension_numbers<[1], [0], [0], [1], [0, 0, 1, 1], [], []>} : vector<8x128xbf16>, vector<128x512xbf16>, vector<8x512xf32> -> vector<8x512xf32>
    %17 = arith.addf %14, %16 : vector<8x512xf32>
    %18 = vector.extract_strided_slice %17 {offsets = [0, 0], sizes = [8, 128], strides = [1, 1]} : vector<8x512xf32> to vector<8x128xf32>
    %cst_11 = arith.constant 5.000000e-01 : f32
    %19 = vector.broadcast %cst_11 : f32 to vector<8x128xf32>
    %20 = arith.mulf %19, %18 : vector<8x128xf32>
    %21 = math.tanh %20 : vector<8x128xf32>
    %cst_12 = arith.constant 5.000000e-01 : f32
    %22 = vector.broadcast %cst_12 : f32 to vector<8x128xf32>
    %23 = arith.mulf %22, %21 : vector<8x128xf32>
    %cst_13 = arith.constant 5.000000e-01 : f32
    %24 = vector.broadcast %cst_13 : f32 to vector<8x128xf32>
    %25 = arith.addf %23, %24 : vector<8x128xf32>
    %26 = vector.extract_strided_slice %17 {offsets = [0, 128], sizes = [8, 128], strides = [1, 1]} : vector<8x512xf32> to vector<8x128xf32>
    %cst_14 = arith.constant 5.000000e-01 : f32
    %27 = vector.broadcast %cst_14 : f32 to vector<8x128xf32>
    %28 = arith.mulf %27, %26 : vector<8x128xf32>
    %29 = math.tanh %28 : vector<8x128xf32>
    %cst_15 = arith.constant 5.000000e-01 : f32
    %30 = vector.broadcast %cst_15 : f32 to vector<8x128xf32>
    %31 = arith.mulf %30, %29 : vector<8x128xf32>
    %cst_16 = arith.constant 5.000000e-01 : f32
    %32 = vector.broadcast %cst_16 : f32 to vector<8x128xf32>
    %33 = arith.addf %31, %32 : vector<8x128xf32>
    %34 = vector.extract_strided_slice %17 {offsets = [0, 256], sizes = [8, 128], strides = [1, 1]} : vector<8x512xf32> to vector<8x128xf32>
    %35 = math.tanh %34 : vector<8x128xf32>
    %36 = vector.extract_strided_slice %17 {offsets = [0, 384], sizes = [8, 128], strides = [1, 1]} : vector<8x512xf32> to vector<8x128xf32>
    %cst_17 = arith.constant 5.000000e-01 : f32
    %37 = vector.broadcast %cst_17 : f32 to vector<8x128xf32>
    %38 = arith.mulf %37, %36 : vector<8x128xf32>
    %39 = math.tanh %38 : vector<8x128xf32>
    %cst_18 = arith.constant 5.000000e-01 : f32
    %40 = vector.broadcast %cst_18 : f32 to vector<8x128xf32>
    %41 = arith.mulf %40, %39 : vector<8x128xf32>
    %cst_19 = arith.constant 5.000000e-01 : f32
    %42 = vector.broadcast %cst_19 : f32 to vector<8x128xf32>
    %43 = arith.addf %41, %42 : vector<8x128xf32>
    %44 = arith.mulf %33, %6 : vector<8x128xf32>
    %45 = arith.mulf %25, %35 : vector<8x128xf32>
    %46 = arith.addf %44, %45 : vector<8x128xf32>
    %47 = math.tanh %46 : vector<8x128xf32>
    %48 = arith.mulf %43, %47 : vector<8x128xf32>
    %49 = arith.truncf %48 : vector<8x128xf32> to vector<8x128xbf16>
    %c0_20 = arith.constant 0 : index
    %50 = arith.index_cast %10 : i32 to index
    %c0_21 = arith.constant 0 : index
    %c0_22 = arith.constant 0 : index
    %51 = vector.load %arg4[%c0_20, %50, %c0_21, %c0_22] : memref<1x8x8x128xbf16, #tpu.memory_space<vmem>>, vector<1x1x8x128xbf16>
    %52 = vector.shape_cast %51 : vector<1x1x8x128xbf16> to vector<8x128xbf16>
    %53 = vector.shape_cast %49 : vector<8x128xbf16> to vector<1x1x8x128xbf16>
    tpu.vector_store %arg4[%c0_20, %50, %c0_21, %c0_22], %53 {strides = array<i32>} : memref<1x8x8x128xbf16, #tpu.memory_space<vmem>>, vector<1x1x8x128xbf16>,
    %c1_i32 = arith.constant 1 : i32
    %c2_i32_23 = arith.constant 2 : i32
    %54 = arith.muli %c2_i32_23, %c1_i32 : i32
    %c7_i32_24 = arith.constant 7 : i32
    %55 = arith.subi %c7_i32_24, %54 : i32
    %56 = arith.muli %arg0, %55 : i32
    %57 = arith.addi %c1_i32, %56 : i32
    %c0_25 = arith.constant 0 : index
    %58 = arith.index_cast %57 : i32 to index
    %c0_26 = arith.constant 0 : index
    %c0_27 = arith.constant 0 : index
    %59 = vector.load %arg2[%c0_25, %58, %c0_26, %c0_27] : memref<1x8x8x512xbf16, #tpu.memory_space<vmem>>, vector<1x1x8x512xbf16>
    %60 = vector.shape_cast %59 : vector<1x1x8x512xbf16> to vector<8x512xbf16>
    %61 = arith.extf %60 : vector<8x512xbf16> to vector<8x512xf32>
    %62 = arith.truncf %48 : vector<8x128xf32> to vector<8x128xbf16>
    %cst_28 = arith.constant dense<0.000000e+00> : vector<8x512xf32>
    %63 = tpu.matmul %62, %4, %cst_28 {dimension_numbers = #tpu.dot_dimension_numbers<[1], [0], [0], [1], [0, 0, 1, 1], [], []>} : vector<8x128xbf16>, vector<128x512xbf16>, vector<8x512xf32> -> vector<8x512xf32>
    %64 = arith.addf %61, %63 : vector<8x512xf32>
    %65 = vector.extract_strided_slice %64 {offsets = [0, 0], sizes = [8, 128], strides = [1, 1]} : vector<8x512xf32> to vector<8x128xf32>
    %cst_29 = arith.constant 5.000000e-01 : f32
    %66 = vector.broadcast %cst_29 : f32 to vector<8x128xf32>
    %67 = arith.mulf %66, %65 : vector<8x128xf32>
    %68 = math.tanh %67 : vector<8x128xf32>
    %cst_30 = arith.constant 5.000000e-01 : f32
    %69 = vector.broadcast %cst_30 : f32 to vector<8x128xf32>
    %70 = arith.mulf %69, %68 : vector<8x128xf32>
    %cst_31 = arith.constant 5.000000e-01 : f32
    %71 = vector.broadcast %cst_31 : f32 to vector<8x128xf32>
    %72 = arith.addf %70, %71 : vector<8x128xf32>
    %73 = vector.extract_strided_slice %64 {offsets = [0, 128], sizes = [8, 128], strides = [1, 1]} : vector<8x512xf32> to vector<8x128xf32>
    %cst_32 = arith.constant 5.000000e-01 : f32
    %74 = vector.broadcast %cst_32 : f32 to vector<8x128xf32>
    %75 = arith.mulf %74, %73 : vector<8x128xf32>
    %76 = math.tanh %75 : vector<8x128xf32>
    %cst_33 = arith.constant 5.000000e-01 : f32
    %77 = vector.broadcast %cst_33 : f32 to vector<8x128xf32>
    %78 = arith.mulf %77, %76 : vector<8x128xf32>
    %cst_34 = arith.constant 5.000000e-01 : f32
    %79 = vector.broadcast %cst_34 : f32 to vector<8x128xf32>
    %80 = arith.addf %78, %79 : vector<8x128xf32>
    %81 = vector.extract_strided_slice %64 {offsets = [0, 256], sizes = [8, 128], strides = [1, 1]} : vector<8x512xf32> to vector<8x128xf32>
    %82 = math.tanh %81 : vector<8x128xf32>
    %83 = vector.extract_strided_slice %64 {offsets = [0, 384], sizes = [8, 128], strides = [1, 1]} : vector<8x512xf32> to vector<8x128xf32>
    %cst_35 = arith.constant 5.000000e-01 : f32
    %84 = vector.broadcast %cst_35 : f32 to vector<8x128xf32>
    %85 = arith.mulf %84, %83 : vector<8x128xf32>
    %86 = math.tanh %85 : vector<8x128xf32>
    %cst_36 = arith.constant 5.000000e-01 : f32
    %87 = vector.broadcast %cst_36 : f32 to vector<8x128xf32>
    %88 = arith.mulf %87, %86 : vector<8x128xf32>
    %cst_37 = arith.constant 5.000000e-01 : f32
    %89 = vector.broadcast %cst_37 : f32 to vector<8x128xf32>
    %90 = arith.addf %88, %89 : vector<8x128xf32>
    %91 = arith.mulf %80, %46 : vector<8x128xf32>
    %92 = arith.mulf %72, %82 : vector<8x128xf32>
    %93 = arith.addf %91, %92 : vector<8x128xf32>
    %94 = math.tanh %93 : vector<8x128xf32>
    %95 = arith.mulf %90, %94 : vector<8x128xf32>
    %96 = arith.truncf %95 : vector<8x128xf32> to vector<8x128xbf16>
    %c0_38 = arith.constant 0 : index
    %97 = arith.index_cast %57 : i32 to index
    %c0_39 = arith.constant 0 : index
    %c0_40 = arith.constant 0 : index
    %98 = vector.load %arg4[%c0_38, %97, %c0_39, %c0_40] : memref<1x8x8x128xbf16, #tpu.memory_space<vmem>>, vector<1x1x8x128xbf16>
    %99 = vector.shape_cast %98 : vector<1x1x8x128xbf16> to vector<8x128xbf16>
    %100 = vector.shape_cast %96 : vector<8x128xbf16> to vector<1x1x8x128xbf16>
    tpu.vector_store %arg4[%c0_38, %97, %c0_39, %c0_40], %100 {strides = array<i32>} : memref<1x8x8x128xbf16, #tpu.memory_space<vmem>>, vector<1x1x8x128xbf16>,
    %c2_i32_41 = arith.constant 2 : i32
    %c2_i32_42 = arith.constant 2 : i32
    %101 = arith.muli %c2_i32_42, %c2_i32_41 : i32
    %c7_i32_43 = arith.constant 7 : i32
    %102 = arith.subi %c7_i32_43, %101 : i32
    %103 = arith.muli %arg0, %102 : i32
    %104 = arith.addi %c2_i32_41, %103 : i32
    %c0_44 = arith.constant 0 : index
    %105 = arith.index_cast %104 : i32 to index
    %c0_45 = arith.constant 0 : index
    %c0_46 = arith.constant 0 : index
    %106 = vector.load %arg2[%c0_44, %105, %c0_45, %c0_46] : memref<1x8x8x512xbf16, #tpu.memory_space<vmem>>, vector<1x1x8x512xbf16>
    %107 = vector.shape_cast %106 : vector<1x1x8x512xbf16> to vector<8x512xbf16>
    %108 = arith.extf %107 : vector<8x512xbf16> to vector<8x512xf32>
    %109 = arith.truncf %95 : vector<8x128xf32> to vector<8x128xbf16>
    %cst_47 = arith.constant dense<0.000000e+00> : vector<8x512xf32>
    %110 = tpu.matmul %109, %4, %cst_47 {dimension_numbers = #tpu.dot_dimension_numbers<[1], [0], [0], [1], [0, 0, 1, 1], [], []>} : vector<8x128xbf16>, vector<128x512xbf16>, vector<8x512xf32> -> vector<8x512xf32>
    %111 = arith.addf %108, %110 : vector<8x512xf32>
    %112 = vector.extract_strided_slice %111 {offsets = [0, 0], sizes = [8, 128], strides = [1, 1]} : vector<8x512xf32> to vector<8x128xf32>
    %cst_48 = arith.constant 5.000000e-01 : f32
    %113 = vector.broadcast %cst_48 : f32 to vector<8x128xf32>
    %114 = arith.mulf %113, %112 : vector<8x128xf32>
    %115 = math.tanh %114 : vector<8x128xf32>
    %cst_49 = arith.constant 5.000000e-01 : f32
    %116 = vector.broadcast %cst_49 : f32 to vector<8x128xf32>
    %117 = arith.mulf %116, %115 : vector<8x128xf32>
    %cst_50 = arith.constant 5.000000e-01 : f32
    %118 = vector.broadcast %cst_50 : f32 to vector<8x128xf32>
    %119 = arith.addf %117, %118 : vector<8x128xf32>
    %120 = vector.extract_strided_slice %111 {offsets = [0, 128], sizes = [8, 128], strides = [1, 1]} : vector<8x512xf32> to vector<8x128xf32>
    %cst_51 = arith.constant 5.000000e-01 : f32
    %121 = vector.broadcast %cst_51 : f32 to vector<8x128xf32>
    %122 = arith.mulf %121, %120 : vector<8x128xf32>
    %123 = math.tanh %122 : vector<8x128xf32>
    %cst_52 = arith.constant 5.000000e-01 : f32
    %124 = vector.broadcast %cst_52 : f32 to vector<8x128xf32>
    %125 = arith.mulf %124, %123 : vector<8x128xf32>
    %cst_53 = arith.constant 5.000000e-01 : f32
    %126 = vector.broadcast %cst_53 : f32 to vector<8x128xf32>
    %127 = arith.addf %125, %126 : vector<8x128xf32>
    %128 = vector.extract_strided_slice %111 {offsets = [0, 256], sizes = [8, 128], strides = [1, 1]} : vector<8x512xf32> to vector<8x128xf32>
    %129 = math.tanh %128 : vector<8x128xf32>
    %130 = vector.extract_strided_slice %111 {offsets = [0, 384], sizes = [8, 128], strides = [1, 1]} : vector<8x512xf32> to vector<8x128xf32>
    %cst_54 = arith.constant 5.000000e-01 : f32
    %131 = vector.broadcast %cst_54 : f32 to vector<8x128xf32>
    %132 = arith.mulf %131, %130 : vector<8x128xf32>
    %133 = math.tanh %132 : vector<8x128xf32>
    %cst_55 = arith.constant 5.000000e-01 : f32
    %134 = vector.broadcast %cst_55 : f32 to vector<8x128xf32>
    %135 = arith.mulf %134, %133 : vector<8x128xf32>
    %cst_56 = arith.constant 5.000000e-01 : f32
    %136 = vector.broadcast %cst_56 : f32 to vector<8x128xf32>
    %137 = arith.addf %135, %136 : vector<8x128xf32>
    %138 = arith.mulf %127, %93 : vector<8x128xf32>
    %139 = arith.mulf %119, %129 : vector<8x128xf32>
    %140 = arith.addf %138, %139 : vector<8x128xf32>
    %141 = math.tanh %140 : vector<8x128xf32>
    %142 = arith.mulf %137, %141 : vector<8x128xf32>
    %143 = arith.truncf %142 : vector<8x128xf32> to vector<8x128xbf16>
    %c0_57 = arith.constant 0 : index
    %144 = arith.index_cast %104 : i32 to index
    %c0_58 = arith.constant 0 : index
    %c0_59 = arith.constant 0 : index
    %145 = vector.load %arg4[%c0_57, %144, %c0_58, %c0_59] : memref<1x8x8x128xbf16, #tpu.memory_space<vmem>>, vector<1x1x8x128xbf16>
    %146 = vector.shape_cast %145 : vector<1x1x8x128xbf16> to vector<8x128xbf16>
    %147 = vector.shape_cast %143 : vector<8x128xbf16> to vector<1x1x8x128xbf16>
    tpu.vector_store %arg4[%c0_57, %144, %c0_58, %c0_59], %147 {strides = array<i32>} : memref<1x8x8x128xbf16, #tpu.memory_space<vmem>>, vector<1x1x8x128xbf16>,
    %c3_i32 = arith.constant 3 : i32
    %c2_i32_60 = arith.constant 2 : i32
    %148 = arith.muli %c2_i32_60, %c3_i32 : i32
    %c7_i32_61 = arith.constant 7 : i32
    %149 = arith.subi %c7_i32_61, %148 : i32
    %150 = arith.muli %arg0, %149 : i32
    %151 = arith.addi %c3_i32, %150 : i32
    %c0_62 = arith.constant 0 : index
    %152 = arith.index_cast %151 : i32 to index
    %c0_63 = arith.constant 0 : index
    %c0_64 = arith.constant 0 : index
    %153 = vector.load %arg2[%c0_62, %152, %c0_63, %c0_64] : memref<1x8x8x512xbf16, #tpu.memory_space<vmem>>, vector<1x1x8x512xbf16>
    %154 = vector.shape_cast %153 : vector<1x1x8x512xbf16> to vector<8x512xbf16>
    %155 = arith.extf %154 : vector<8x512xbf16> to vector<8x512xf32>
    %156 = arith.truncf %142 : vector<8x128xf32> to vector<8x128xbf16>
    %cst_65 = arith.constant dense<0.000000e+00> : vector<8x512xf32>
    %157 = tpu.matmul %156, %4, %cst_65 {dimension_numbers = #tpu.dot_dimension_numbers<[1], [0], [0], [1], [0, 0, 1, 1], [], []>} : vector<8x128xbf16>, vector<128x512xbf16>, vector<8x512xf32> -> vector<8x512xf32>
    %158 = arith.addf %155, %157 : vector<8x512xf32>
    %159 = vector.extract_strided_slice %158 {offsets = [0, 0], sizes = [8, 128], strides = [1, 1]} : vector<8x512xf32> to vector<8x128xf32>
    %cst_66 = arith.constant 5.000000e-01 : f32
    %160 = vector.broadcast %cst_66 : f32 to vector<8x128xf32>
    %161 = arith.mulf %160, %159 : vector<8x128xf32>
    %162 = math.tanh %161 : vector<8x128xf32>
    %cst_67 = arith.constant 5.000000e-01 : f32
    %163 = vector.broadcast %cst_67 : f32 to vector<8x128xf32>
    %164 = arith.mulf %163, %162 : vector<8x128xf32>
    %cst_68 = arith.constant 5.000000e-01 : f32
    %165 = vector.broadcast %cst_68 : f32 to vector<8x128xf32>
    %166 = arith.addf %164, %165 : vector<8x128xf32>
    %167 = vector.extract_strided_slice %158 {offsets = [0, 128], sizes = [8, 128], strides = [1, 1]} : vector<8x512xf32> to vector<8x128xf32>
    %cst_69 = arith.constant 5.000000e-01 : f32
    %168 = vector.broadcast %cst_69 : f32 to vector<8x128xf32>
    %169 = arith.mulf %168, %167 : vector<8x128xf32>
    %170 = math.tanh %169 : vector<8x128xf32>
    %cst_70 = arith.constant 5.000000e-01 : f32
    %171 = vector.broadcast %cst_70 : f32 to vector<8x128xf32>
    %172 = arith.mulf %171, %170 : vector<8x128xf32>
    %cst_71 = arith.constant 5.000000e-01 : f32
    %173 = vector.broadcast %cst_71 : f32 to vector<8x128xf32>
    %174 = arith.addf %172, %173 : vector<8x128xf32>
    %175 = vector.extract_strided_slice %158 {offsets = [0, 256], sizes = [8, 128], strides = [1, 1]} : vector<8x512xf32> to vector<8x128xf32>
    %176 = math.tanh %175 : vector<8x128xf32>
    %177 = vector.extract_strided_slice %158 {offsets = [0, 384], sizes = [8, 128], strides = [1, 1]} : vector<8x512xf32> to vector<8x128xf32>
    %cst_72 = arith.constant 5.000000e-01 : f32
    %178 = vector.broadcast %cst_72 : f32 to vector<8x128xf32>
    %179 = arith.mulf %178, %177 : vector<8x128xf32>
    %180 = math.tanh %179 : vector<8x128xf32>
    %cst_73 = arith.constant 5.000000e-01 : f32
    %181 = vector.broadcast %cst_73 : f32 to vector<8x128xf32>
    %182 = arith.mulf %181, %180 : vector<8x128xf32>
    %cst_74 = arith.constant 5.000000e-01 : f32
    %183 = vector.broadcast %cst_74 : f32 to vector<8x128xf32>
    %184 = arith.addf %182, %183 : vector<8x128xf32>
    %185 = arith.mulf %174, %140 : vector<8x128xf32>
    %186 = arith.mulf %166, %176 : vector<8x128xf32>
    %187 = arith.addf %185, %186 : vector<8x128xf32>
    %188 = math.tanh %187 : vector<8x128xf32>
    %189 = arith.mulf %184, %188 : vector<8x128xf32>
    %190 = arith.truncf %189 : vector<8x128xf32> to vector<8x128xbf16>
    %c0_75 = arith.constant 0 : index
    %191 = arith.index_cast %151 : i32 to index
    %c0_76 = arith.constant 0 : index
    %c0_77 = arith.constant 0 : index
    %192 = vector.load %arg4[%c0_75, %191, %c0_76, %c0_77] : memref<1x8x8x128xbf16, #tpu.memory_space<vmem>>, vector<1x1x8x128xbf16>
    %193 = vector.shape_cast %192 : vector<1x1x8x128xbf16> to vector<8x128xbf16>
    %194 = vector.shape_cast %190 : vector<8x128xbf16> to vector<1x1x8x128xbf16>
    tpu.vector_store %arg4[%c0_75, %191, %c0_76, %c0_77], %194 {strides = array<i32>} : memref<1x8x8x128xbf16, #tpu.memory_space<vmem>>, vector<1x1x8x128xbf16>,
    %c4_i32 = arith.constant 4 : i32
    %c2_i32_78 = arith.constant 2 : i32
    %195 = arith.muli %c2_i32_78, %c4_i32 : i32
    %c7_i32_79 = arith.constant 7 : i32
    %196 = arith.subi %c7_i32_79, %195 : i32
    %197 = arith.muli %arg0, %196 : i32
    %198 = arith.addi %c4_i32, %197 : i32
    %c0_80 = arith.constant 0 : index
    %199 = arith.index_cast %198 : i32 to index
    %c0_81 = arith.constant 0 : index
    %c0_82 = arith.constant 0 : index
    %200 = vector.load %arg2[%c0_80, %199, %c0_81, %c0_82] : memref<1x8x8x512xbf16, #tpu.memory_space<vmem>>, vector<1x1x8x512xbf16>
    %201 = vector.shape_cast %200 : vector<1x1x8x512xbf16> to vector<8x512xbf16>
    %202 = arith.extf %201 : vector<8x512xbf16> to vector<8x512xf32>
    %203 = arith.truncf %189 : vector<8x128xf32> to vector<8x128xbf16>
    %cst_83 = arith.constant dense<0.000000e+00> : vector<8x512xf32>
    %204 = tpu.matmul %203, %4, %cst_83 {dimension_numbers = #tpu.dot_dimension_numbers<[1], [0], [0], [1], [0, 0, 1, 1], [], []>} : vector<8x128xbf16>, vector<128x512xbf16>, vector<8x512xf32> -> vector<8x512xf32>
    %205 = arith.addf %202, %204 : vector<8x512xf32>
    %206 = vector.extract_strided_slice %205 {offsets = [0, 0], sizes = [8, 128], strides = [1, 1]} : vector<8x512xf32> to vector<8x128xf32>
    %cst_84 = arith.constant 5.000000e-01 : f32
    %207 = vector.broadcast %cst_84 : f32 to vector<8x128xf32>
    %208 = arith.mulf %207, %206 : vector<8x128xf32>
    %209 = math.tanh %208 : vector<8x128xf32>
    %cst_85 = arith.constant 5.000000e-01 : f32
    %210 = vector.broadcast %cst_85 : f32 to vector<8x128xf32>
    %211 = arith.mulf %210, %209 : vector<8x128xf32>
    %cst_86 = arith.constant 5.000000e-01 : f32
    %212 = vector.broadcast %cst_86 : f32 to vector<8x128xf32>
    %213 = arith.addf %211, %212 : vector<8x128xf32>
    %214 = vector.extract_strided_slice %205 {offsets = [0, 128], sizes = [8, 128], strides = [1, 1]} : vector<8x512xf32> to vector<8x128xf32>
    %cst_87 = arith.constant 5.000000e-01 : f32
    %215 = vector.broadcast %cst_87 : f32 to vector<8x128xf32>
    %216 = arith.mulf %215, %214 : vector<8x128xf32>
    %217 = math.tanh %216 : vector<8x128xf32>
    %cst_88 = arith.constant 5.000000e-01 : f32
    %218 = vector.broadcast %cst_88 : f32 to vector<8x128xf32>
    %219 = arith.mulf %218, %217 : vector<8x128xf32>
    %cst_89 = arith.constant 5.000000e-01 : f32
    %220 = vector.broadcast %cst_89 : f32 to vector<8x128xf32>
    %221 = arith.addf %219, %220 : vector<8x128xf32>
    %222 = vector.extract_strided_slice %205 {offsets = [0, 256], sizes = [8, 128], strides = [1, 1]} : vector<8x512xf32> to vector<8x128xf32>
    %223 = math.tanh %222 : vector<8x128xf32>
    %224 = vector.extract_strided_slice %205 {offsets = [0, 384], sizes = [8, 128], strides = [1, 1]} : vector<8x512xf32> to vector<8x128xf32>
    %cst_90 = arith.constant 5.000000e-01 : f32
    %225 = vector.broadcast %cst_90 : f32 to vector<8x128xf32>
    %226 = arith.mulf %225, %224 : vector<8x128xf32>
    %227 = math.tanh %226 : vector<8x128xf32>
    %cst_91 = arith.constant 5.000000e-01 : f32
    %228 = vector.broadcast %cst_91 : f32 to vector<8x128xf32>
    %229 = arith.mulf %228, %227 : vector<8x128xf32>
    %cst_92 = arith.constant 5.000000e-01 : f32
    %230 = vector.broadcast %cst_92 : f32 to vector<8x128xf32>
    %231 = arith.addf %229, %230 : vector<8x128xf32>
    %232 = arith.mulf %221, %187 : vector<8x128xf32>
    %233 = arith.mulf %213, %223 : vector<8x128xf32>
    %234 = arith.addf %232, %233 : vector<8x128xf32>
    %235 = math.tanh %234 : vector<8x128xf32>
    %236 = arith.mulf %231, %235 : vector<8x128xf32>
    %237 = arith.truncf %236 : vector<8x128xf32> to vector<8x128xbf16>
    %c0_93 = arith.constant 0 : index
    %238 = arith.index_cast %198 : i32 to index
    %c0_94 = arith.constant 0 : index
    %c0_95 = arith.constant 0 : index
    %239 = vector.load %arg4[%c0_93, %238, %c0_94, %c0_95] : memref<1x8x8x128xbf16, #tpu.memory_space<vmem>>, vector<1x1x8x128xbf16>
    %240 = vector.shape_cast %239 : vector<1x1x8x128xbf16> to vector<8x128xbf16>
    %241 = vector.shape_cast %237 : vector<8x128xbf16> to vector<1x1x8x128xbf16>
    tpu.vector_store %arg4[%c0_93, %238, %c0_94, %c0_95], %241 {strides = array<i32>} : memref<1x8x8x128xbf16, #tpu.memory_space<vmem>>, vector<1x1x8x128xbf16>,
    %c5_i32 = arith.constant 5 : i32
    %c2_i32_96 = arith.constant 2 : i32
    %242 = arith.muli %c2_i32_96, %c5_i32 : i32
    %c7_i32_97 = arith.constant 7 : i32
    %243 = arith.subi %c7_i32_97, %242 : i32
    %244 = arith.muli %arg0, %243 : i32
    %245 = arith.addi %c5_i32, %244 : i32
    %c0_98 = arith.constant 0 : index
    %246 = arith.index_cast %245 : i32 to index
    %c0_99 = arith.constant 0 : index
    %c0_100 = arith.constant 0 : index
    %247 = vector.load %arg2[%c0_98, %246, %c0_99, %c0_100] : memref<1x8x8x512xbf16, #tpu.memory_space<vmem>>, vector<1x1x8x512xbf16>
    %248 = vector.shape_cast %247 : vector<1x1x8x512xbf16> to vector<8x512xbf16>
    %249 = arith.extf %248 : vector<8x512xbf16> to vector<8x512xf32>
    %250 = arith.truncf %236 : vector<8x128xf32> to vector<8x128xbf16>
    %cst_101 = arith.constant dense<0.000000e+00> : vector<8x512xf32>
    %251 = tpu.matmul %250, %4, %cst_101 {dimension_numbers = #tpu.dot_dimension_numbers<[1], [0], [0], [1], [0, 0, 1, 1], [], []>} : vector<8x128xbf16>, vector<128x512xbf16>, vector<8x512xf32> -> vector<8x512xf32>
    %252 = arith.addf %249, %251 : vector<8x512xf32>
    %253 = vector.extract_strided_slice %252 {offsets = [0, 0], sizes = [8, 128], strides = [1, 1]} : vector<8x512xf32> to vector<8x128xf32>
    %cst_102 = arith.constant 5.000000e-01 : f32
    %254 = vector.broadcast %cst_102 : f32 to vector<8x128xf32>
    %255 = arith.mulf %254, %253 : vector<8x128xf32>
    %256 = math.tanh %255 : vector<8x128xf32>
    %cst_103 = arith.constant 5.000000e-01 : f32
    %257 = vector.broadcast %cst_103 : f32 to vector<8x128xf32>
    %258 = arith.mulf %257, %256 : vector<8x128xf32>
    %cst_104 = arith.constant 5.000000e-01 : f32
    %259 = vector.broadcast %cst_104 : f32 to vector<8x128xf32>
    %260 = arith.addf %258, %259 : vector<8x128xf32>
    %261 = vector.extract_strided_slice %252 {offsets = [0, 128], sizes = [8, 128], strides = [1, 1]} : vector<8x512xf32> to vector<8x128xf32>
    %cst_105 = arith.constant 5.000000e-01 : f32
    %262 = vector.broadcast %cst_105 : f32 to vector<8x128xf32>
    %263 = arith.mulf %262, %261 : vector<8x128xf32>
    %264 = math.tanh %263 : vector<8x128xf32>
    %cst_106 = arith.constant 5.000000e-01 : f32
    %265 = vector.broadcast %cst_106 : f32 to vector<8x128xf32>
    %266 = arith.mulf %265, %264 : vector<8x128xf32>
    %cst_107 = arith.constant 5.000000e-01 : f32
    %267 = vector.broadcast %cst_107 : f32 to vector<8x128xf32>
    %268 = arith.addf %266, %267 : vector<8x128xf32>
    %269 = vector.extract_strided_slice %252 {offsets = [0, 256], sizes = [8, 128], strides = [1, 1]} : vector<8x512xf32> to vector<8x128xf32>
    %270 = math.tanh %269 : vector<8x128xf32>
    %271 = vector.extract_strided_slice %252 {offsets = [0, 384], sizes = [8, 128], strides = [1, 1]} : vector<8x512xf32> to vector<8x128xf32>
    %cst_108 = arith.constant 5.000000e-01 : f32
    %272 = vector.broadcast %cst_108 : f32 to vector<8x128xf32>
    %273 = arith.mulf %272, %271 : vector<8x128xf32>
    %274 = math.tanh %273 : vector<8x128xf32>
    %cst_109 = arith.constant 5.000000e-01 : f32
    %275 = vector.broadcast %cst_109 : f32 to vector<8x128xf32>
    %276 = arith.mulf %275, %274 : vector<8x128xf32>
    %cst_110 = arith.constant 5.000000e-01 : f32
    %277 = vector.broadcast %cst_110 : f32 to vector<8x128xf32>
    %278 = arith.addf %276, %277 : vector<8x128xf32>
    %279 = arith.mulf %268, %234 : vector<8x128xf32>
    %280 = arith.mulf %260, %270 : vector<8x128xf32>
    %281 = arith.addf %279, %280 : vector<8x128xf32>
    %282 = math.tanh %281 : vector<8x128xf32>
    %283 = arith.mulf %278, %282 : vector<8x128xf32>
    %284 = arith.truncf %283 : vector<8x128xf32> to vector<8x128xbf16>
    %c0_111 = arith.constant 0 : index
    %285 = arith.index_cast %245 : i32 to index
    %c0_112 = arith.constant 0 : index
    %c0_113 = arith.constant 0 : index
    %286 = vector.load %arg4[%c0_111, %285, %c0_112, %c0_113] : memref<1x8x8x128xbf16, #tpu.memory_space<vmem>>, vector<1x1x8x128xbf16>
    %287 = vector.shape_cast %286 : vector<1x1x8x128xbf16> to vector<8x128xbf16>
    %288 = vector.shape_cast %284 : vector<8x128xbf16> to vector<1x1x8x128xbf16>
    tpu.vector_store %arg4[%c0_111, %285, %c0_112, %c0_113], %288 {strides = array<i32>} : memref<1x8x8x128xbf16, #tpu.memory_space<vmem>>, vector<1x1x8x128xbf16>,
    %c6_i32 = arith.constant 6 : i32
    %c2_i32_114 = arith.constant 2 : i32
    %289 = arith.muli %c2_i32_114, %c6_i32 : i32
    %c7_i32_115 = arith.constant 7 : i32
    %290 = arith.subi %c7_i32_115, %289 : i32
    %291 = arith.muli %arg0, %290 : i32
    %292 = arith.addi %c6_i32, %291 : i32
    %c0_116 = arith.constant 0 : index
    %293 = arith.index_cast %292 : i32 to index
    %c0_117 = arith.constant 0 : index
    %c0_118 = arith.constant 0 : index
    %294 = vector.load %arg2[%c0_116, %293, %c0_117, %c0_118] : memref<1x8x8x512xbf16, #tpu.memory_space<vmem>>, vector<1x1x8x512xbf16>
    %295 = vector.shape_cast %294 : vector<1x1x8x512xbf16> to vector<8x512xbf16>
    %296 = arith.extf %295 : vector<8x512xbf16> to vector<8x512xf32>
    %297 = arith.truncf %283 : vector<8x128xf32> to vector<8x128xbf16>
    %cst_119 = arith.constant dense<0.000000e+00> : vector<8x512xf32>
    %298 = tpu.matmul %297, %4, %cst_119 {dimension_numbers = #tpu.dot_dimension_numbers<[1], [0], [0], [1], [0, 0, 1, 1], [], []>} : vector<8x128xbf16>, vector<128x512xbf16>, vector<8x512xf32> -> vector<8x512xf32>
    %299 = arith.addf %296, %298 : vector<8x512xf32>
    %300 = vector.extract_strided_slice %299 {offsets = [0, 0], sizes = [8, 128], strides = [1, 1]} : vector<8x512xf32> to vector<8x128xf32>
    %cst_120 = arith.constant 5.000000e-01 : f32
    %301 = vector.broadcast %cst_120 : f32 to vector<8x128xf32>
    %302 = arith.mulf %301, %300 : vector<8x128xf32>
    %303 = math.tanh %302 : vector<8x128xf32>
    %cst_121 = arith.constant 5.000000e-01 : f32
    %304 = vector.broadcast %cst_121 : f32 to vector<8x128xf32>
    %305 = arith.mulf %304, %303 : vector<8x128xf32>
    %cst_122 = arith.constant 5.000000e-01 : f32
    %306 = vector.broadcast %cst_122 : f32 to vector<8x128xf32>
    %307 = arith.addf %305, %306 : vector<8x128xf32>
    %308 = vector.extract_strided_slice %299 {offsets = [0, 128], sizes = [8, 128], strides = [1, 1]} : vector<8x512xf32> to vector<8x128xf32>
    %cst_123 = arith.constant 5.000000e-01 : f32
    %309 = vector.broadcast %cst_123 : f32 to vector<8x128xf32>
    %310 = arith.mulf %309, %308 : vector<8x128xf32>
    %311 = math.tanh %310 : vector<8x128xf32>
    %cst_124 = arith.constant 5.000000e-01 : f32
    %312 = vector.broadcast %cst_124 : f32 to vector<8x128xf32>
    %313 = arith.mulf %312, %311 : vector<8x128xf32>
    %cst_125 = arith.constant 5.000000e-01 : f32
    %314 = vector.broadcast %cst_125 : f32 to vector<8x128xf32>
    %315 = arith.addf %313, %314 : vector<8x128xf32>
    %316 = vector.extract_strided_slice %299 {offsets = [0, 256], sizes = [8, 128], strides = [1, 1]} : vector<8x512xf32> to vector<8x128xf32>
    %317 = math.tanh %316 : vector<8x128xf32>
    %318 = vector.extract_strided_slice %299 {offsets = [0, 384], sizes = [8, 128], strides = [1, 1]} : vector<8x512xf32> to vector<8x128xf32>
    %cst_126 = arith.constant 5.000000e-01 : f32
    %319 = vector.broadcast %cst_126 : f32 to vector<8x128xf32>
    %320 = arith.mulf %319, %318 : vector<8x128xf32>
    %321 = math.tanh %320 : vector<8x128xf32>
    %cst_127 = arith.constant 5.000000e-01 : f32
    %322 = vector.broadcast %cst_127 : f32 to vector<8x128xf32>
    %323 = arith.mulf %322, %321 : vector<8x128xf32>
    %cst_128 = arith.constant 5.000000e-01 : f32
    %324 = vector.broadcast %cst_128 : f32 to vector<8x128xf32>
    %325 = arith.addf %323, %324 : vector<8x128xf32>
    %326 = arith.mulf %315, %281 : vector<8x128xf32>
    %327 = arith.mulf %307, %317 : vector<8x128xf32>
    %328 = arith.addf %326, %327 : vector<8x128xf32>
    %329 = math.tanh %328 : vector<8x128xf32>
    %330 = arith.mulf %325, %329 : vector<8x128xf32>
    %331 = arith.truncf %330 : vector<8x128xf32> to vector<8x128xbf16>
    %c0_129 = arith.constant 0 : index
    %332 = arith.index_cast %292 : i32 to index
    %c0_130 = arith.constant 0 : index
    %c0_131 = arith.constant 0 : index
    %333 = vector.load %arg4[%c0_129, %332, %c0_130, %c0_131] : memref<1x8x8x128xbf16, #tpu.memory_space<vmem>>, vector<1x1x8x128xbf16>
    %334 = vector.shape_cast %333 : vector<1x1x8x128xbf16> to vector<8x128xbf16>
    %335 = vector.shape_cast %331 : vector<8x128xbf16> to vector<1x1x8x128xbf16>
    tpu.vector_store %arg4[%c0_129, %332, %c0_130, %c0_131], %335 {strides = array<i32>} : memref<1x8x8x128xbf16, #tpu.memory_space<vmem>>, vector<1x1x8x128xbf16>,
    %c7_i32_132 = arith.constant 7 : i32
    %c2_i32_133 = arith.constant 2 : i32
    %336 = arith.muli %c2_i32_133, %c7_i32_132 : i32
    %c7_i32_134 = arith.constant 7 : i32
    %337 = arith.subi %c7_i32_134, %336 : i32
    %338 = arith.muli %arg0, %337 : i32
    %339 = arith.addi %c7_i32_132, %338 : i32
    %c0_135 = arith.constant 0 : index
    %340 = arith.index_cast %339 : i32 to index
    %c0_136 = arith.constant 0 : index
    %c0_137 = arith.constant 0 : index
    %341 = vector.load %arg2[%c0_135, %340, %c0_136, %c0_137] : memref<1x8x8x512xbf16, #tpu.memory_space<vmem>>, vector<1x1x8x512xbf16>
    %342 = vector.shape_cast %341 : vector<1x1x8x512xbf16> to vector<8x512xbf16>
    %343 = arith.extf %342 : vector<8x512xbf16> to vector<8x512xf32>
    %344 = arith.truncf %330 : vector<8x128xf32> to vector<8x128xbf16>
    %cst_138 = arith.constant dense<0.000000e+00> : vector<8x512xf32>
    %345 = tpu.matmul %344, %4, %cst_138 {dimension_numbers = #tpu.dot_dimension_numbers<[1], [0], [0], [1], [0, 0, 1, 1], [], []>} : vector<8x128xbf16>, vector<128x512xbf16>, vector<8x512xf32> -> vector<8x512xf32>
    %346 = arith.addf %343, %345 : vector<8x512xf32>
    %347 = vector.extract_strided_slice %346 {offsets = [0, 0], sizes = [8, 128], strides = [1, 1]} : vector<8x512xf32> to vector<8x128xf32>
    %cst_139 = arith.constant 5.000000e-01 : f32
    %348 = vector.broadcast %cst_139 : f32 to vector<8x128xf32>
    %349 = arith.mulf %348, %347 : vector<8x128xf32>
    %350 = math.tanh %349 : vector<8x128xf32>
    %cst_140 = arith.constant 5.000000e-01 : f32
    %351 = vector.broadcast %cst_140 : f32 to vector<8x128xf32>
    %352 = arith.mulf %351, %350 : vector<8x128xf32>
    %cst_141 = arith.constant 5.000000e-01 : f32
    %353 = vector.broadcast %cst_141 : f32 to vector<8x128xf32>
    %354 = arith.addf %352, %353 : vector<8x128xf32>
    %355 = vector.extract_strided_slice %346 {offsets = [0, 128], sizes = [8, 128], strides = [1, 1]} : vector<8x512xf32> to vector<8x128xf32>
    %cst_142 = arith.constant 5.000000e-01 : f32
    %356 = vector.broadcast %cst_142 : f32 to vector<8x128xf32>
    %357 = arith.mulf %356, %355 : vector<8x128xf32>
    %358 = math.tanh %357 : vector<8x128xf32>
    %cst_143 = arith.constant 5.000000e-01 : f32
    %359 = vector.broadcast %cst_143 : f32 to vector<8x128xf32>
    %360 = arith.mulf %359, %358 : vector<8x128xf32>
    %cst_144 = arith.constant 5.000000e-01 : f32
    %361 = vector.broadcast %cst_144 : f32 to vector<8x128xf32>
    %362 = arith.addf %360, %361 : vector<8x128xf32>
    %363 = vector.extract_strided_slice %346 {offsets = [0, 256], sizes = [8, 128], strides = [1, 1]} : vector<8x512xf32> to vector<8x128xf32>
    %364 = math.tanh %363 : vector<8x128xf32>
    %365 = vector.extract_strided_slice %346 {offsets = [0, 384], sizes = [8, 128], strides = [1, 1]} : vector<8x512xf32> to vector<8x128xf32>
    %cst_145 = arith.constant 5.000000e-01 : f32
    %366 = vector.broadcast %cst_145 : f32 to vector<8x128xf32>
    %367 = arith.mulf %366, %365 : vector<8x128xf32>
    %368 = math.tanh %367 : vector<8x128xf32>
    %cst_146 = arith.constant 5.000000e-01 : f32
    %369 = vector.broadcast %cst_146 : f32 to vector<8x128xf32>
    %370 = arith.mulf %369, %368 : vector<8x128xf32>
    %cst_147 = arith.constant 5.000000e-01 : f32
    %371 = vector.broadcast %cst_147 : f32 to vector<8x128xf32>
    %372 = arith.addf %370, %371 : vector<8x128xf32>
    %373 = arith.mulf %362, %328 : vector<8x128xf32>
    %374 = arith.mulf %354, %364 : vector<8x128xf32>
    %375 = arith.addf %373, %374 : vector<8x128xf32>
    %376 = math.tanh %375 : vector<8x128xf32>
    %377 = arith.mulf %372, %376 : vector<8x128xf32>
    %378 = arith.truncf %377 : vector<8x128xf32> to vector<8x128xbf16>
    %c0_148 = arith.constant 0 : index
    %379 = arith.index_cast %339 : i32 to index
    %c0_149 = arith.constant 0 : index
    %c0_150 = arith.constant 0 : index
    %380 = vector.load %arg4[%c0_148, %379, %c0_149, %c0_150] : memref<1x8x8x128xbf16, #tpu.memory_space<vmem>>, vector<1x1x8x128xbf16>
    %381 = vector.shape_cast %380 : vector<1x1x8x128xbf16> to vector<8x128xbf16>
    %382 = vector.shape_cast %378 : vector<8x128xbf16> to vector<1x1x8x128xbf16>
    tpu.vector_store %arg4[%c0_148, %379, %c0_149, %c0_150], %382 {strides = array<i32>} : memref<1x8x8x128xbf16, #tpu.memory_space<vmem>>, vector<1x1x8x128xbf16>,
    %c8_i32 = arith.constant 8 : i32
    %c0_151 = arith.constant 0 : index
    %c0_152 = arith.constant 0 : index
    %383 = vector.load %arg7[%c0_151, %c0_152] : memref<8x128xf32, #tpu.memory_space<vmem>>, vector<8x128xf32>
    tpu.vector_store %arg7[%c0_151, %c0_152], %377 {strides = array<i32>} : memref<8x128xf32, #tpu.memory_space<vmem>>, vector<8x128xf32>,
    %c0_153 = arith.constant 0 : index
    %c0_154 = arith.constant 0 : index
    %384 = vector.load %arg8[%c0_153, %c0_154] : memref<8x128xf32, #tpu.memory_space<vmem>>, vector<8x128xf32>
    tpu.vector_store %arg8[%c0_153, %c0_154], %375 {strides = array<i32>} : memref<8x128xf32, #tpu.memory_space<vmem>>, vector<8x128xf32>,
    %c0_i32_155 = arith.constant 0 : i32
    %385 = arith.cmpi eq, %arg1, %c0_i32_155 : i32
    %386 = arith.extui %385 : i1 to i32
    %c0_i32_156 = arith.constant 0 : i32
    %387 = arith.cmpi ne, %386, %c0_i32_156 : i32
    scf.if %387 {
      %c0_157 = arith.constant 0 : index
      %c0_158 = arith.constant 0 : index
      %c0_159 = arith.constant 0 : index
      %388 = vector.load %arg5[%c0_157, %c0_158, %c0_159] : memref<1x8x128xf32, #tpu.memory_space<vmem>>, vector<1x8x128xf32>
      %389 = vector.shape_cast %388 : vector<1x8x128xf32> to vector<8x128xf32>
      %390 = vector.shape_cast %377 : vector<8x128xf32> to vector<1x8x128xf32>
      tpu.vector_store %arg5[%c0_157, %c0_158, %c0_159], %390 {strides = array<i32>} : memref<1x8x128xf32, #tpu.memory_space<vmem>>, vector<1x8x128xf32>,
      %c0_160 = arith.constant 0 : index
      %c0_161 = arith.constant 0 : index
      %c0_162 = arith.constant 0 : index
      %391 = vector.load %arg6[%c0_160, %c0_161, %c0_162] : memref<1x8x128xf32, #tpu.memory_space<vmem>>, vector<1x8x128xf32>
      %392 = vector.shape_cast %391 : vector<1x8x128xf32> to vector<8x128xf32>
      %393 = vector.shape_cast %375 : vector<8x128xf32> to vector<1x8x128xf32>
      tpu.vector_store %arg6[%c0_160, %c0_161, %c0_162], %393 {strides = array<i32>} : memref<1x8x128xf32, #tpu.memory_space<vmem>>, vector<1x8x128xf32>,
    } else {
    }
    return
  }
  func.func @transform_0(%arg0: i32, %arg1: i32) -> (i32, i32, i32, i32) {
    %c2_i32 = arith.constant 2 : i32
    %0 = arith.muli %c2_i32, %arg1 : i32
    %c0_i32 = arith.constant 0 : i32
    %1 = arith.subi %c0_i32, %0 : i32
    %2 = arith.muli %arg0, %1 : i32
    %3 = arith.addi %arg1, %2 : i32
    %c0_i32_0 = arith.constant 0 : i32
    %c0_i32_1 = arith.constant 0 : i32
    %c0_i32_2 = arith.constant 0 : i32
    return %arg0, %3, %c0_i32_0, %c0_i32_1 : i32, i32, i32, i32
  }
  func.func @transform_1(%arg0: i32, %arg1: i32) -> (i32, i32, i32) {
    %c0_i32 = arith.constant 0 : i32
    %c0_i32_0 = arith.constant 0 : i32
    %c0_i32_1 = arith.constant 0 : i32
    return %arg0, %c0_i32, %c0_i32_0 : i32, i32, i32
  }
  func.func @transform_2(%arg0: i32, %arg1: i32) -> (i32, i32, i32, i32) {
    %c2_i32 = arith.constant 2 : i32
    %0 = arith.muli %c2_i32, %arg1 : i32
    %c0_i32 = arith.constant 0 : i32
    %1 = arith.subi %c0_i32, %0 : i32
    %2 = arith.muli %arg0, %1 : i32
    %3 = arith.addi %arg1, %2 : i32
    %c0_i32_0 = arith.constant 0 : i32
    %c0_i32_1 = arith.constant 0 : i32
    %c0_i32_2 = arith.constant 0 : i32
    return %arg0, %3, %c0_i32_0, %c0_i32_1 : i32, i32, i32, i32
  }
  func.func @transform_3(%arg0: i32, %arg1: i32) -> (i32, i32, i32) {
    %c0_i32 = arith.constant 0 : i32
    %c0_i32_0 = arith.constant 0 : i32
    %c0_i32_1 = arith.constant 0 : i32
    return %arg0, %c0_i32, %c0_i32_0 : i32, i32, i32
  }
  func.func @transform_4(%arg0: i32, %arg1: i32) -> (i32, i32, i32) {
    %c0_i32 = arith.constant 0 : i32
    %c0_i32_0 = arith.constant 0 : i32
    %c0_i32_1 = arith.constant 0 : i32
    return %arg0, %c0_i32, %c0_i32_0 : i32, i32, i32
  }
}

</mosaic_0001>

<bundles_post_ra>
// kernel: lstm_forward.2
= control target key start
LH: loop header
LB: loop body
LE: loop exit
PB: predicated region body
PF: predicated region fallthrough
CT: control target
= control target key end

     0   :  { %10 = vsyncpa [#allocation5], 0  ;;  %s1949_s15 = smov 0   ;;  %s1951_s16 = smov 0   ;;  %s2442_s0 = inlined_call_operand.vmem [shape: bf16[2,8,8,512], index: 0, kind: input, shape index: {}]   ;;  %s2443_s1 = inlined_call_operand.hbm [shape: bf16[2,128,512], index: 1, kind: input, shape index: {}]   ;;  %s2444_s2 = inlined_call_operand.vmem [shape: bf16[2,8,8,128], index: 2, kind: output, shape index: {0}]   ;;  %s2445_s3 = inlined_call_operand.vmem [shape: f32[2,8,128], index: 3, kind: output, shape index: {1}]   ;;  %s2446_s4 = inlined_call_operand.vmem [shape: f32[2,8,128], index: 4, kind: output, shape index: {2}]  }
   0x1   :  { %s1953_s17 = smov 0   ;;  %s1955_s18 = smov 0  }
   0x2   :  { %s1957_s19 = smov 0   ;;  %s1959_s20 = smov 0  }
   0x3 LB: > { %s1483_s21 = sadd.s32 4294967295, %s1918_s20   ;;  %s28_s22 = sadd.s32 1, %s1914_s19  ;;  %s1918_s20 = sphi %s1959_s20, %s16_s20   ;;  %s1914_s19 = sphi %s1957_s19, %s2454_s19   ;;  %s1910_s18 = sphi %s1955_s18, %s2453_s18   ;;  %s1906_s17 = sphi %s1953_s17, %s2452_s17   ;;  %s1902_s16 = sphi %s1951_s16, %s2451_s16   ;;  %s1898_s15 = sphi %s1949_s15, %s2450_s15  }
   0x4   : > { %p30_p0 = scmp.ge.s32.totalorder %s28_s22, 2  ;;  %s71_s23 = sadd.s32 1, %s1906_s17 }
   0x5   : > { %p84_p1 = scmp.ne.s32.totalorder %s1902_s16, %s1898_s15  ;;  %p85_p2 = scmp.eq.s32.totalorder %s1483_s21, 0 }
   0x6   : > { %s2456_s22 = smov (%p30_p0, %s28_s22), 0  ;;  %p1485_p4 = scmp.ge.s32.totalorder %s1918_s20, 1 }
   0x7   : > { %p1983_p3 = por %p85_p2, %p84_p1  ;;  %s68_s25 = ssub.s32 %s1914_s19, %s2456_s22 }
   0x8   : > { %p183_p5 = scmp.lt.s32.totalorder %s1918_s20, 3  ;;  %p69_p6 = scmp.eq.s32.totalorder %s68_s25, 0 }
   0x9   : > { %s1662_s26 = sshll.u32 %s1910_s18, 8  ;;  %s1920_s7 = smov [#allocation4]  }
   0xa   : > { %p1992_p7 = pnand %p1485_p4, %p183_p5  ;;  %s196_s30 = scalar_lea.hbm %s2443_s1, %s1662_s26 }
   0xb   : > { %s2000_s5 = scalar_select %p69_p6, %s1906_s17, %s71_s23  }
   0xc   : > { %p1702_p8 = pneg %p1992_p7  ;;  %s197_s6 = sshll.u32 %s196_s30, 4  ;;  %s198_s6 = int_to_ptr.hbm [resolvable:$true] %s197_s6 }
   0xd   : > { %s199_s8 = sshll.u32 %s1920_s7, 4  ;;  %s1838_s10 = sshra.s32 %s198_s6, 4  ;;  %s200_s8 = int_to_ptr.vmem [resolvable:$true] %s199_s8  ;;  %s1839_s10 = int_to_ptr.hbm [resolvable:$true] %s1838_s10 }
   0xe   : > { %p2006_p9 = pnand %p1702_p8, %p1983_p3  ;;  %s1840_s11 = scalar_lea.hbm %s1839_s10, 256 }
   0xf   : > { %p1841_p10 = scmp.ne.s32.totalorder %s1839_s10, %s1840_s11  ;;  %s1845_s14 = scalar_lea.hbm %s2443_s1, 512 }
  0x10   : > { %p1842_p11 = pneg %p2006_p9  ;;  %p1846_p0 = scmp.lt.s32.totalorder %s1839_s10, %s2443_s1 }
  0x11   : > { %p1847_p1 = scmp.lt.s32.totalorder %s1845_s14, %s1840_s11 }
  0x12   : > { %p1843_p12 = pnand %p1842_p11, %p1841_p10 }
  0x13   : > { %p1848_p2 = por %p1847_p1, %p1846_p0 }
  0x14   : > { %p1844_p13 = pneg %p1843_p12 }
  0x16   : > { %p1849_p4 = pnand %p1848_p2, %p1844_p13 }
  0x18   : > { %1852 = shalt.err (!%p1849_p4)
}
  0x19   : > { %s1921_s23 = smov 256   ;;  %s1922_s25 = smov 16  }
  0x1a   : > { %1705 = dma.hbm_to_vmem [thread:$0]  (!%p2006_p9), %s198_s6, 4096, %s200_s8, [#allocation5], %s1921_s23, %s1921_s23, %s1922_s25  }
  0x1b   : > { %237 = sbr.rel (%p1992_p7) target bundleno = 1325 (0x52d), region = 28 }
  0x20   : > { %1893 = dma.done.wait (%p1983_p3), [#allocation5], 4096  }
  0x21   : > { %1895 = vsyncadd (%p1983_p3), [#allocation5], 4294963200  ;;  %v1612_v0 = vld [vmem:[#allocation4 + $0xe0] sm:$0xf]  ;;  %v1695_v1 = vld [vmem:[#allocation4 + $0xec] sm:$0xf0] }
  0x22   : > { %v1693_v2 = vld [vmem:[#allocation4 + $0xe4] sm:$0xf]  ;;  %v2026_v3 = vor.u32 %v1695_v1, %v1612_v0  ;;  %v1614_v4 = vld [vmem:[#allocation4 + $0xf0] sm:$0xf0]  ;;  %v1620_v5 = vld [vmem:[#allocation4 + $0xe8] sm:$0xf] }
  0x23   : > { %v1696_v6 = vld [vmem:[#allocation4 + $0xf4] sm:$0xf0]  ;;  %v2028_v7 = vor.u32 %v1693_v2, %v1614_v4  ;;  %v1694_v9 = vld [vmem:[#allocation4 + $0xec] sm:$0xf]  ;;  %v1622_v10 = vld [vmem:[#allocation4 + $0xf8] sm:$0xf0] }
  0x24   : > { %v2030_v8 = vor.u32 %v1696_v6, %v1620_v5  ;;  %v1596_v11 = vld [vmem:[#allocation4 + $0xc0] sm:$0xf]  ;;  %545 = vmatpush.bf16.msra.mxu0 %v2026_v3  ;;  %v2033_v12 = vor.u32 %v1694_v9, %v1622_v10  ;;  %v1691_v13 = vld [vmem:[#allocation4 + $0xcc] sm:$0xf0]  ;;  %v1689_v14 = vld [vmem:[#allocation4 + $0xc4] sm:$0xf] }
  0x25   : > { %v1598_v15 = vld [vmem:[#allocation4 + $0xd0] sm:$0xf0]  ;;  %558 = vmatpush.bf16.msra.mxu1 %v2028_v7  ;;  %v2037_v16 = vor.u32 %v1691_v13, %v1596_v11  ;;  %v1604_v18 = vld [vmem:[#allocation4 + $0xc8] sm:$0xf]  ;;  %v1692_v19 = vld [vmem:[#allocation4 + $0xd4] sm:$0xf0] }
  0x26   : > { %571 = vmatpush.bf16.msra.mxu2 %v2030_v8  ;;  %v2039_v17 = vor.u32 %v1689_v14, %v1598_v15  ;;  %v1690_v20 = vld [vmem:[#allocation4 + $0xcc] sm:$0xf]  ;;  %584 = vmatpush.bf16.msra.mxu3 %v2033_v12  ;;  %v2042_v21 = vor.u32 %v1692_v19, %v1604_v18  ;;  %v1606_v22 = vld [vmem:[#allocation4 + $0xd8] sm:$0xf0]  ;;  %v1580_v23 = vld [vmem:[#allocation4 + $0xa0] sm:$0xf] }
  0x27   : > { %v1687_v24 = vld [vmem:[#allocation4 + $0xac] sm:$0xf0]  ;;  %v2044_v25 = vor.u32 %v1690_v20, %v1606_v22  ;;  %v1685_v26 = vld [vmem:[#allocation4 + $0xa4] sm:$0xf]  ;;  %v1582_v27 = vld [vmem:[#allocation4 + $0xb0] sm:$0xf0] }
  0x28   : > { %v1588_v28 = vld [vmem:[#allocation4 + $0xa8] sm:$0xf]  ;;  %546 = vmatpush.bf16.msra.mxu0 %v2037_v16  ;;  %v2047_v29 = vor.u32 %v1687_v24, %v1580_v23  ;;  %v1688_v30 = vld [vmem:[#allocation4 + $0xb4] sm:$0xf0]  ;;  %v1686_v31 = vld [vmem:[#allocation4 + $0xac] sm:$0xf]  ;;  %v2051_v33 = vor.u32 %v1685_v26, %v1582_v27 }
  0x29   : > { %v1590_v32 = vld [vmem:[#allocation4 + $0xb8] sm:$0xf0]  ;;  %559 = vmatpush.bf16.msra.mxu1 %v2039_v17  ;;  %v2053_v34 = vor.u32 %v1688_v30, %v1588_v28  ;;  %v1564_v35 = vld [vmem:[#allocation4 + $0x80] sm:$0xf]  ;;  %v1683_v36 = vld [vmem:[#allocation4 + $0x8c] sm:$0xf0] }
  0x2a   : > { %572 = vmatpush.bf16.msra.mxu2 %v2042_v21  ;;  %v1681_v37 = vld [vmem:[#allocation4 + $0x84] sm:$0xf]  ;;  %585 = vmatpush.bf16.msra.mxu3 %v2044_v25  ;;  %v2056_v38 = vor.u32 %v1686_v31, %v1590_v32  ;;  %v1566_v39 = vld [vmem:[#allocation4 + $0x90] sm:$0xf0]  ;;  %v1572_v40 = vld [vmem:[#allocation4 + $0x88] sm:$0xf]  ;;  %v2059_v44 = vor.u32 %v1683_v36, %v1564_v35 }
  0x2b   : > { %v1684_v41 = vld [vmem:[#allocation4 + $0x94] sm:$0xf0]  ;;  %v1682_v42 = vld [vmem:[#allocation4 + $0x8c] sm:$0xf]  ;;  %v1574_v43 = vld [vmem:[#allocation4 + $0x98] sm:$0xf0]  ;;  %v2063_v45 = vor.u32 %v1681_v37, %v1566_v39 }
  0x2c   : > { %547 = vmatpush.bf16.msra.mxu0 %v2047_v29  ;;  %v2065_v46 = vor.u32 %v1684_v41, %v1572_v40  ;;  %v1548_v47 = vld [vmem:[#allocation4 + $0x60] sm:$0xf]  ;;  %v1679_v48 = vld [vmem:[#allocation4 + $0x6c] sm:$0xf0]  ;;  %v1677_v49 = vld [vmem:[#allocation4 + $0x64] sm:$0xf]  ;;  %v2068_v50 = vor.u32 %v1682_v42, %v1574_v43 }
  0x2d   : > { %560 = vmatpush.bf16.msra.mxu1 %v2051_v33  ;;  %v1550_v51 = vld [vmem:[#allocation4 + $0x70] sm:$0xf0]  ;;  %v1556_v52 = vld [vmem:[#allocation4 + $0x68] sm:$0xf]  ;;  %v1680_v53 = vld [vmem:[#allocation4 + $0x74] sm:$0xf0]  ;;  %v2071_v56 = vor.u32 %v1679_v48, %v1548_v47 }
  0x2e   : > { %573 = vmatpush.bf16.msra.mxu2 %v2053_v34  ;;  %586 = vmatpush.bf16.msra.mxu3 %v2056_v38  ;;  %v1678_v54 = vld [vmem:[#allocation4 + $0x6c] sm:$0xf]  ;;  %v1558_v55 = vld [vmem:[#allocation4 + $0x78] sm:$0xf0]  ;;  %v2075_v57 = vor.u32 %v1677_v49, %v1550_v51  ;;  %v2077_v58 = vor.u32 %v1680_v53, %v1556_v52  ;;  %v1532_v59 = vld [vmem:[#allocation4 + $0x40] sm:$0xf] }
  0x2f   : > { %v1675_v60 = vld [vmem:[#allocation4 + $0x4c] sm:$0xf0]  ;;  %v1673_v61 = vld [vmem:[#allocation4 + $0x44] sm:$0xf]  ;;  %v2080_v62 = vor.u32 %v1678_v54, %v1558_v55  ;;  %v1534_v63 = vld [vmem:[#allocation4 + $0x50] sm:$0xf0] }
  0x30   : > { %548 = vmatpush.bf16.msra.mxu0 %v2059_v44  ;;  %v1540_v0 = vld [vmem:[#allocation4 + $0x48] sm:$0xf]  ;;  %v1676_v1 = vld [vmem:[#allocation4 + $0x54] sm:$0xf0]  ;;  %v1674_v2 = vld [vmem:[#allocation4 + $0x4c] sm:$0xf]  ;;  %v2083_v5 = vor.u32 %v1675_v60, %v1532_v59  ;;  %v2087_v6 = vor.u32 %v1673_v61, %v1534_v63 }
  0x31   : > { %561 = vmatpush.bf16.msra.mxu1 %v2063_v45  ;;  %v1542_v4 = vld [vmem:[#allocation4 + $0x58] sm:$0xf0]  ;;  %v2089_v9 = vor.u32 %v1676_v1, %v1540_v0  ;;  %v1516_v10 = vld [vmem:[#allocation4 + $0x20] sm:$0xf]  ;;  %v1671_v11 = vld [vmem:[#allocation4 + $0x2c] sm:$0xf0] }
  0x32   : > { %574 = vmatpush.bf16.msra.mxu2 %v2065_v46  ;;  %587 = vmatpush.bf16.msra.mxu3 %v2068_v50  ;;  %v1669_v13 = vld [vmem:[#allocation4 + $0x24] sm:$0xf]  ;;  %v2092_v14 = vor.u32 %v1674_v2, %v1542_v4  ;;  %v1518_v15 = vld [vmem:[#allocation4 + $0x30] sm:$0xf0]  ;;  %v1524_v18 = vld [vmem:[#allocation4 + $0x28] sm:$0xf]  ;;  %v2095_v23 = vor.u32 %v1671_v11, %v1516_v10 }
  0x33   : > { %v1672_v19 = vld [vmem:[#allocation4 + $0x34] sm:$0xf0]  ;;  %v1670_v20 = vld [vmem:[#allocation4 + $0x2c] sm:$0xf]  ;;  %v1526_v22 = vld [vmem:[#allocation4 + $0x38] sm:$0xf0]  ;;  %v2099_v24 = vor.u32 %v1669_v13, %v1518_v15 }
  0x34   : > { %549 = vmatpush.bf16.msra.mxu0 %v2071_v56  ;;  %v2101_v26 = vor.u32 %v1672_v19, %v1524_v18  ;;  %v1500_v27 = vld [vmem:[#allocation4] sm:$0xf]  ;;  %v1667_v28 = vld [vmem:[#allocation4 + $0xc] sm:$0xf0]  ;;  %v1665_v30 = vld [vmem:[#allocation4 + $0x4] sm:$0xf]  ;;  %v2104_v31 = vor.u32 %v1670_v20, %v1526_v22 }
  0x35   : > { %562 = vmatpush.bf16.msra.mxu1 %v2075_v57  ;;  %v1502_v32 = vld [vmem:[#allocation4 + $0x10] sm:$0xf0]  ;;  %v1508_v35 = vld [vmem:[#allocation4 + $0x8] sm:$0xf]  ;;  %v1668_v36 = vld [vmem:[#allocation4 + $0x14] sm:$0xf0]  ;;  %v2107_v40 = vor.u32 %v1667_v28, %v1500_v27 }
  0x36   : > { %575 = vmatpush.bf16.msra.mxu2 %v2077_v58  ;;  %588 = vmatpush.bf16.msra.mxu3 %v2080_v62  ;;  %v1666_v37 = vld [vmem:[#allocation4 + $0xc] sm:$0xf]  ;;  %v1510_v39 = vld [vmem:[#allocation4 + $0x18] sm:$0xf0]  ;;  %v2111_v41 = vor.u32 %v1665_v30, %v1502_v32  ;;  %v2113_v42 = vor.u32 %v1668_v36, %v1508_v35  ;;  %v1923_v47 = vmov 0.0|0.0   ;;  %p294_p3 = scmp.lt.s32.totalorder %s1910_s18, 1 }
  0x37   : > { %v2116_v43 = vor.u32 %v1666_v37, %v1510_v39  ;;  %s1697_s27 = smul.u32 112, %s1910_s18  ;;  %s1637_s28 = sshll.u32 %s1910_s18, 4 }
  0x38   : > { %550 = vmatpush.bf16.msra.mxu0 %v2083_v5  ;;  %s2188_s24 = scalar_select %p294_p3, %s1910_s18, 1 }
  0x39   : > { %563 = vmatpush.bf16.msra.mxu1 %v2087_v6  ;;  %s1698_s8 = smul.u32 28, %s1910_s18 }
  0x3a   : > { %576 = vmatpush.bf16.msra.mxu2 %v2089_v9  ;;  %589 = vmatpush.bf16.msra.mxu3 %v2092_v14  ;;  %s1663_s26 = sshll.u32 %s2188_s24, 7  ;;  %s1664_s7 = sshll.u32 %s2188_s24, 5 }
  0x3b   : > { %s2195_s30 = scalar_lea.vmem %s2442_s0, %s1663_s26  ;;  %s2206_s11 = scalar_lea.vmem %s2444_s2, %s1664_s7 }
  0x3c   : > { %551 = vmatpush.bf16.msra.mxu0 %v2095_v23  ;;  %s377_s6 = scalar_lea.vmem %s2195_s30, %s1697_s27  ;;  %s621_s12 = scalar_lea.vmem %s2206_s11, %s1698_s8 }
  0x3d   : > { %564 = vmatpush.bf16.msra.mxu1 %v2099_v24  ;;  %v378_v48 = vld [vmem:[%s377_s6] sm:$0xff]  ;;  %v379_v55 = vld [vmem:[%s377_s6 + $0x8] sm:$0xff]  ;;  %s1627_s13 = smul.u32 80, %s1910_s18  ;;  %s1378_s29 = scalar_lea.vmem %s2195_s30, %s1637_s28 }
  0x3e   : > { %577 = vmatpush.bf16.msra.mxu2 %v2101_v26  ;;  %590 = vmatpush.bf16.msra.mxu3 %v2104_v31  ;;  %v380_v49 = vunpack.c.l.bf16 %v378_v48  ;;  %v381_v51 = vunpack.c.h.bf16 %v378_v48  ;;  %v382_v63 = vunpack.c.l.bf16 %v379_v55  ;;  %v383_v0 = vunpack.c.h.bf16 %v379_v55  ;;  %s1630_s15 = smul.u32 20, %s1910_s18  ;;  %s1640_s6 = sshll.u32 %s1910_s18, 2 }
  0x3f   : > { %s1363_s14 = scalar_lea.vmem %s2195_s30, %s1627_s13  ;;  %s1632_s23 = smul.u32 48, %s1910_s18 }
  0x40   : > { %552 = vmatpush.bf16.msra.mxu0 %v2107_v40  ;;  %s1367_s21 = scalar_lea.vmem %s2206_s11, %s1630_s15  ;;  %s1635_s26 = smul.u32 12, %s1910_s18 }
  0x41   : > { %565 = vmatpush.bf16.msra.mxu1 %v2111_v41  ;;  %s1371_s25 = scalar_lea.vmem %s2195_s30, %s1632_s23  ;;  %s1381_s7 = scalar_lea.vmem %s2206_s11, %s1640_s6 }
  0x42   : > { %578 = vmatpush.bf16.msra.mxu2 %v2113_v42  ;;  %591 = vmatpush.bf16.msra.mxu3 %v2116_v43  ;;  %s1375_s27 = scalar_lea.vmem %s2206_s11, %s1635_s26  ;;  %s889_s8 = ssub.s32 4, %s1910_s18 }
  0x43   : > { %553 = vmatmul.bf16.vlgmr.msra.gmra.mxu0 %v1923_v47  ;;  %s1699_s9 = sshll.u32 %s889_s8, 4 }
  0x44   : > { %634 = vmatpush.bf16.msrb.mxu0 %v2026_v3  ;;  %566 = vmatmul.bf16.vlgmr.msra.gmra.mxu1 %v1923_v47  ;;  %s892_s10 = scalar_lea.vmem %s2195_s30, %s1699_s9 }
  0x45   : > { %647 = vmatpush.bf16.msrb.mxu1 %v2028_v7  ;;  %579 = vmatmul.bf16.vlgmr.msra.gmra.mxu2 %v1923_v47 }
  0x46   : > { %592 = vmatmul.bf16.vlgmr.msra.gmra.mxu3 %v1923_v47  ;;  %660 = vmatpush.bf16.msrb.mxu2 %v2030_v8 }
  0x47   : > { %673 = vmatpush.bf16.msrb.mxu3 %v2033_v12 }
  0x48   : > { %635 = vmatpush.bf16.msrb.mxu0 %v2037_v16 }
  0x49   : > { %648 = vmatpush.bf16.msrb.mxu1 %v2039_v17 }
  0x4a   : > { %661 = vmatpush.bf16.msrb.mxu2 %v2042_v21 }
  0x4b   : > { %674 = vmatpush.bf16.msrb.mxu3 %v2044_v25 }
  0x4c   : > { %636 = vmatpush.bf16.msrb.mxu0 %v2047_v29 }
  0x4d   : > { %649 = vmatpush.bf16.msrb.mxu1 %v2051_v33 }
  0x4e   : > { %662 = vmatpush.bf16.msrb.mxu2 %v2053_v34 }
  0x4f   : > { %675 = vmatpush.bf16.msrb.mxu3 %v2056_v38 }
  0x50   : > { %637 = vmatpush.bf16.msrb.mxu0 %v2059_v44 }
  0x51   : > { %650 = vmatpush.bf16.msrb.mxu1 %v2063_v45 }
  0x52   : > { %663 = vmatpush.bf16.msrb.mxu2 %v2065_v46 }
  0x53   : > { %676 = vmatpush.bf16.msrb.mxu3 %v2068_v50 }
  0x54   : > { %638 = vmatpush.bf16.msrb.mxu0 %v2071_v56 }
  0x55   : > { %651 = vmatpush.bf16.msrb.mxu1 %v2075_v57 }
  0x56   : > { %664 = vmatpush.bf16.msrb.mxu2 %v2077_v58 }
  0x57   : > { %677 = vmatpush.bf16.msrb.mxu3 %v2080_v62 }
  0x58   : > { %639 = vmatpush.bf16.msrb.mxu0 %v2083_v5 }
  0x59   : > { %652 = vmatpush.bf16.msrb.mxu1 %v2087_v6 }
  0x5a   : > { %665 = vmatpush.bf16.msrb.mxu2 %v2089_v9 }
  0x5b   : > { %678 = vmatpush.bf16.msrb.mxu3 %v2092_v14 }
  0x5c   : > { %640 = vmatpush.bf16.msrb.mxu0 %v2095_v23 }
  0x5d   : > { %653 = vmatpush.bf16.msrb.mxu1 %v2099_v24 }
  0x5e   : > { %666 = vmatpush.bf16.msrb.mxu2 %v2101_v26 }
  0x5f   : > { %679 = vmatpush.bf16.msrb.mxu3 %v2104_v31 }
  0x60   : > { %641 = vmatpush.bf16.msrb.mxu0 %v2107_v40 }
  0x61   : > { %654 = vmatpush.bf16.msrb.mxu1 %v2111_v41 }
  0x62   : > { %667 = vmatpush.bf16.msrb.mxu2 %v2113_v42 }
  0x63   : > { %680 = vmatpush.bf16.msrb.mxu3 %v2116_v43 }
  0x64   : > { %723 = vmatpush.bf16.msra.mxu0 %v2026_v3 }
  0x65   : > { %736 = vmatpush.bf16.msra.mxu1 %v2028_v7 }
  0x66   : > { %749 = vmatpush.bf16.msra.mxu2 %v2030_v8 }
  0x67   : > { %762 = vmatpush.bf16.msra.mxu3 %v2033_v12 }
  0x68   : > { %724 = vmatpush.bf16.msra.mxu0 %v2037_v16 }
  0x69   : > { %737 = vmatpush.bf16.msra.mxu1 %v2039_v17 }
  0x6a   : > { %750 = vmatpush.bf16.msra.mxu2 %v2042_v21 }
  0x6b   : > { %763 = vmatpush.bf16.msra.mxu3 %v2044_v25 }
  0x6c   : > { %725 = vmatpush.bf16.msra.mxu0 %v2047_v29 }
  0x6d   : > { %738 = vmatpush.bf16.msra.mxu1 %v2051_v33 }
  0x6e   : > { %751 = vmatpush.bf16.msra.mxu2 %v2053_v34 }
  0x6f   : > { %764 = vmatpush.bf16.msra.mxu3 %v2056_v38 }
  0x70   : > { %726 = vmatpush.bf16.msra.mxu0 %v2059_v44 }
  0x71   : > { %739 = vmatpush.bf16.msra.mxu1 %v2063_v45 }
  0x72   : > { %752 = vmatpush.bf16.msra.mxu2 %v2065_v46 }
  0x73   : > { %765 = vmatpush.bf16.msra.mxu3 %v2068_v50 }
  0x74   : > { %727 = vmatpush.bf16.msra.mxu0 %v2071_v56 }
  0x75   : > { %740 = vmatpush.bf16.msra.mxu1 %v2075_v57 }
  0x76   : > { %753 = vmatpush.bf16.msra.mxu2 %v2077_v58 }
  0x77   : > { %766 = vmatpush.bf16.msra.mxu3 %v2080_v62 }
  0x78   : > { %728 = vmatpush.bf16.msra.mxu0 %v2083_v5 }
  0x79   : > { %741 = vmatpush.bf16.msra.mxu1 %v2087_v6 }
  0x7a   : > { %754 = vmatpush.bf16.msra.mxu2 %v2089_v9 }
  0x7b   : > { %767 = vmatpush.bf16.msra.mxu3 %v2092_v14 }
  0x7c   : > { %729 = vmatpush.bf16.msra.mxu0 %v2095_v23 }
  0x7d   : > { %742 = vmatpush.bf16.msra.mxu1 %v2099_v24 }
  0x7e   : > { %755 = vmatpush.bf16.msra.mxu2 %v2101_v26 }
  0x7f   : > { %768 = vmatpush.bf16.msra.mxu3 %v2104_v31 }
  0x80   : > { %730 = vmatpush.bf16.msra.mxu0 %v2107_v40 }
  0x81   : > { %743 = vmatpush.bf16.msra.mxu1 %v2111_v41 }
  0x82   : > { %756 = vmatpush.bf16.msra.mxu2 %v2113_v42 }
  0x83   : > { %769 = vmatpush.bf16.msra.mxu3 %v2116_v43 }
  0xc0   : > { %v554_v52 = vpop.f32.mrf.mxu0 }
  0xc1   : > { %v597_v53 = vadd.f32 %v554_v52, %v380_v49  ;;  %v567_v54 = vpop.f32.mrf.mxu1 }
  0xc2   : > { %v598_v59 = vadd.f32 %v567_v54, %v381_v51  ;;  %v1628_v54 = vld [vmem:[%s1363_s14 + $0x10] sm:$0xff] }
  0xc3   : > { %v601_v60 = vmul.f32 0.5, %v597_v53  ;;  %v630_v55 = vunpack.c.l.bf16 %v1628_v54 }
  0xc4   : > { %v605_v61 = vmul.f32 0.5, %v598_v59  ;;  %v631_v59 = vunpack.c.h.bf16 %v1628_v54 }
  0xc5   : > { %1758 = vtanh.f32 %v601_v60 }
  0xc6   : > { %1760 = vtanh.f32 %v605_v61 }
  0xc8   : > { %v580_v1 = vpop.f32.mrf.mxu2  ;;  %v556_v10 = vpop.f32.mrf.mxu0 }
  0xc9   : > { %v599_v2 = vadd.f32 %v580_v1, %v382_v63  ;;  %v593_v4 = vpop.f32.mrf.mxu3  ;;  %v569_v13 = vpop.f32.mrf.mxu1  ;;  %v1629_v1 = vld [vmem:[%s1363_s14 + $0x18] sm:$0xff]  ;;  %s1645_s14 = smul.u32 4294967248, %s1910_s18 }
  0xca   : > { %v600_v11 = vadd.f32 %v593_v4, %v383_v0  ;;  %v632_v10 = vunpack.c.l.bf16 %v1629_v1 }
  0xcb   : > { %1762 = vtanh.f32 %v599_v2  ;;  %v1759_v15 = vpop.eup %1758  ;;  %s1389_s15 = scalar_lea.vmem %s2195_s30, %s1645_s14 }
  0xcc   : > { %v610_v18 = vmul.f32 0.5, %v600_v11  ;;  %v1761_v19 = vpop.eup %1760  ;;  %v603_v20 = vmul.f32 0.5, %v1759_v15  ;;  %v633_v11 = vunpack.c.h.bf16 %v1629_v1 }
  0xcd   : > { %v607_v22 = vmul.f32 0.5, %v1761_v19 }
  0xce   : > { %1764 = vtanh.f32 %v610_v18  ;;  %v604_v27 = vadd.f32 0.5, %v603_v20 }
  0xcf   : > { %v608_v28 = vadd.f32 0.5, %v607_v22 }
  0xd0   : > { %v582_v30 = vpop.f32.mrf.mxu2 }
  0xd1   : > { %v1763_v32 = vpop.eup %1762  ;;  %v595_v35 = vpop.f32.mrf.mxu3  ;;  %v614_v36 = vmul.f32 0.0, %v608_v28 }
  0xd2   : > { %v615_v37 = vmul.f32 %v1763_v32, %v604_v27 }
  0xd4   : > { %v1765_v39 = vpop.eup %1764  ;;  %v2198_v47 = vadd.f32 %v615_v37, %v614_v36 }
  0xd5   : > { %v612_v48 = vmul.f32 0.5, %v1765_v39 }
  0xd6   : > { %1766 = vtanh.f32 %v2198_v47 }
  0xd7   : > { %v613_v49 = vadd.f32 0.5, %v612_v48 }
  0xdc   : > { %v1767_v51 = vpop.eup %1766 }
  0xdd   : > { %v618_v52 = vmul.f32 %v1767_v51, %v613_v49 }
  0xdf   : > { %v619_v53 = vpack.c.bf16 %v618_v52, %v618_v52 }
  0xe1   : > { %622 = vst [vmem:[%s621_s12] sm:$0xf] %v619_v53  ;;  %642 = vmatmul.bf16.vlgmr.msrb.gmra.mxu0 %v619_v53  ;;  %655 = vmatmul.bf16.vlgmr.msrb.gmra.mxu1 %v619_v53  ;;  %s1644_s12 = sshll.u32 %s889_s8, 2 }
  0xe2   : > { %668 = vmatmul.bf16.vlgmr.msrb.gmra.mxu2 %v619_v53  ;;  %681 = vmatmul.bf16.vlgmr.msrb.gmra.mxu3 %v619_v53  ;;  %s975_s13 = scalar_lea.vmem %s2206_s11, %s1644_s12 }
  0xe3   : > { %811 = vmatpush.bf16.msrb.mxu0 %v2026_v3  ;;  %824 = vmatpush.bf16.msrb.mxu1 %v2028_v7 }
  0xe4   : > { %837 = vmatpush.bf16.msrb.mxu2 %v2030_v8  ;;  %850 = vmatpush.bf16.msrb.mxu3 %v2033_v12 }
  0xe7   : > { %812 = vmatpush.bf16.msrb.mxu0 %v2037_v16  ;;  %825 = vmatpush.bf16.msrb.mxu1 %v2039_v17 }
  0xe8   : > { %838 = vmatpush.bf16.msrb.mxu2 %v2042_v21  ;;  %851 = vmatpush.bf16.msrb.mxu3 %v2044_v25 }
  0xeb   : > { %813 = vmatpush.bf16.msrb.mxu0 %v2047_v29  ;;  %826 = vmatpush.bf16.msrb.mxu1 %v2051_v33 }
  0xec   : > { %839 = vmatpush.bf16.msrb.mxu2 %v2053_v34  ;;  %852 = vmatpush.bf16.msrb.mxu3 %v2056_v38 }
  0xef   : > { %814 = vmatpush.bf16.msrb.mxu0 %v2059_v44  ;;  %827 = vmatpush.bf16.msrb.mxu1 %v2063_v45 }
  0xf0   : > { %840 = vmatpush.bf16.msrb.mxu2 %v2065_v46  ;;  %853 = vmatpush.bf16.msrb.mxu3 %v2068_v50 }
  0xf3   : > { %815 = vmatpush.bf16.msrb.mxu0 %v2071_v56  ;;  %828 = vmatpush.bf16.msrb.mxu1 %v2075_v57 }
  0xf4   : > { %841 = vmatpush.bf16.msrb.mxu2 %v2077_v58  ;;  %854 = vmatpush.bf16.msrb.mxu3 %v2080_v62 }
  0xf7   : > { %816 = vmatpush.bf16.msrb.mxu0 %v2083_v5  ;;  %829 = vmatpush.bf16.msrb.mxu1 %v2087_v6 }
  0xf8   : > { %842 = vmatpush.bf16.msrb.mxu2 %v2089_v9  ;;  %855 = vmatpush.bf16.msrb.mxu3 %v2092_v14 }
  0xfb   : > { %817 = vmatpush.bf16.msrb.mxu0 %v2095_v23  ;;  %830 = vmatpush.bf16.msrb.mxu1 %v2099_v24 }
  0xfc   : > { %843 = vmatpush.bf16.msrb.mxu2 %v2101_v26  ;;  %856 = vmatpush.bf16.msrb.mxu3 %v2104_v31 }
  0xff   : > { %818 = vmatpush.bf16.msrb.mxu0 %v2107_v40  ;;  %831 = vmatpush.bf16.msrb.mxu1 %v2111_v41 }
 0x100   : > { %844 = vmatpush.bf16.msrb.mxu2 %v2113_v42  ;;  %857 = vmatpush.bf16.msrb.mxu3 %v2116_v43 }
 0x15e   : > { %v643_v60 = vpop.f32.mrf.mxu0  ;;  %v656_v61 = vpop.f32.mrf.mxu1 }
 0x15f   : > { %v686_v63 = vadd.f32 %v643_v60, %v630_v55  ;;  %v687_v0 = vadd.f32 %v656_v61, %v631_v59 }
 0x161   : > { %v690_v2 = vmul.f32 0.5, %v686_v63  ;;  %v694_v4 = vmul.f32 0.5, %v687_v0 }
 0x163   : > { %1768 = vtanh.f32 %v690_v2 }
 0x164   : > { %1770 = vtanh.f32 %v694_v4 }
 0x165   : > { %v669_v13 = vpop.f32.mrf.mxu2  ;;  %v682_v15 = vpop.f32.mrf.mxu3 }
 0x166   : > { %v688_v18 = vadd.f32 %v669_v13, %v632_v10  ;;  %v689_v19 = vadd.f32 %v682_v15, %v633_v11  ;;  %v645_v20 = vpop.f32.mrf.mxu0  ;;  %v658_v22 = vpop.f32.mrf.mxu1  ;;  %v1634_v13 = vld [vmem:[%s1371_s25 + $0x28] sm:$0xff] }
 0x167   : > { %v722_v20 = vunpack.c.h.bf16 %v1634_v13 }
 0x168   : > { %1772 = vtanh.f32 %v688_v18  ;;  %v699_v27 = vmul.f32 0.5, %v689_v19  ;;  %v721_v19 = vunpack.c.l.bf16 %v1634_v13 }
 0x169   : > { %v1769_v28 = vpop.eup %1768 }
 0x16a   : > { %v1771_v30 = vpop.eup %1770  ;;  %v692_v32 = vmul.f32 0.5, %v1769_v28  ;;  %1774 = vtanh.f32 %v699_v27 }
 0x16b   : > { %v696_v35 = vmul.f32 0.5, %v1771_v30 }
 0x16c   : > { %v693_v36 = vadd.f32 0.5, %v692_v32 }
 0x16d   : > { %v697_v37 = vadd.f32 0.5, %v696_v35  ;;  %v671_v39 = vpop.f32.mrf.mxu2  ;;  %v684_v48 = vpop.f32.mrf.mxu3 }
 0x16e   : > { %v1773_v49 = vpop.eup %1772 }
 0x16f   : > { %v703_v51 = vmul.f32 %v697_v37, %v2198_v47  ;;  %v704_v52 = vmul.f32 %v1773_v49, %v693_v36  ;;  %v1633_v47 = vld [vmem:[%s1371_s25 + $0x20] sm:$0xff]  ;;  %s1650_s25 = smul.u32 4294967216, %s1910_s18 }
 0x170   : > { %v1775_v53 = vpop.eup %1774  ;;  %v719_v0 = vunpack.c.l.bf16 %v1633_v47  ;;  %v720_v1 = vunpack.c.h.bf16 %v1633_v47 }
 0x171   : > { %v2244_v54 = vadd.f32 %v704_v52, %v703_v51  ;;  %v701_v55 = vmul.f32 0.5, %v1775_v53  ;;  %s1397_s26 = scalar_lea.vmem %s2195_s30, %s1650_s25 }
 0x173   : > { %1776 = vtanh.f32 %v2244_v54  ;;  %v702_v59 = vadd.f32 0.5, %v701_v55 }
 0x179   : > { %v1777_v60 = vpop.eup %1776 }
 0x17a   : > { %v707_v61 = vmul.f32 %v1777_v60, %v702_v59 }
 0x17c   : > { %v708_v63 = vpack.c.bf16 %v707_v61, %v707_v61 }
 0x17e   : > { %1631 = vst [vmem:[%s1367_s21 + $0x4] sm:$0xf] %v708_v63  ;;  %731 = vmatmul.bf16.vlgmr.msra.gmra.mxu0 %v708_v63  ;;  %744 = vmatmul.bf16.vlgmr.msra.gmra.mxu1 %v708_v63  ;;  %s1648_s21 = smul.u32 4294967284, %s1910_s18 }
 0x17f   : > { %757 = vmatmul.bf16.vlgmr.msra.gmra.mxu2 %v708_v63  ;;  %770 = vmatmul.bf16.vlgmr.msra.gmra.mxu3 %v708_v63 }
 0x180   : > { %899 = vmatpush.bf16.msra.mxu0 %v2026_v3  ;;  %912 = vmatpush.bf16.msra.mxu1 %v2028_v7  ;;  %s1393_s23 = scalar_lea.vmem %s2206_s11, %s1648_s21 }
 0x181   : > { %925 = vmatpush.bf16.msra.mxu2 %v2030_v8  ;;  %938 = vmatpush.bf16.msra.mxu3 %v2033_v12 }
 0x184   : > { %900 = vmatpush.bf16.msra.mxu0 %v2037_v16  ;;  %913 = vmatpush.bf16.msra.mxu1 %v2039_v17 }
 0x185   : > { %926 = vmatpush.bf16.msra.mxu2 %v2042_v21  ;;  %939 = vmatpush.bf16.msra.mxu3 %v2044_v25 }
 0x188   : > { %901 = vmatpush.bf16.msra.mxu0 %v2047_v29  ;;  %914 = vmatpush.bf16.msra.mxu1 %v2051_v33 }
 0x189   : > { %927 = vmatpush.bf16.msra.mxu2 %v2053_v34  ;;  %940 = vmatpush.bf16.msra.mxu3 %v2056_v38 }
 0x18c   : > { %902 = vmatpush.bf16.msra.mxu0 %v2059_v44  ;;  %915 = vmatpush.bf16.msra.mxu1 %v2063_v45 }
 0x18d   : > { %928 = vmatpush.bf16.msra.mxu2 %v2065_v46  ;;  %941 = vmatpush.bf16.msra.mxu3 %v2068_v50 }
 0x190   : > { %903 = vmatpush.bf16.msra.mxu0 %v2071_v56  ;;  %916 = vmatpush.bf16.msra.mxu1 %v2075_v57 }
 0x191   : > { %929 = vmatpush.bf16.msra.mxu2 %v2077_v58  ;;  %942 = vmatpush.bf16.msra.mxu3 %v2080_v62 }
 0x194   : > { %904 = vmatpush.bf16.msra.mxu0 %v2083_v5  ;;  %917 = vmatpush.bf16.msra.mxu1 %v2087_v6 }
 0x195   : > { %930 = vmatpush.bf16.msra.mxu2 %v2089_v9  ;;  %943 = vmatpush.bf16.msra.mxu3 %v2092_v14 }
 0x198   : > { %905 = vmatpush.bf16.msra.mxu0 %v2095_v23  ;;  %918 = vmatpush.bf16.msra.mxu1 %v2099_v24 }
 0x199   : > { %931 = vmatpush.bf16.msra.mxu2 %v2101_v26  ;;  %944 = vmatpush.bf16.msra.mxu3 %v2104_v31 }
 0x19c   : > { %906 = vmatpush.bf16.msra.mxu0 %v2107_v40  ;;  %919 = vmatpush.bf16.msra.mxu1 %v2111_v41 }
 0x19d   : > { %932 = vmatpush.bf16.msra.mxu2 %v2113_v42  ;;  %945 = vmatpush.bf16.msra.mxu3 %v2116_v43 }
 0x1fb   : > { %v732_v2 = vpop.f32.mrf.mxu0  ;;  %v745_v4 = vpop.f32.mrf.mxu1 }
 0x1fc   : > { %v775_v10 = vadd.f32 %v732_v2, %v719_v0  ;;  %v776_v11 = vadd.f32 %v745_v4, %v720_v1 }
 0x1fe   : > { %v779_v15 = vmul.f32 0.5, %v775_v10  ;;  %v783_v18 = vmul.f32 0.5, %v776_v11 }
 0x200   : > { %1778 = vtanh.f32 %v779_v15 }
 0x201   : > { %1780 = vtanh.f32 %v783_v18 }
 0x202   : > { %v758_v22 = vpop.f32.mrf.mxu2  ;;  %v771_v27 = vpop.f32.mrf.mxu3 }
 0x203   : > { %v777_v28 = vadd.f32 %v758_v22, %v721_v19  ;;  %v778_v30 = vadd.f32 %v771_v27, %v722_v20  ;;  %v734_v32 = vpop.f32.mrf.mxu0  ;;  %v747_v35 = vpop.f32.mrf.mxu1  ;;  %v1639_v22 = vld [vmem:[%s1378_s29 + $0x38] sm:$0xff] }
 0x204   : > { %v810_v32 = vunpack.c.h.bf16 %v1639_v22 }
 0x205   : > { %1782 = vtanh.f32 %v777_v28  ;;  %v788_v36 = vmul.f32 0.5, %v778_v30  ;;  %v809_v30 = vunpack.c.l.bf16 %v1639_v22 }
 0x206   : > { %v1779_v37 = vpop.eup %1778 }
 0x207   : > { %v1781_v39 = vpop.eup %1780  ;;  %v781_v48 = vmul.f32 0.5, %v1779_v37  ;;  %1784 = vtanh.f32 %v788_v36 }
 0x208   : > { %v785_v49 = vmul.f32 0.5, %v1781_v39 }
 0x209   : > { %v782_v51 = vadd.f32 0.5, %v781_v48 }
 0x20a   : > { %v786_v52 = vadd.f32 0.5, %v785_v49  ;;  %v760_v53 = vpop.f32.mrf.mxu2  ;;  %v773_v55 = vpop.f32.mrf.mxu3 }
 0x20b   : > { %v1783_v59 = vpop.eup %1782 }
 0x20c   : > { %v792_v60 = vmul.f32 %v786_v52, %v2244_v54  ;;  %v793_v61 = vmul.f32 %v1783_v59, %v782_v51  ;;  %v1638_v54 = vld [vmem:[%s1378_s29 + $0x30] sm:$0xff]  ;;  %s1655_s29 = smul.u32 4294967184, %s1910_s18 }
 0x20d   : > { %v1785_v63 = vpop.eup %1784  ;;  %v807_v11 = vunpack.c.l.bf16 %v1638_v54  ;;  %v808_v13 = vunpack.c.h.bf16 %v1638_v54 }
 0x20e   : > { %v2284_v47 = vadd.f32 %v793_v61, %v792_v60  ;;  %v790_v0 = vmul.f32 0.5, %v1785_v63  ;;  %s1405_s6 = scalar_lea.vmem %s2195_s30, %s1655_s29  ;;  %s1494_s30 = sshll.u32 %s2188_s24, 3 }
 0x20f   : > { %s333_s9 = scalar_lea.vmem %s2446_s4, %s1494_s30 }
 0x210   : > { %1786 = vtanh.f32 %v2284_v47  ;;  %v791_v1 = vadd.f32 0.5, %v790_v0 }
 0x216   : > { %v1787_v2 = vpop.eup %1786 }
 0x217   : > { %v796_v4 = vmul.f32 %v1787_v2, %v791_v1 }
 0x219   : > { %v797_v10 = vpack.c.bf16 %v796_v4, %v796_v4 }
 0x21b   : > { %1636 = vst [vmem:[%s1375_s27 + $0x8] sm:$0xf] %v797_v10  ;;  %819 = vmatmul.bf16.vlgmr.msrb.gmra.mxu0 %v797_v10  ;;  %832 = vmatmul.bf16.vlgmr.msrb.gmra.mxu1 %v797_v10  ;;  %s1653_s27 = smul.u32 4294967276, %s1910_s18 }
 0x21c   : > { %845 = vmatmul.bf16.vlgmr.msrb.gmra.mxu2 %v797_v10  ;;  %858 = vmatmul.bf16.vlgmr.msrb.gmra.mxu3 %v797_v10 }
 0x21d   : > { %988 = vmatpush.bf16.msrb.mxu0 %v2026_v3  ;;  %1001 = vmatpush.bf16.msrb.mxu1 %v2028_v7  ;;  %s1401_s28 = scalar_lea.vmem %s2206_s11, %s1653_s27 }
 0x21e   : > { %1014 = vmatpush.bf16.msrb.mxu2 %v2030_v8  ;;  %1027 = vmatpush.bf16.msrb.mxu3 %v2033_v12 }
 0x221   : > { %989 = vmatpush.bf16.msrb.mxu0 %v2037_v16  ;;  %1002 = vmatpush.bf16.msrb.mxu1 %v2039_v17 }
 0x222   : > { %1015 = vmatpush.bf16.msrb.mxu2 %v2042_v21  ;;  %1028 = vmatpush.bf16.msrb.mxu3 %v2044_v25 }
 0x225   : > { %990 = vmatpush.bf16.msrb.mxu0 %v2047_v29  ;;  %1003 = vmatpush.bf16.msrb.mxu1 %v2051_v33 }
 0x226   : > { %1016 = vmatpush.bf16.msrb.mxu2 %v2053_v34  ;;  %1029 = vmatpush.bf16.msrb.mxu3 %v2056_v38 }
 0x229   : > { %991 = vmatpush.bf16.msrb.mxu0 %v2059_v44  ;;  %1004 = vmatpush.bf16.msrb.mxu1 %v2063_v45 }
 0x22a   : > { %1017 = vmatpush.bf16.msrb.mxu2 %v2065_v46  ;;  %1030 = vmatpush.bf16.msrb.mxu3 %v2068_v50 }
 0x22d   : > { %992 = vmatpush.bf16.msrb.mxu0 %v2071_v56  ;;  %1005 = vmatpush.bf16.msrb.mxu1 %v2075_v57 }
 0x22e   : > { %1018 = vmatpush.bf16.msrb.mxu2 %v2077_v58  ;;  %1031 = vmatpush.bf16.msrb.mxu3 %v2080_v62 }
 0x231   : > { %993 = vmatpush.bf16.msrb.mxu0 %v2083_v5  ;;  %1006 = vmatpush.bf16.msrb.mxu1 %v2087_v6 }
 0x232   : > { %1019 = vmatpush.bf16.msrb.mxu2 %v2089_v9  ;;  %1032 = vmatpush.bf16.msrb.mxu3 %v2092_v14 }
 0x235   : > { %994 = vmatpush.bf16.msrb.mxu0 %v2095_v23  ;;  %1007 = vmatpush.bf16.msrb.mxu1 %v2099_v24 }
 0x236   : > { %1020 = vmatpush.bf16.msrb.mxu2 %v2101_v26  ;;  %1033 = vmatpush.bf16.msrb.mxu3 %v2104_v31 }
 0x239   : > { %995 = vmatpush.bf16.msrb.mxu0 %v2107_v40  ;;  %1008 = vmatpush.bf16.msrb.mxu1 %v2111_v41 }
 0x23a   : > { %1021 = vmatpush.bf16.msrb.mxu2 %v2113_v42  ;;  %1034 = vmatpush.bf16.msrb.mxu3 %v2116_v43 }
 0x298   : > { %v820_v15 = vpop.f32.mrf.mxu0  ;;  %v833_v18 = vpop.f32.mrf.mxu1 }
 0x299   : > { %v863_v19 = vadd.f32 %v820_v15, %v807_v11  ;;  %v864_v20 = vadd.f32 %v833_v18, %v808_v13 }
 0x29b   : > { %v867_v27 = vmul.f32 0.5, %v863_v19  ;;  %v871_v28 = vmul.f32 0.5, %v864_v20 }
 0x29d   : > { %1788 = vtanh.f32 %v867_v27 }
 0x29e   : > { %1790 = vtanh.f32 %v871_v28 }
 0x29f   : > { %v846_v35 = vpop.f32.mrf.mxu2  ;;  %v859_v36 = vpop.f32.mrf.mxu3 }
 0x2a0   : > { %v865_v37 = vadd.f32 %v846_v35, %v809_v30  ;;  %v866_v39 = vadd.f32 %v859_v36, %v810_v32  ;;  %v822_v48 = vpop.f32.mrf.mxu0  ;;  %v835_v49 = vpop.f32.mrf.mxu1  ;;  %v894_v35 = vld [vmem:[%s892_s10 + $0x8] sm:$0xff] }
 0x2a1   : > { %v898_v48 = vunpack.c.h.bf16 %v894_v35 }
 0x2a2   : > { %1792 = vtanh.f32 %v865_v37  ;;  %v876_v51 = vmul.f32 0.5, %v866_v39  ;;  %v897_v39 = vunpack.c.l.bf16 %v894_v35 }
 0x2a3   : > { %v1789_v52 = vpop.eup %1788 }
 0x2a4   : > { %v1791_v53 = vpop.eup %1790  ;;  %v869_v55 = vmul.f32 0.5, %v1789_v52  ;;  %1794 = vtanh.f32 %v876_v51 }
 0x2a5   : > { %v873_v59 = vmul.f32 0.5, %v1791_v53 }
 0x2a6   : > { %v870_v60 = vadd.f32 0.5, %v869_v55 }
 0x2a7   : > { %v874_v61 = vadd.f32 0.5, %v873_v59  ;;  %v848_v63 = vpop.f32.mrf.mxu2  ;;  %v861_v0 = vpop.f32.mrf.mxu3 }
 0x2a8   : > { %v1793_v1 = vpop.eup %1792 }
 0x2a9   : > { %v880_v2 = vmul.f32 %v874_v61, %v2284_v47  ;;  %v881_v4 = vmul.f32 %v1793_v1, %v870_v60  ;;  %v893_v47 = vld [vmem:[%s892_s10] sm:$0xff]  ;;  %s1658_s10 = smul.u32 4294967268, %s1910_s18 }
 0x2aa   : > { %v1795_v10 = vpop.eup %1794  ;;  %v895_v20 = vunpack.c.l.bf16 %v893_v47  ;;  %v896_v22 = vunpack.c.h.bf16 %v893_v47 }
 0x2ab   : > { %v2324_v54 = vadd.f32 %v881_v4, %v880_v2  ;;  %v878_v11 = vmul.f32 0.5, %v1795_v10  ;;  %s1409_s14 = scalar_lea.vmem %s2206_s11, %s1658_s10 }
 0x2ad   : > { %1796 = vtanh.f32 %v2324_v54  ;;  %v879_v13 = vadd.f32 0.5, %v878_v11 }
 0x2b3   : > { %v1797_v15 = vpop.eup %1796 }
 0x2b4   : > { %v884_v18 = vmul.f32 %v1797_v15, %v879_v13 }
 0x2b6   : > { %v885_v19 = vpack.c.bf16 %v884_v18, %v884_v18 }
 0x2b8   : > { %1641 = vst [vmem:[%s1381_s7 + $0xc] sm:$0xf] %v885_v19  ;;  %907 = vmatmul.bf16.vlgmr.msra.gmra.mxu0 %v885_v19  ;;  %920 = vmatmul.bf16.vlgmr.msra.gmra.mxu1 %v885_v19 }
 0x2b9   : > { %933 = vmatmul.bf16.vlgmr.msra.gmra.mxu2 %v885_v19  ;;  %946 = vmatmul.bf16.vlgmr.msra.gmra.mxu3 %v885_v19 }
 0x2ba   : > { %1077 = vmatpush.bf16.msra.mxu0 %v2026_v3  ;;  %1090 = vmatpush.bf16.msra.mxu1 %v2028_v7 }
 0x2bb   : > { %1103 = vmatpush.bf16.msra.mxu2 %v2030_v8  ;;  %1116 = vmatpush.bf16.msra.mxu3 %v2033_v12 }
 0x2be   : > { %1078 = vmatpush.bf16.msra.mxu0 %v2037_v16  ;;  %1091 = vmatpush.bf16.msra.mxu1 %v2039_v17 }
 0x2bf   : > { %1104 = vmatpush.bf16.msra.mxu2 %v2042_v21  ;;  %1117 = vmatpush.bf16.msra.mxu3 %v2044_v25 }
 0x2c2   : > { %1079 = vmatpush.bf16.msra.mxu0 %v2047_v29  ;;  %1092 = vmatpush.bf16.msra.mxu1 %v2051_v33 }
 0x2c3   : > { %1105 = vmatpush.bf16.msra.mxu2 %v2053_v34  ;;  %1118 = vmatpush.bf16.msra.mxu3 %v2056_v38 }
 0x2c6   : > { %1080 = vmatpush.bf16.msra.mxu0 %v2059_v44  ;;  %1093 = vmatpush.bf16.msra.mxu1 %v2063_v45 }
 0x2c7   : > { %1106 = vmatpush.bf16.msra.mxu2 %v2065_v46  ;;  %1119 = vmatpush.bf16.msra.mxu3 %v2068_v50 }
 0x2ca   : > { %1081 = vmatpush.bf16.msra.mxu0 %v2071_v56  ;;  %1094 = vmatpush.bf16.msra.mxu1 %v2075_v57 }
 0x2cb   : > { %1107 = vmatpush.bf16.msra.mxu2 %v2077_v58  ;;  %1120 = vmatpush.bf16.msra.mxu3 %v2080_v62 }
 0x2ce   : > { %1082 = vmatpush.bf16.msra.mxu0 %v2083_v5  ;;  %1095 = vmatpush.bf16.msra.mxu1 %v2087_v6 }
 0x2cf   : > { %1108 = vmatpush.bf16.msra.mxu2 %v2089_v9  ;;  %1121 = vmatpush.bf16.msra.mxu3 %v2092_v14 }
 0x2d2   : > { %1083 = vmatpush.bf16.msra.mxu0 %v2095_v23  ;;  %1096 = vmatpush.bf16.msra.mxu1 %v2099_v24 }
 0x2d3   : > { %1109 = vmatpush.bf16.msra.mxu2 %v2101_v26  ;;  %1122 = vmatpush.bf16.msra.mxu3 %v2104_v31 }
 0x2d6   : > { %1084 = vmatpush.bf16.msra.mxu0 %v2107_v40  ;;  %1097 = vmatpush.bf16.msra.mxu1 %v2111_v41 }
 0x2d7   : > { %1110 = vmatpush.bf16.msra.mxu2 %v2113_v42  ;;  %1123 = vmatpush.bf16.msra.mxu3 %v2116_v43 }
 0x335   : > { %v908_v27 = vpop.f32.mrf.mxu0  ;;  %v921_v28 = vpop.f32.mrf.mxu1 }
 0x336   : > { %v951_v30 = vadd.f32 %v908_v27, %v895_v20  ;;  %v952_v32 = vadd.f32 %v921_v28, %v896_v22 }
 0x338   : > { %v955_v36 = vmul.f32 0.5, %v951_v30  ;;  %v959_v37 = vmul.f32 0.5, %v952_v32 }
 0x33a   : > { %1798 = vtanh.f32 %v955_v36 }
 0x33b   : > { %1800 = vtanh.f32 %v959_v37 }
 0x33c   : > { %v934_v49 = vpop.f32.mrf.mxu2  ;;  %v947_v51 = vpop.f32.mrf.mxu3 }
 0x33d   : > { %v953_v52 = vadd.f32 %v934_v49, %v897_v39  ;;  %v954_v53 = vadd.f32 %v947_v51, %v898_v48  ;;  %v910_v55 = vpop.f32.mrf.mxu0  ;;  %v923_v59 = vpop.f32.mrf.mxu1  ;;  %v1651_v39 = vld [vmem:[%s1397_s26 + $0x60] sm:$0xff] }
 0x33e   : > { %v1073_v48 = vunpack.c.l.bf16 %v1651_v39  ;;  %v1074_v49 = vunpack.c.h.bf16 %v1651_v39  ;;  %v1652_v59 = vld [vmem:[%s1397_s26 + $0x68] sm:$0xff] }
 0x33f   : > { %1802 = vtanh.f32 %v953_v52  ;;  %v964_v60 = vmul.f32 0.5, %v954_v53 }
 0x340   : > { %v1799_v61 = vpop.eup %1798 }
 0x341   : > { %v1801_v63 = vpop.eup %1800  ;;  %v957_v0 = vmul.f32 0.5, %v1799_v61  ;;  %1804 = vtanh.f32 %v964_v60 }
 0x342   : > { %v961_v1 = vmul.f32 0.5, %v1801_v63  ;;  %v1075_v63 = vunpack.c.l.bf16 %v1652_v59 }
 0x343   : > { %v958_v2 = vadd.f32 0.5, %v957_v0  ;;  %v1076_v0 = vunpack.c.h.bf16 %v1652_v59 }
 0x344   : > { %v962_v4 = vadd.f32 0.5, %v961_v1  ;;  %v936_v10 = vpop.f32.mrf.mxu2  ;;  %v949_v11 = vpop.f32.mrf.mxu3 }
 0x345   : > { %v1803_v13 = vpop.eup %1802 }
 0x346   : > { %v968_v15 = vmul.f32 %v962_v4, %v2324_v54  ;;  %v969_v18 = vmul.f32 %v1803_v13, %v958_v2 }
 0x347   : > { %v1805_v19 = vpop.eup %1804 }
 0x348   : > { %v2366_v47 = vadd.f32 %v969_v18, %v968_v15  ;;  %v966_v20 = vmul.f32 0.5, %v1805_v19 }
 0x34a   : > { %1806 = vtanh.f32 %v2366_v47  ;;  %v967_v22 = vadd.f32 0.5, %v966_v20 }
 0x350   : > { %v1807_v27 = vpop.eup %1806 }
 0x351   : > { %v972_v28 = vmul.f32 %v1807_v27, %v967_v22 }
 0x353   : > { %v973_v30 = vpack.c.bf16 %v972_v28, %v972_v28 }
 0x355   : > { %976 = vst [vmem:[%s975_s13] sm:$0xf] %v973_v30  ;;  %996 = vmatmul.bf16.vlgmr.msrb.gmra.mxu0 %v973_v30  ;;  %1009 = vmatmul.bf16.vlgmr.msrb.gmra.mxu1 %v973_v30  ;;  %s329_s13 = scalar_lea.vmem %s2445_s3, %s1494_s30 }
 0x356   : > { %1022 = vmatmul.bf16.vlgmr.msrb.gmra.mxu2 %v973_v30  ;;  %1035 = vmatmul.bf16.vlgmr.msrb.gmra.mxu3 %v973_v30 }
 0x357   : > { %1166 = vmatpush.bf16.msrb.mxu0 %v2026_v3  ;;  %1179 = vmatpush.bf16.msrb.mxu1 %v2028_v7  ;;  %v1646_v3 = vld [vmem:[%s1389_s15 + $0x50] sm:$0xff] }
 0x358   : > { %1192 = vmatpush.bf16.msrb.mxu2 %v2030_v8  ;;  %1205 = vmatpush.bf16.msrb.mxu3 %v2033_v12  ;;  %v984_v7 = vunpack.c.l.bf16 %v1646_v3  ;;  %v985_v8 = vunpack.c.h.bf16 %v1646_v3 }
 0x35b   : > { %1167 = vmatpush.bf16.msrb.mxu0 %v2037_v16  ;;  %1180 = vmatpush.bf16.msrb.mxu1 %v2039_v17 }
 0x35c   : > { %1193 = vmatpush.bf16.msrb.mxu2 %v2042_v21  ;;  %1206 = vmatpush.bf16.msrb.mxu3 %v2044_v25  ;;  %v1647_v25 = vld [vmem:[%s1389_s15 + $0x58] sm:$0xff] }
 0x35f   : > { %1168 = vmatpush.bf16.msrb.mxu0 %v2047_v29  ;;  %1181 = vmatpush.bf16.msrb.mxu1 %v2051_v33 }
 0x360   : > { %1194 = vmatpush.bf16.msrb.mxu2 %v2053_v34  ;;  %1207 = vmatpush.bf16.msrb.mxu3 %v2056_v38  ;;  %v986_v34 = vunpack.c.l.bf16 %v1647_v25  ;;  %v987_v38 = vunpack.c.h.bf16 %v1647_v25 }
 0x363   : > { %1169 = vmatpush.bf16.msrb.mxu0 %v2059_v44  ;;  %1182 = vmatpush.bf16.msrb.mxu1 %v2063_v45 }
 0x364   : > { %1195 = vmatpush.bf16.msrb.mxu2 %v2065_v46  ;;  %1208 = vmatpush.bf16.msrb.mxu3 %v2068_v50 }
 0x367   : > { %1170 = vmatpush.bf16.msrb.mxu0 %v2071_v56  ;;  %1183 = vmatpush.bf16.msrb.mxu1 %v2075_v57 }
 0x368   : > { %1196 = vmatpush.bf16.msrb.mxu2 %v2077_v58  ;;  %1209 = vmatpush.bf16.msrb.mxu3 %v2080_v62 }
 0x36b   : > { %1171 = vmatpush.bf16.msrb.mxu0 %v2083_v5  ;;  %1184 = vmatpush.bf16.msrb.mxu1 %v2087_v6 }
 0x36c   : > { %1197 = vmatpush.bf16.msrb.mxu2 %v2089_v9  ;;  %1210 = vmatpush.bf16.msrb.mxu3 %v2092_v14 }
 0x36f   : > { %1172 = vmatpush.bf16.msrb.mxu0 %v2095_v23  ;;  %1185 = vmatpush.bf16.msrb.mxu1 %v2099_v24 }
 0x370   : > { %1198 = vmatpush.bf16.msrb.mxu2 %v2101_v26  ;;  %1211 = vmatpush.bf16.msrb.mxu3 %v2104_v31 }
 0x373   : > { %1173 = vmatpush.bf16.msrb.mxu0 %v2107_v40  ;;  %1186 = vmatpush.bf16.msrb.mxu1 %v2111_v41 }
 0x374   : > { %1199 = vmatpush.bf16.msrb.mxu2 %v2113_v42  ;;  %1212 = vmatpush.bf16.msrb.mxu3 %v2116_v43 }
 0x3d2   : > { %v997_v12 = vpop.f32.mrf.mxu0  ;;  %v1010_v16 = vpop.f32.mrf.mxu1 }
 0x3d3   : > { %v1040_v17 = vadd.f32 %v997_v12, %v984_v7  ;;  %v1041_v21 = vadd.f32 %v1010_v16, %v985_v8 }
 0x3d5   : > { %v1044_v29 = vmul.f32 0.5, %v1040_v17  ;;  %v1048_v33 = vmul.f32 0.5, %v1041_v21 }
 0x3d7   : > { %1808 = vtanh.f32 %v1044_v29 }
 0x3d8   : > { %1810 = vtanh.f32 %v1048_v33 }
 0x3d9   : > { %v1023_v44 = vpop.f32.mrf.mxu2  ;;  %v1036_v45 = vpop.f32.mrf.mxu3 }
 0x3da   : > { %v1042_v46 = vadd.f32 %v1023_v44, %v986_v34  ;;  %v1043_v50 = vadd.f32 %v1036_v45, %v987_v38  ;;  %v999_v56 = vpop.f32.mrf.mxu0  ;;  %v1012_v57 = vpop.f32.mrf.mxu1  ;;  %v1656_v34 = vld [vmem:[%s1405_s6 + $0x70] sm:$0xff] }
 0x3db   : > { %v1162_v38 = vunpack.c.l.bf16 %v1656_v34  ;;  %v1163_v44 = vunpack.c.h.bf16 %v1656_v34  ;;  %v1657_v57 = vld [vmem:[%s1405_s6 + $0x78] sm:$0xff] }
 0x3dc   : > { %1812 = vtanh.f32 %v1042_v46  ;;  %v1053_v58 = vmul.f32 0.5, %v1043_v50 }
 0x3dd   : > { %v1809_v62 = vpop.eup %1808 }
 0x3de   : > { %v1811_v5 = vpop.eup %1810  ;;  %v1046_v6 = vmul.f32 0.5, %v1809_v62  ;;  %1814 = vtanh.f32 %v1053_v58 }
 0x3df   : > { %v1050_v9 = vmul.f32 0.5, %v1811_v5  ;;  %v1164_v5 = vunpack.c.l.bf16 %v1657_v57 }
 0x3e0   : > { %v1047_v14 = vadd.f32 0.5, %v1046_v6  ;;  %v1165_v6 = vunpack.c.h.bf16 %v1657_v57 }
 0x3e1   : > { %v1051_v23 = vadd.f32 0.5, %v1050_v9  ;;  %v1025_v24 = vpop.f32.mrf.mxu2  ;;  %v1038_v26 = vpop.f32.mrf.mxu3 }
 0x3e2   : > { %v1813_v31 = vpop.eup %1812 }
 0x3e3   : > { %v1057_v40 = vmul.f32 %v1051_v23, %v2366_v47  ;;  %v1058_v41 = vmul.f32 %v1813_v31, %v1047_v14 }
 0x3e4   : > { %v1815_v42 = vpop.eup %1814 }
 0x3e5   : > { %v1059_v43 = vadd.f32 %v1058_v41, %v1057_v40  ;;  %v1055_v54 = vmul.f32 0.5, %v1815_v42 }
 0x3e7   : > { %1816 = vtanh.f32 %v1059_v43  ;;  %v1056_v32 = vadd.f32 0.5, %v1055_v54 }
 0x3ed   : > { %v1817_v35 = vpop.eup %1816 }
 0x3ee   : > { %v1061_v36 = vmul.f32 %v1817_v35, %v1056_v32 }
 0x3f0   : > { %v1062_v37 = vpack.c.bf16 %v1061_v36, %v1061_v36 }
 0x3f2   : > { %1649 = vst [vmem:[%s1393_s23 + $0x14] sm:$0xf] %v1062_v37  ;;  %1085 = vmatmul.bf16.vlgmr.msra.gmra.mxu0 %v1062_v37  ;;  %1098 = vmatmul.bf16.vlgmr.msra.gmra.mxu1 %v1062_v37 }
 0x3f3   : > { %1111 = vmatmul.bf16.vlgmr.msra.gmra.mxu2 %v1062_v37  ;;  %1124 = vmatmul.bf16.vlgmr.msra.gmra.mxu3 %v1062_v37 }
 0x46f   : > { %v1086_v51 = vpop.f32.mrf.mxu0  ;;  %v1099_v52 = vpop.f32.mrf.mxu1 }
 0x470   : > { %v1129_v53 = vadd.f32 %v1086_v51, %v1073_v48  ;;  %v1130_v55 = vadd.f32 %v1099_v52, %v1074_v49 }
 0x472   : > { %v1133_v60 = vmul.f32 0.5, %v1129_v53  ;;  %v1137_v61 = vmul.f32 0.5, %v1130_v55 }
 0x474   : > { %1818 = vtanh.f32 %v1133_v60 }
 0x475   : > { %1820 = vtanh.f32 %v1137_v61 }
 0x476   : > { %v1112_v1 = vpop.f32.mrf.mxu2  ;;  %v1125_v2 = vpop.f32.mrf.mxu3 }
 0x477   : > { %v1131_v4 = vadd.f32 %v1112_v1, %v1075_v63  ;;  %v1132_v10 = vadd.f32 %v1125_v2, %v1076_v0  ;;  %v1088_v11 = vpop.f32.mrf.mxu0  ;;  %v1101_v13 = vpop.f32.mrf.mxu1 }
 0x479   : > { %1822 = vtanh.f32 %v1131_v4  ;;  %v1142_v15 = vmul.f32 0.5, %v1132_v10 }
 0x47a   : > { %v1819_v18 = vpop.eup %1818 }
 0x47b   : > { %v1821_v19 = vpop.eup %1820  ;;  %v1135_v47 = vmul.f32 0.5, %v1819_v18  ;;  %1824 = vtanh.f32 %v1142_v15 }
 0x47c   : > { %v1139_v20 = vmul.f32 0.5, %v1821_v19 }
 0x47d   : > { %v1136_v22 = vadd.f32 0.5, %v1135_v47 }
 0x47e   : > { %v1140_v27 = vadd.f32 0.5, %v1139_v20  ;;  %v1114_v28 = vpop.f32.mrf.mxu2  ;;  %v1127_v30 = vpop.f32.mrf.mxu3 }
 0x47f   : > { %v1823_v3 = vpop.eup %1822 }
 0x480   : > { %v1146_v7 = vmul.f32 %v1140_v27, %v1059_v43  ;;  %v1147_v8 = vmul.f32 %v1823_v3, %v1136_v22 }
 0x481   : > { %v1825_v12 = vpop.eup %1824 }
 0x482   : > { %v1148_v16 = vadd.f32 %v1147_v8, %v1146_v7  ;;  %v1144_v17 = vmul.f32 0.5, %v1825_v12 }
 0x484   : > { %1826 = vtanh.f32 %v1148_v16  ;;  %v1145_v21 = vadd.f32 0.5, %v1144_v17 }
 0x48a   : > { %v1827_v25 = vpop.eup %1826 }
 0x48b   : > { %v1150_v29 = vmul.f32 %v1827_v25, %v1145_v21 }
 0x48d   : > { %v1151_v33 = vpack.c.bf16 %v1150_v29, %v1150_v29 }
 0x48f   : > { %1654 = vst [vmem:[%s1401_s28 + $0x18] sm:$0xf] %v1151_v33  ;;  %1174 = vmatmul.bf16.vlgmr.msrb.gmra.mxu0 %v1151_v33  ;;  %1187 = vmatmul.bf16.vlgmr.msrb.gmra.mxu1 %v1151_v33 }
 0x490   : > { %1200 = vmatmul.bf16.vlgmr.msrb.gmra.mxu2 %v1151_v33  ;;  %1213 = vmatmul.bf16.vlgmr.msrb.gmra.mxu3 %v1151_v33 }
 0x50c   : > { %v1175_v45 = vpop.f32.mrf.mxu0  ;;  %v1188_v46 = vpop.f32.mrf.mxu1 }
 0x50d   : > { %v1218_v50 = vadd.f32 %v1175_v45, %v1162_v38  ;;  %v1219_v56 = vadd.f32 %v1188_v46, %v1163_v44 }
 0x50f   : > { %v1222_v58 = vmul.f32 0.5, %v1218_v50  ;;  %v1226_v62 = vmul.f32 0.5, %v1219_v56 }
 0x511   : > { %1828 = vtanh.f32 %v1222_v58 }
 0x512   : > { %1830 = vtanh.f32 %v1226_v62 }
 0x513   : > { %v1201_v9 = vpop.f32.mrf.mxu2  ;;  %v1214_v14 = vpop.f32.mrf.mxu3 }
 0x514   : > { %v1220_v23 = vadd.f32 %v1201_v9, %v1164_v5  ;;  %v1221_v24 = vadd.f32 %v1214_v14, %v1165_v6  ;;  %v1177_v26 = vpop.f32.mrf.mxu0  ;;  %v1190_v31 = vpop.f32.mrf.mxu1 }
 0x516   : > { %1832 = vtanh.f32 %v1220_v23  ;;  %v1231_v40 = vmul.f32 0.5, %v1221_v24 }
 0x517   : > { %v1829_v41 = vpop.eup %1828 }
 0x518   : > { %v1831_v42 = vpop.eup %1830  ;;  %v1224_v43 = vmul.f32 0.5, %v1829_v41  ;;  %1834 = vtanh.f32 %v1231_v40 }
 0x519   : > { %v1228_v54 = vmul.f32 0.5, %v1831_v42 }
 0x51a   : > { %v1225_v32 = vadd.f32 0.5, %v1224_v43 }
 0x51b   : > { %v1229_v35 = vadd.f32 0.5, %v1228_v54  ;;  %v1203_v36 = vpop.f32.mrf.mxu2  ;;  %v1216_v37 = vpop.f32.mrf.mxu3 }
 0x51c   : > { %v1833_v39 = vpop.eup %1832 }
 0x51d   : > { %v1235_v48 = vmul.f32 %v1229_v35, %v1148_v16  ;;  %v1236_v49 = vmul.f32 %v1833_v39, %v1225_v32 }
 0x51e   : > { %v1835_v51 = vpop.eup %1834 }
 0x51f   : > { %v1237_v52 = vadd.f32 %v1236_v49, %v1235_v48  ;;  %v1233_v53 = vmul.f32 0.5, %v1835_v51 }
 0x521   : > { %1836 = vtanh.f32 %v1237_v52  ;;  %1250 = vst [vmem:[%s333_s9] sm:$0xff] %v1237_v52  ;;  %v1234_v55 = vadd.f32 0.5, %v1233_v53 }
 0x527   : > { %v1837_v59 = vpop.eup %1836 }
 0x528   : > { %v1239_v60 = vmul.f32 %v1837_v59, %v1234_v55 }
 0x52a   : > { %v1240_v61 = vpack.c.bf16 %v1239_v60, %v1239_v60  ;;  %1249 = vst [vmem:[%s329_s13] sm:$0xff] %v1239_v60 }
 0x52c   : > { %1659 = vst [vmem:[%s1409_s14 + $0x1c] sm:$0xf] %v1240_v61 }
 0x52d PF: > { %s16_s20 = sadd.s32 1, %s1918_s20   ;;  %s2450_s15 = smov %s1902_s16 }
 0x52e   : > { %p13_p5 = scmp.ge.s32.totalorder %s16_s20, 4   ;;  %s2451_s16 = smov %s1906_s17 }
 0x52f   : > { %s2452_s17 = smov %s2000_s5  ;;  %s2453_s18 = smov %s1914_s19 }
 0x530   : > { %s2454_s19 = smov %s2456_s22  ;;  %15 = sbr.rel (!%p13_p5) target bundleno = 3 (0x3), region = 112 }
 0x535   :  { %1321 = vsyncpa [#allocation5], 1 }
 0x536   :  { %1323 = vsyncpa [#allocation5 + $0x1], 1 }

// kernel: lstm_forward.3
= control target key start
LH: loop header
LB: loop body
LE: loop exit
PB: predicated region body
PF: predicated region fallthrough
CT: control target
= control target key end

     0   :  { %s1851_s15 = smov 0   ;;  %s1853_s16 = smov 0   ;;  %s2348_s0 = inlined_call_operand.vmem [shape: bf16[2,8,8,512], index: 0, kind: input, shape index: {}]   ;;  %s2349_s1 = inlined_call_operand.vmem [shape: bf16[2,128,512], index: 1, kind: input, shape index: {}]   ;;  %s2350_s2 = inlined_call_operand.vmem [shape: bf16[2,8,8,128], index: 2, kind: output, shape index: {0}]   ;;  %s2351_s3 = inlined_call_operand.vmem [shape: f32[2,8,128], index: 3, kind: output, shape index: {1}]   ;;  %s2352_s4 = inlined_call_operand.vmem [shape: f32[2,8,128], index: 4, kind: output, shape index: {2}]  }
   0x1   :  { %s1855_s17 = smov 0  }
   0x2 LB: > { %s27_s18 = sadd.s32 1, %s1819_s16  ;;  %p1483_p0 = scmp.ge.s32.totalorder %s1823_s17, 1  ;;  %s1823_s17 = sphi %s1855_s17, %s15_s17   ;;  %s1819_s16 = sphi %s1853_s16, %s2354_s16   ;;  %s1815_s15 = sphi %s1851_s15, %s2353_s15  }
   0x3   : > { %p29_p1 = scmp.ge.s32.totalorder %s27_s18, 2  ;;  %p223_p2 = scmp.lt.s32.totalorder %s1823_s17, 3 }
   0x5   : > { %s2356_s18 = smov (%p29_p1, %s27_s18), 0  ;;  %p224_p3 = pnand %p1483_p0, %p223_p2 }
   0x6   : > { %p284_p4 = scmp.lt.s32.totalorder (!%p224_p3), %s1815_s15, 1  ;;  %s1693_s25 = smul.u32 (!%p224_p3), 112, %s1815_s15 }
   0x7   : > { %227 = sbr.rel (%p224_p3) target bundleno = 1308 (0x51c), region = 28  ;;  %s884_s27 = ssub.s32 (!%p224_p3), 4, %s1815_s15 }
   0x8   : > { %s1694_s5 = smul.u32 (!%p224_p3), 28, %s1815_s15 }
   0x9   : > { %s1623_s10 = smul.u32 (!%p224_p3), 80, %s1815_s15 }
   0xa   : > { %s1626_s12 = smul.u32 (!%p224_p3), 20, %s1815_s15 }
   0xb   : > { %s1628_s14 = smul.u32 (!%p224_p3), 48, %s1815_s15 }
   0xc   : > { %s1873_s19 = scalar_select %p284_p4, %s1815_s15, 1 }
   0xd   : > { %s1631_s21 = smul.u32 12, %s1815_s15 }
   0xe   : > { %s1659_s20 = sshll.u32 %s1873_s19, 8  ;;  %s1658_s24 = sshll.u32 %s1873_s19, 7 }
   0xf   : > { %s1879_s23 = scalar_lea.vmem %s2349_s1, %s1659_s20  ;;  %s2110_s28 = scalar_lea.vmem %s2348_s0, %s1658_s24 }
  0x10   : > { %v1608_v0 = vld [vmem:[%s1879_s23 + $0xe0] sm:$0xf]  ;;  %v1691_v1 = vld [vmem:[%s1879_s23 + $0xec] sm:$0xf0]  ;;  %v1689_v2 = vld [vmem:[%s1879_s23 + $0xe4] sm:$0xf]  ;;  %s372_s29 = scalar_lea.vmem %s2110_s28, %s1693_s25  ;;  %s1359_s11 = scalar_lea.vmem %s2110_s28, %s1623_s10 }
  0x11   : > { %v1884_v3 = vor.u32 %v1691_v1, %v1608_v0  ;;  %v1610_v4 = vld [vmem:[%s1879_s23 + $0xf0] sm:$0xf0]  ;;  %v1616_v5 = vld [vmem:[%s1879_s23 + $0xe8] sm:$0xf]  ;;  %v1692_v6 = vld [vmem:[%s1879_s23 + $0xf4] sm:$0xf0]  ;;  %s1367_s20 = scalar_lea.vmem %s2110_s28, %s1628_s14 }
  0x12   : > { %v1889_v7 = vor.u32 %v1689_v2, %v1610_v4  ;;  %v1891_v8 = vor.u32 %v1692_v6, %v1616_v5  ;;  %v1690_v9 = vld [vmem:[%s1879_s23 + $0xec] sm:$0xf]  ;;  %v1618_v10 = vld [vmem:[%s1879_s23 + $0xf8] sm:$0xf0]  ;;  %v1592_v11 = vld [vmem:[%s1879_s23 + $0xc0] sm:$0xf] }
  0x13   : > { %540 = vmatpush.bf16.msra.mxu0 %v1884_v3  ;;  %v1897_v12 = vor.u32 %v1690_v9, %v1618_v10  ;;  %v1687_v13 = vld [vmem:[%s1879_s23 + $0xcc] sm:$0xf0]  ;;  %v1685_v14 = vld [vmem:[%s1879_s23 + $0xc4] sm:$0xf]  ;;  %v1594_v15 = vld [vmem:[%s1879_s23 + $0xd0] sm:$0xf0] }
  0x14   : > { %553 = vmatpush.bf16.msra.mxu1 %v1889_v7  ;;  %566 = vmatpush.bf16.msra.mxu2 %v1891_v8  ;;  %v1904_v16 = vor.u32 %v1687_v13, %v1592_v11  ;;  %v1906_v17 = vor.u32 %v1685_v14, %v1594_v15  ;;  %v1600_v18 = vld [vmem:[%s1879_s23 + $0xc8] sm:$0xf]  ;;  %v1688_v19 = vld [vmem:[%s1879_s23 + $0xd4] sm:$0xf0]  ;;  %v1686_v20 = vld [vmem:[%s1879_s23 + $0xcc] sm:$0xf] }
  0x15   : > { %579 = vmatpush.bf16.msra.mxu3 %v1897_v12  ;;  %v1912_v21 = vor.u32 %v1688_v19, %v1600_v18  ;;  %v1602_v22 = vld [vmem:[%s1879_s23 + $0xd8] sm:$0xf0]  ;;  %v1576_v23 = vld [vmem:[%s1879_s23 + $0xa0] sm:$0xf]  ;;  %v1683_v24 = vld [vmem:[%s1879_s23 + $0xac] sm:$0xf0] }
  0x16   : > { %v1917_v25 = vor.u32 %v1686_v20, %v1602_v22  ;;  %v1681_v26 = vld [vmem:[%s1879_s23 + $0xa4] sm:$0xf]  ;;  %v1578_v27 = vld [vmem:[%s1879_s23 + $0xb0] sm:$0xf0]  ;;  %v1584_v28 = vld [vmem:[%s1879_s23 + $0xa8] sm:$0xf]  ;;  %v1923_v29 = vor.u32 %v1683_v24, %v1576_v23 }
  0x17   : > { %541 = vmatpush.bf16.msra.mxu0 %v1904_v16  ;;  %v1684_v30 = vld [vmem:[%s1879_s23 + $0xb4] sm:$0xf0]  ;;  %v1682_v31 = vld [vmem:[%s1879_s23 + $0xac] sm:$0xf]  ;;  %v1586_v32 = vld [vmem:[%s1879_s23 + $0xb8] sm:$0xf0]  ;;  %v1930_v33 = vor.u32 %v1681_v26, %v1578_v27 }
  0x18   : > { %554 = vmatpush.bf16.msra.mxu1 %v1906_v17  ;;  %567 = vmatpush.bf16.msra.mxu2 %v1912_v21  ;;  %v1932_v34 = vor.u32 %v1684_v30, %v1584_v28  ;;  %v1560_v35 = vld [vmem:[%s1879_s23 + $0x80] sm:$0xf]  ;;  %v1679_v36 = vld [vmem:[%s1879_s23 + $0x8c] sm:$0xf0]  ;;  %v1677_v37 = vld [vmem:[%s1879_s23 + $0x84] sm:$0xf]  ;;  %v1938_v38 = vor.u32 %v1682_v31, %v1586_v32 }
  0x19   : > { %580 = vmatpush.bf16.msra.mxu3 %v1917_v25  ;;  %v1562_v39 = vld [vmem:[%s1879_s23 + $0x90] sm:$0xf0]  ;;  %v1568_v40 = vld [vmem:[%s1879_s23 + $0x88] sm:$0xf]  ;;  %v1680_v41 = vld [vmem:[%s1879_s23 + $0x94] sm:$0xf0]  ;;  %v1946_v44 = vor.u32 %v1679_v36, %v1560_v35 }
  0x1a   : > { %v1678_v42 = vld [vmem:[%s1879_s23 + $0x8c] sm:$0xf]  ;;  %v1570_v43 = vld [vmem:[%s1879_s23 + $0x98] sm:$0xf0]  ;;  %v1950_v45 = vor.u32 %v1677_v37, %v1562_v39  ;;  %v1952_v46 = vor.u32 %v1680_v41, %v1568_v40  ;;  %v1544_v47 = vld [vmem:[%s1879_s23 + $0x60] sm:$0xf] }
  0x1b   : > { %542 = vmatpush.bf16.msra.mxu0 %v1923_v29  ;;  %v1675_v48 = vld [vmem:[%s1879_s23 + $0x6c] sm:$0xf0]  ;;  %v1673_v49 = vld [vmem:[%s1879_s23 + $0x64] sm:$0xf]  ;;  %v1958_v50 = vor.u32 %v1678_v42, %v1570_v43  ;;  %v1546_v51 = vld [vmem:[%s1879_s23 + $0x70] sm:$0xf0] }
  0x1c   : > { %555 = vmatpush.bf16.msra.mxu1 %v1930_v33  ;;  %568 = vmatpush.bf16.msra.mxu2 %v1932_v34  ;;  %v1552_v52 = vld [vmem:[%s1879_s23 + $0x68] sm:$0xf]  ;;  %v1676_v53 = vld [vmem:[%s1879_s23 + $0x74] sm:$0xf0]  ;;  %v1674_v54 = vld [vmem:[%s1879_s23 + $0x6c] sm:$0xf]  ;;  %v1966_v56 = vor.u32 %v1675_v48, %v1544_v47  ;;  %v1970_v57 = vor.u32 %v1673_v49, %v1546_v51 }
  0x1d   : > { %581 = vmatpush.bf16.msra.mxu3 %v1938_v38  ;;  %v1554_v55 = vld [vmem:[%s1879_s23 + $0x78] sm:$0xf0]  ;;  %v1972_v58 = vor.u32 %v1676_v53, %v1552_v52  ;;  %v1528_v59 = vld [vmem:[%s1879_s23 + $0x40] sm:$0xf]  ;;  %v1671_v60 = vld [vmem:[%s1879_s23 + $0x4c] sm:$0xf0] }
  0x1e   : > { %v1669_v61 = vld [vmem:[%s1879_s23 + $0x44] sm:$0xf]  ;;  %v1978_v62 = vor.u32 %v1674_v54, %v1554_v55  ;;  %v1530_v63 = vld [vmem:[%s1879_s23 + $0x50] sm:$0xf0]  ;;  %v1536_v0 = vld [vmem:[%s1879_s23 + $0x48] sm:$0xf]  ;;  %v1986_v5 = vor.u32 %v1671_v60, %v1528_v59 }
  0x1f   : > { %543 = vmatpush.bf16.msra.mxu0 %v1946_v44  ;;  %v1672_v1 = vld [vmem:[%s1879_s23 + $0x54] sm:$0xf0]  ;;  %v1670_v2 = vld [vmem:[%s1879_s23 + $0x4c] sm:$0xf]  ;;  %v1538_v4 = vld [vmem:[%s1879_s23 + $0x58] sm:$0xf0]  ;;  %v1990_v6 = vor.u32 %v1669_v61, %v1530_v63 }
  0x20   : > { %556 = vmatpush.bf16.msra.mxu1 %v1950_v45  ;;  %569 = vmatpush.bf16.msra.mxu2 %v1952_v46  ;;  %v1992_v9 = vor.u32 %v1672_v1, %v1536_v0  ;;  %v1512_v10 = vld [vmem:[%s1879_s23 + $0x20] sm:$0xf]  ;;  %v1667_v11 = vld [vmem:[%s1879_s23 + $0x2c] sm:$0xf0]  ;;  %v1665_v13 = vld [vmem:[%s1879_s23 + $0x24] sm:$0xf]  ;;  %v1998_v14 = vor.u32 %v1670_v2, %v1538_v4 }
  0x21   : > { %582 = vmatpush.bf16.msra.mxu3 %v1958_v50  ;;  %v1514_v15 = vld [vmem:[%s1879_s23 + $0x30] sm:$0xf0]  ;;  %v1520_v18 = vld [vmem:[%s1879_s23 + $0x28] sm:$0xf]  ;;  %v1668_v19 = vld [vmem:[%s1879_s23 + $0x34] sm:$0xf0]  ;;  %v2006_v23 = vor.u32 %v1667_v11, %v1512_v10 }
  0x22   : > { %v1666_v20 = vld [vmem:[%s1879_s23 + $0x2c] sm:$0xf]  ;;  %v1522_v22 = vld [vmem:[%s1879_s23 + $0x38] sm:$0xf0]  ;;  %v2010_v24 = vor.u32 %v1665_v13, %v1514_v15  ;;  %v2012_v26 = vor.u32 %v1668_v19, %v1520_v18  ;;  %v1496_v27 = vld [vmem:[%s1879_s23] sm:$0xf] }
  0x23   : > { %544 = vmatpush.bf16.msra.mxu0 %v1966_v56  ;;  %v1663_v28 = vld [vmem:[%s1879_s23 + $0xc] sm:$0xf0]  ;;  %v1661_v30 = vld [vmem:[%s1879_s23 + $0x4] sm:$0xf]  ;;  %v2018_v31 = vor.u32 %v1666_v20, %v1522_v22  ;;  %v1498_v32 = vld [vmem:[%s1879_s23 + $0x10] sm:$0xf0] }
  0x24   : > { %557 = vmatpush.bf16.msra.mxu1 %v1970_v57  ;;  %570 = vmatpush.bf16.msra.mxu2 %v1972_v58  ;;  %v1504_v35 = vld [vmem:[%s1879_s23 + $0x8] sm:$0xf]  ;;  %v1664_v36 = vld [vmem:[%s1879_s23 + $0x14] sm:$0xf0]  ;;  %v1662_v37 = vld [vmem:[%s1879_s23 + $0xc] sm:$0xf]  ;;  %v2026_v40 = vor.u32 %v1663_v28, %v1496_v27  ;;  %v2030_v41 = vor.u32 %v1661_v30, %v1498_v32 }
  0x25   : > { %583 = vmatpush.bf16.msra.mxu3 %v1978_v62  ;;  %v1506_v39 = vld [vmem:[%s1879_s23 + $0x18] sm:$0xf0]  ;;  %v2032_v42 = vor.u32 %v1664_v36, %v1504_v35  ;;  %v1825_v47 = vmov 0.0|0.0   ;;  %v373_v48 = vld [vmem:[%s372_s29] sm:$0xff]  ;;  %v374_v55 = vld [vmem:[%s372_s29 + $0x8] sm:$0xff]  ;;  %s1660_s30 = sshll.u32 %s1873_s19, 5 }
  0x26   : > { %v2035_v43 = vor.u32 %v1662_v37, %v1506_v39  ;;  %v375_v49 = vunpack.c.l.bf16 %v373_v48  ;;  %v376_v51 = vunpack.c.h.bf16 %v373_v48  ;;  %v377_v63 = vunpack.c.l.bf16 %v374_v55  ;;  %s2121_s8 = scalar_lea.vmem %s2350_s2, %s1660_s30  ;;  %s1633_s23 = sshll.u32 %s1815_s15, 4 }
  0x27   : > { %545 = vmatpush.bf16.msra.mxu0 %v1986_v5  ;;  %v378_v0 = vunpack.c.h.bf16 %v374_v55  ;;  %s616_s9 = scalar_lea.vmem %s2121_s8, %s1694_s5  ;;  %s1363_s13 = scalar_lea.vmem %s2121_s8, %s1626_s12 }
  0x28   : > { %558 = vmatpush.bf16.msra.mxu1 %v1990_v6  ;;  %571 = vmatpush.bf16.msra.mxu2 %v1992_v9  ;;  %s1371_s22 = scalar_lea.vmem %s2121_s8, %s1631_s21  ;;  %s1374_s24 = scalar_lea.vmem %s2110_s28, %s1633_s23 }
  0x29   : > { %584 = vmatpush.bf16.msra.mxu3 %v1998_v14  ;;  %s1636_s25 = sshll.u32 %s1815_s15, 2  ;;  %s1695_s29 = sshll.u32 %s884_s27, 4 }
  0x2a   : > { %s1377_s26 = scalar_lea.vmem %s2121_s8, %s1636_s25  ;;  %s887_s30 = scalar_lea.vmem %s2110_s28, %s1695_s29 }
  0x2b   : > { %546 = vmatpush.bf16.msra.mxu0 %v2006_v23  ;;  %s1640_s5 = sshll.u32 %s884_s27, 2  ;;  %s1641_s7 = smul.u32 4294967248, %s1815_s15 }
  0x2c   : > { %559 = vmatpush.bf16.msra.mxu1 %v2010_v24  ;;  %572 = vmatpush.bf16.msra.mxu2 %v2012_v26  ;;  %s970_s6 = scalar_lea.vmem %s2121_s8, %s1640_s5  ;;  %s1644_s10 = smul.u32 4294967284, %s1815_s15 }
  0x2d   : > { %585 = vmatpush.bf16.msra.mxu3 %v2018_v31  ;;  %s1646_s12 = smul.u32 4294967216, %s1815_s15 }
  0x2e   : > { %s1649_s14 = smul.u32 4294967276, %s1815_s15 }
  0x2f   : > { %547 = vmatpush.bf16.msra.mxu0 %v2026_v40  ;;  %s1651_s21 = smul.u32 4294967184, %s1815_s15 }
  0x30   : > { %560 = vmatpush.bf16.msra.mxu1 %v2030_v41  ;;  %573 = vmatpush.bf16.msra.mxu2 %v2032_v42 }
  0x31   : > { %586 = vmatpush.bf16.msra.mxu3 %v2035_v43 }
  0x32   : > { %548 = vmatmul.bf16.vlgmr.msra.gmra.mxu0 %v1825_v47 }
  0x33   : > { %629 = vmatpush.bf16.msrb.mxu0 %v1884_v3  ;;  %561 = vmatmul.bf16.vlgmr.msra.gmra.mxu1 %v1825_v47 }
  0x34   : > { %642 = vmatpush.bf16.msrb.mxu1 %v1889_v7  ;;  %574 = vmatmul.bf16.vlgmr.msra.gmra.mxu2 %v1825_v47 }
  0x35   : > { %587 = vmatmul.bf16.vlgmr.msra.gmra.mxu3 %v1825_v47  ;;  %655 = vmatpush.bf16.msrb.mxu2 %v1891_v8 }
  0x36   : > { %668 = vmatpush.bf16.msrb.mxu3 %v1897_v12 }
  0x37   : > { %630 = vmatpush.bf16.msrb.mxu0 %v1904_v16 }
  0x38   : > { %643 = vmatpush.bf16.msrb.mxu1 %v1906_v17 }
  0x39   : > { %656 = vmatpush.bf16.msrb.mxu2 %v1912_v21 }
  0x3a   : > { %669 = vmatpush.bf16.msrb.mxu3 %v1917_v25 }
  0x3b   : > { %631 = vmatpush.bf16.msrb.mxu0 %v1923_v29 }
  0x3c   : > { %644 = vmatpush.bf16.msrb.mxu1 %v1930_v33 }
  0x3d   : > { %657 = vmatpush.bf16.msrb.mxu2 %v1932_v34 }
  0x3e   : > { %670 = vmatpush.bf16.msrb.mxu3 %v1938_v38 }
  0x3f   : > { %632 = vmatpush.bf16.msrb.mxu0 %v1946_v44 }
  0x40   : > { %645 = vmatpush.bf16.msrb.mxu1 %v1950_v45 }
  0x41   : > { %658 = vmatpush.bf16.msrb.mxu2 %v1952_v46 }
  0x42   : > { %671 = vmatpush.bf16.msrb.mxu3 %v1958_v50 }
  0x43   : > { %633 = vmatpush.bf16.msrb.mxu0 %v1966_v56 }
  0x44   : > { %646 = vmatpush.bf16.msrb.mxu1 %v1970_v57 }
  0x45   : > { %659 = vmatpush.bf16.msrb.mxu2 %v1972_v58 }
  0x46   : > { %672 = vmatpush.bf16.msrb.mxu3 %v1978_v62 }
  0x47   : > { %634 = vmatpush.bf16.msrb.mxu0 %v1986_v5 }
  0x48   : > { %647 = vmatpush.bf16.msrb.mxu1 %v1990_v6 }
  0x49   : > { %660 = vmatpush.bf16.msrb.mxu2 %v1992_v9 }
  0x4a   : > { %673 = vmatpush.bf16.msrb.mxu3 %v1998_v14 }
  0x4b   : > { %635 = vmatpush.bf16.msrb.mxu0 %v2006_v23 }
  0x4c   : > { %648 = vmatpush.bf16.msrb.mxu1 %v2010_v24 }
  0x4d   : > { %661 = vmatpush.bf16.msrb.mxu2 %v2012_v26 }
  0x4e   : > { %674 = vmatpush.bf16.msrb.mxu3 %v2018_v31 }
  0x4f   : > { %636 = vmatpush.bf16.msrb.mxu0 %v2026_v40 }
  0x50   : > { %649 = vmatpush.bf16.msrb.mxu1 %v2030_v41 }
  0x51   : > { %662 = vmatpush.bf16.msrb.mxu2 %v2032_v42 }
  0x52   : > { %675 = vmatpush.bf16.msrb.mxu3 %v2035_v43 }
  0x53   : > { %718 = vmatpush.bf16.msra.mxu0 %v1884_v3 }
  0x54   : > { %731 = vmatpush.bf16.msra.mxu1 %v1889_v7 }
  0x55   : > { %744 = vmatpush.bf16.msra.mxu2 %v1891_v8 }
  0x56   : > { %757 = vmatpush.bf16.msra.mxu3 %v1897_v12 }
  0x57   : > { %719 = vmatpush.bf16.msra.mxu0 %v1904_v16 }
  0x58   : > { %732 = vmatpush.bf16.msra.mxu1 %v1906_v17 }
  0x59   : > { %745 = vmatpush.bf16.msra.mxu2 %v1912_v21 }
  0x5a   : > { %758 = vmatpush.bf16.msra.mxu3 %v1917_v25 }
  0x5b   : > { %720 = vmatpush.bf16.msra.mxu0 %v1923_v29 }
  0x5c   : > { %733 = vmatpush.bf16.msra.mxu1 %v1930_v33 }
  0x5d   : > { %746 = vmatpush.bf16.msra.mxu2 %v1932_v34 }
  0x5e   : > { %759 = vmatpush.bf16.msra.mxu3 %v1938_v38 }
  0x5f   : > { %721 = vmatpush.bf16.msra.mxu0 %v1946_v44 }
  0x60   : > { %734 = vmatpush.bf16.msra.mxu1 %v1950_v45 }
  0x61   : > { %747 = vmatpush.bf16.msra.mxu2 %v1952_v46 }
  0x62   : > { %760 = vmatpush.bf16.msra.mxu3 %v1958_v50 }
  0x63   : > { %722 = vmatpush.bf16.msra.mxu0 %v1966_v56 }
  0x64   : > { %735 = vmatpush.bf16.msra.mxu1 %v1970_v57 }
  0x65   : > { %748 = vmatpush.bf16.msra.mxu2 %v1972_v58 }
  0x66   : > { %761 = vmatpush.bf16.msra.mxu3 %v1978_v62 }
  0x67   : > { %723 = vmatpush.bf16.msra.mxu0 %v1986_v5 }
  0x68   : > { %736 = vmatpush.bf16.msra.mxu1 %v1990_v6 }
  0x69   : > { %749 = vmatpush.bf16.msra.mxu2 %v1992_v9 }
  0x6a   : > { %762 = vmatpush.bf16.msra.mxu3 %v1998_v14 }
  0x6b   : > { %724 = vmatpush.bf16.msra.mxu0 %v2006_v23 }
  0x6c   : > { %737 = vmatpush.bf16.msra.mxu1 %v2010_v24 }
  0x6d   : > { %750 = vmatpush.bf16.msra.mxu2 %v2012_v26 }
  0x6e   : > { %763 = vmatpush.bf16.msra.mxu3 %v2018_v31 }
  0x6f   : > { %725 = vmatpush.bf16.msra.mxu0 %v2026_v40 }
  0x70   : > { %738 = vmatpush.bf16.msra.mxu1 %v2030_v41 }
  0x71   : > { %751 = vmatpush.bf16.msra.mxu2 %v2032_v42 }
  0x72   : > { %764 = vmatpush.bf16.msra.mxu3 %v2035_v43 }
  0xaf   : > { %v549_v52 = vpop.f32.mrf.mxu0 }
  0xb0   : > { %v592_v53 = vadd.f32 %v549_v52, %v375_v49  ;;  %v562_v54 = vpop.f32.mrf.mxu1 }
  0xb1   : > { %v593_v59 = vadd.f32 %v562_v54, %v376_v51  ;;  %v1624_v54 = vld [vmem:[%s1359_s11 + $0x10] sm:$0xff] }
  0xb2   : > { %v596_v60 = vmul.f32 0.5, %v592_v53  ;;  %v625_v55 = vunpack.c.l.bf16 %v1624_v54 }
  0xb3   : > { %v600_v61 = vmul.f32 0.5, %v593_v59  ;;  %v626_v59 = vunpack.c.h.bf16 %v1624_v54 }
  0xb4   : > { %1721 = vtanh.f32 %v596_v60 }
  0xb5   : > { %1723 = vtanh.f32 %v600_v61 }
  0xb7   : > { %v575_v1 = vpop.f32.mrf.mxu2  ;;  %v551_v10 = vpop.f32.mrf.mxu0 }
  0xb8   : > { %v594_v2 = vadd.f32 %v575_v1, %v377_v63  ;;  %v588_v4 = vpop.f32.mrf.mxu3  ;;  %v564_v13 = vpop.f32.mrf.mxu1  ;;  %v1625_v1 = vld [vmem:[%s1359_s11 + $0x18] sm:$0xff]  ;;  %s1389_s11 = scalar_lea.vmem %s2121_s8, %s1644_s10 }
  0xb9   : > { %v595_v11 = vadd.f32 %v588_v4, %v378_v0  ;;  %v627_v10 = vunpack.c.l.bf16 %v1625_v1 }
  0xba   : > { %1725 = vtanh.f32 %v594_v2  ;;  %v1722_v15 = vpop.eup %1721 }
  0xbb   : > { %v605_v18 = vmul.f32 0.5, %v595_v11  ;;  %v1724_v19 = vpop.eup %1723  ;;  %v598_v20 = vmul.f32 0.5, %v1722_v15  ;;  %v628_v11 = vunpack.c.h.bf16 %v1625_v1 }
  0xbc   : > { %v602_v22 = vmul.f32 0.5, %v1724_v19 }
  0xbd   : > { %1727 = vtanh.f32 %v605_v18  ;;  %v599_v27 = vadd.f32 0.5, %v598_v20 }
  0xbe   : > { %v603_v28 = vadd.f32 0.5, %v602_v22 }
  0xbf   : > { %v577_v30 = vpop.f32.mrf.mxu2 }
  0xc0   : > { %v1726_v32 = vpop.eup %1725  ;;  %v590_v35 = vpop.f32.mrf.mxu3  ;;  %v609_v36 = vmul.f32 0.0, %v603_v28 }
  0xc1   : > { %v610_v37 = vmul.f32 %v1726_v32, %v599_v27 }
  0xc3   : > { %v1728_v39 = vpop.eup %1727  ;;  %v2113_v47 = vadd.f32 %v610_v37, %v609_v36 }
  0xc4   : > { %v607_v48 = vmul.f32 0.5, %v1728_v39 }
  0xc5   : > { %1729 = vtanh.f32 %v2113_v47 }
  0xc6   : > { %v608_v49 = vadd.f32 0.5, %v607_v48 }
  0xcb   : > { %v1730_v51 = vpop.eup %1729 }
  0xcc   : > { %v613_v52 = vmul.f32 %v1730_v51, %v608_v49 }
  0xce   : > { %v614_v53 = vpack.c.bf16 %v613_v52, %v613_v52 }
  0xd0   : > { %617 = vst [vmem:[%s616_s9] sm:$0xf] %v614_v53  ;;  %637 = vmatmul.bf16.vlgmr.msrb.gmra.mxu0 %v614_v53  ;;  %650 = vmatmul.bf16.vlgmr.msrb.gmra.mxu1 %v614_v53  ;;  %s1385_s9 = scalar_lea.vmem %s2110_s28, %s1641_s7 }
  0xd1   : > { %663 = vmatmul.bf16.vlgmr.msrb.gmra.mxu2 %v614_v53  ;;  %676 = vmatmul.bf16.vlgmr.msrb.gmra.mxu3 %v614_v53 }
  0xd2   : > { %806 = vmatpush.bf16.msrb.mxu0 %v1884_v3  ;;  %819 = vmatpush.bf16.msrb.mxu1 %v1889_v7 }
  0xd3   : > { %832 = vmatpush.bf16.msrb.mxu2 %v1891_v8  ;;  %845 = vmatpush.bf16.msrb.mxu3 %v1897_v12 }
  0xd6   : > { %807 = vmatpush.bf16.msrb.mxu0 %v1904_v16  ;;  %820 = vmatpush.bf16.msrb.mxu1 %v1906_v17 }
  0xd7   : > { %833 = vmatpush.bf16.msrb.mxu2 %v1912_v21  ;;  %846 = vmatpush.bf16.msrb.mxu3 %v1917_v25 }
  0xda   : > { %808 = vmatpush.bf16.msrb.mxu0 %v1923_v29  ;;  %821 = vmatpush.bf16.msrb.mxu1 %v1930_v33 }
  0xdb   : > { %834 = vmatpush.bf16.msrb.mxu2 %v1932_v34  ;;  %847 = vmatpush.bf16.msrb.mxu3 %v1938_v38 }
  0xde   : > { %809 = vmatpush.bf16.msrb.mxu0 %v1946_v44  ;;  %822 = vmatpush.bf16.msrb.mxu1 %v1950_v45 }
  0xdf   : > { %835 = vmatpush.bf16.msrb.mxu2 %v1952_v46  ;;  %848 = vmatpush.bf16.msrb.mxu3 %v1958_v50 }
  0xe2   : > { %810 = vmatpush.bf16.msrb.mxu0 %v1966_v56  ;;  %823 = vmatpush.bf16.msrb.mxu1 %v1970_v57 }
  0xe3   : > { %836 = vmatpush.bf16.msrb.mxu2 %v1972_v58  ;;  %849 = vmatpush.bf16.msrb.mxu3 %v1978_v62 }
  0xe6   : > { %811 = vmatpush.bf16.msrb.mxu0 %v1986_v5  ;;  %824 = vmatpush.bf16.msrb.mxu1 %v1990_v6 }
  0xe7   : > { %837 = vmatpush.bf16.msrb.mxu2 %v1992_v9  ;;  %850 = vmatpush.bf16.msrb.mxu3 %v1998_v14 }
  0xea   : > { %812 = vmatpush.bf16.msrb.mxu0 %v2006_v23  ;;  %825 = vmatpush.bf16.msrb.mxu1 %v2010_v24 }
  0xeb   : > { %838 = vmatpush.bf16.msrb.mxu2 %v2012_v26  ;;  %851 = vmatpush.bf16.msrb.mxu3 %v2018_v31 }
  0xee   : > { %813 = vmatpush.bf16.msrb.mxu0 %v2026_v40  ;;  %826 = vmatpush.bf16.msrb.mxu1 %v2030_v41 }
  0xef   : > { %839 = vmatpush.bf16.msrb.mxu2 %v2032_v42  ;;  %852 = vmatpush.bf16.msrb.mxu3 %v2035_v43 }
 0x14d   : > { %v638_v60 = vpop.f32.mrf.mxu0  ;;  %v651_v61 = vpop.f32.mrf.mxu1 }
 0x14e   : > { %v681_v63 = vadd.f32 %v638_v60, %v625_v55  ;;  %v682_v0 = vadd.f32 %v651_v61, %v626_v59 }
 0x150   : > { %v685_v2 = vmul.f32 0.5, %v681_v63  ;;  %v689_v4 = vmul.f32 0.5, %v682_v0 }
 0x152   : > { %1731 = vtanh.f32 %v685_v2 }
 0x153   : > { %1733 = vtanh.f32 %v689_v4 }
 0x154   : > { %v664_v13 = vpop.f32.mrf.mxu2  ;;  %v677_v15 = vpop.f32.mrf.mxu3 }
 0x155   : > { %v683_v18 = vadd.f32 %v664_v13, %v627_v10  ;;  %v684_v19 = vadd.f32 %v677_v15, %v628_v11  ;;  %v640_v20 = vpop.f32.mrf.mxu0  ;;  %v653_v22 = vpop.f32.mrf.mxu1  ;;  %v1630_v13 = vld [vmem:[%s1367_s20 + $0x28] sm:$0xff] }
 0x156   : > { %v717_v20 = vunpack.c.h.bf16 %v1630_v13 }
 0x157   : > { %1735 = vtanh.f32 %v683_v18  ;;  %v694_v27 = vmul.f32 0.5, %v684_v19  ;;  %v716_v19 = vunpack.c.l.bf16 %v1630_v13 }
 0x158   : > { %v1732_v28 = vpop.eup %1731 }
 0x159   : > { %v1734_v30 = vpop.eup %1733  ;;  %v687_v32 = vmul.f32 0.5, %v1732_v28  ;;  %1737 = vtanh.f32 %v694_v27 }
 0x15a   : > { %v691_v35 = vmul.f32 0.5, %v1734_v30 }
 0x15b   : > { %v688_v36 = vadd.f32 0.5, %v687_v32 }
 0x15c   : > { %v692_v37 = vadd.f32 0.5, %v691_v35  ;;  %v666_v39 = vpop.f32.mrf.mxu2  ;;  %v679_v48 = vpop.f32.mrf.mxu3 }
 0x15d   : > { %v1736_v49 = vpop.eup %1735 }
 0x15e   : > { %v698_v51 = vmul.f32 %v692_v37, %v2113_v47  ;;  %v699_v52 = vmul.f32 %v1736_v49, %v688_v36  ;;  %v1629_v47 = vld [vmem:[%s1367_s20 + $0x20] sm:$0xff]  ;;  %s1397_s20 = scalar_lea.vmem %s2121_s8, %s1649_s14 }
 0x15f   : > { %v1738_v53 = vpop.eup %1737  ;;  %v714_v0 = vunpack.c.l.bf16 %v1629_v47  ;;  %v715_v1 = vunpack.c.h.bf16 %v1629_v47 }
 0x160   : > { %v2159_v54 = vadd.f32 %v699_v52, %v698_v51  ;;  %v696_v55 = vmul.f32 0.5, %v1738_v53 }
 0x162   : > { %1739 = vtanh.f32 %v2159_v54  ;;  %v697_v59 = vadd.f32 0.5, %v696_v55 }
 0x168   : > { %v1740_v60 = vpop.eup %1739 }
 0x169   : > { %v702_v61 = vmul.f32 %v1740_v60, %v697_v59 }
 0x16b   : > { %v703_v63 = vpack.c.bf16 %v702_v61, %v702_v61 }
 0x16d   : > { %1627 = vst [vmem:[%s1363_s13 + $0x4] sm:$0xf] %v703_v63  ;;  %726 = vmatmul.bf16.vlgmr.msra.gmra.mxu0 %v703_v63  ;;  %739 = vmatmul.bf16.vlgmr.msra.gmra.mxu1 %v703_v63  ;;  %s1393_s13 = scalar_lea.vmem %s2110_s28, %s1646_s12 }
 0x16e   : > { %752 = vmatmul.bf16.vlgmr.msra.gmra.mxu2 %v703_v63  ;;  %765 = vmatmul.bf16.vlgmr.msra.gmra.mxu3 %v703_v63 }
 0x16f   : > { %894 = vmatpush.bf16.msra.mxu0 %v1884_v3  ;;  %907 = vmatpush.bf16.msra.mxu1 %v1889_v7 }
 0x170   : > { %920 = vmatpush.bf16.msra.mxu2 %v1891_v8  ;;  %933 = vmatpush.bf16.msra.mxu3 %v1897_v12 }
 0x173   : > { %895 = vmatpush.bf16.msra.mxu0 %v1904_v16  ;;  %908 = vmatpush.bf16.msra.mxu1 %v1906_v17 }
 0x174   : > { %921 = vmatpush.bf16.msra.mxu2 %v1912_v21  ;;  %934 = vmatpush.bf16.msra.mxu3 %v1917_v25 }
 0x177   : > { %896 = vmatpush.bf16.msra.mxu0 %v1923_v29  ;;  %909 = vmatpush.bf16.msra.mxu1 %v1930_v33 }
 0x178   : > { %922 = vmatpush.bf16.msra.mxu2 %v1932_v34  ;;  %935 = vmatpush.bf16.msra.mxu3 %v1938_v38 }
 0x17b   : > { %897 = vmatpush.bf16.msra.mxu0 %v1946_v44  ;;  %910 = vmatpush.bf16.msra.mxu1 %v1950_v45 }
 0x17c   : > { %923 = vmatpush.bf16.msra.mxu2 %v1952_v46  ;;  %936 = vmatpush.bf16.msra.mxu3 %v1958_v50 }
 0x17f   : > { %898 = vmatpush.bf16.msra.mxu0 %v1966_v56  ;;  %911 = vmatpush.bf16.msra.mxu1 %v1970_v57 }
 0x180   : > { %924 = vmatpush.bf16.msra.mxu2 %v1972_v58  ;;  %937 = vmatpush.bf16.msra.mxu3 %v1978_v62 }
 0x183   : > { %899 = vmatpush.bf16.msra.mxu0 %v1986_v5  ;;  %912 = vmatpush.bf16.msra.mxu1 %v1990_v6 }
 0x184   : > { %925 = vmatpush.bf16.msra.mxu2 %v1992_v9  ;;  %938 = vmatpush.bf16.msra.mxu3 %v1998_v14 }
 0x187   : > { %900 = vmatpush.bf16.msra.mxu0 %v2006_v23  ;;  %913 = vmatpush.bf16.msra.mxu1 %v2010_v24 }
 0x188   : > { %926 = vmatpush.bf16.msra.mxu2 %v2012_v26  ;;  %939 = vmatpush.bf16.msra.mxu3 %v2018_v31 }
 0x18b   : > { %901 = vmatpush.bf16.msra.mxu0 %v2026_v40  ;;  %914 = vmatpush.bf16.msra.mxu1 %v2030_v41 }
 0x18c   : > { %927 = vmatpush.bf16.msra.mxu2 %v2032_v42  ;;  %940 = vmatpush.bf16.msra.mxu3 %v2035_v43 }
 0x1ea   : > { %v727_v2 = vpop.f32.mrf.mxu0  ;;  %v740_v4 = vpop.f32.mrf.mxu1 }
 0x1eb   : > { %v770_v10 = vadd.f32 %v727_v2, %v714_v0  ;;  %v771_v11 = vadd.f32 %v740_v4, %v715_v1 }
 0x1ed   : > { %v774_v15 = vmul.f32 0.5, %v770_v10  ;;  %v778_v18 = vmul.f32 0.5, %v771_v11 }
 0x1ef   : > { %1741 = vtanh.f32 %v774_v15 }
 0x1f0   : > { %1743 = vtanh.f32 %v778_v18 }
 0x1f1   : > { %v753_v22 = vpop.f32.mrf.mxu2  ;;  %v766_v27 = vpop.f32.mrf.mxu3 }
 0x1f2   : > { %v772_v28 = vadd.f32 %v753_v22, %v716_v19  ;;  %v773_v30 = vadd.f32 %v766_v27, %v717_v20  ;;  %v729_v32 = vpop.f32.mrf.mxu0  ;;  %v742_v35 = vpop.f32.mrf.mxu1  ;;  %v1635_v22 = vld [vmem:[%s1374_s24 + $0x38] sm:$0xff] }
 0x1f3   : > { %v805_v32 = vunpack.c.h.bf16 %v1635_v22 }
 0x1f4   : > { %1745 = vtanh.f32 %v772_v28  ;;  %v783_v36 = vmul.f32 0.5, %v773_v30  ;;  %v804_v30 = vunpack.c.l.bf16 %v1635_v22 }
 0x1f5   : > { %v1742_v37 = vpop.eup %1741 }
 0x1f6   : > { %v1744_v39 = vpop.eup %1743  ;;  %v776_v48 = vmul.f32 0.5, %v1742_v37  ;;  %1747 = vtanh.f32 %v783_v36 }
 0x1f7   : > { %v780_v49 = vmul.f32 0.5, %v1744_v39 }
 0x1f8   : > { %v777_v51 = vadd.f32 0.5, %v776_v48 }
 0x1f9   : > { %v781_v52 = vadd.f32 0.5, %v780_v49  ;;  %v755_v53 = vpop.f32.mrf.mxu2  ;;  %v768_v55 = vpop.f32.mrf.mxu3 }
 0x1fa   : > { %v1746_v59 = vpop.eup %1745 }
 0x1fb   : > { %v787_v60 = vmul.f32 %v781_v52, %v2159_v54  ;;  %v788_v61 = vmul.f32 %v1746_v59, %v777_v51  ;;  %v1634_v54 = vld [vmem:[%s1374_s24 + $0x30] sm:$0xff] }
 0x1fc   : > { %v1748_v63 = vpop.eup %1747  ;;  %v802_v11 = vunpack.c.l.bf16 %v1634_v54  ;;  %v803_v13 = vunpack.c.h.bf16 %v1634_v54 }
 0x1fd   : > { %v2199_v47 = vadd.f32 %v788_v61, %v787_v60  ;;  %v785_v0 = vmul.f32 0.5, %v1748_v63 }
 0x1ff   : > { %1749 = vtanh.f32 %v2199_v47  ;;  %v786_v1 = vadd.f32 0.5, %v785_v0 }
 0x205   : > { %v1750_v2 = vpop.eup %1749 }
 0x206   : > { %v791_v4 = vmul.f32 %v1750_v2, %v786_v1 }
 0x208   : > { %v792_v10 = vpack.c.bf16 %v791_v4, %v791_v4 }
 0x20a   : > { %1632 = vst [vmem:[%s1371_s22 + $0x8] sm:$0xf] %v792_v10  ;;  %814 = vmatmul.bf16.vlgmr.msrb.gmra.mxu0 %v792_v10  ;;  %827 = vmatmul.bf16.vlgmr.msrb.gmra.mxu1 %v792_v10  ;;  %s1401_s22 = scalar_lea.vmem %s2110_s28, %s1651_s21  ;;  %s1490_s28 = sshll.u32 %s1873_s19, 3 }
 0x20b   : > { %840 = vmatmul.bf16.vlgmr.msrb.gmra.mxu2 %v792_v10  ;;  %853 = vmatmul.bf16.vlgmr.msrb.gmra.mxu3 %v792_v10  ;;  %s328_s25 = scalar_lea.vmem %s2352_s4, %s1490_s28  ;;  %s324_s29 = scalar_lea.vmem %s2351_s3, %s1490_s28 }
 0x20c   : > { %983 = vmatpush.bf16.msrb.mxu0 %v1884_v3  ;;  %996 = vmatpush.bf16.msrb.mxu1 %v1889_v7 }
 0x20d   : > { %1009 = vmatpush.bf16.msrb.mxu2 %v1891_v8  ;;  %1022 = vmatpush.bf16.msrb.mxu3 %v1897_v12 }
 0x210   : > { %984 = vmatpush.bf16.msrb.mxu0 %v1904_v16  ;;  %997 = vmatpush.bf16.msrb.mxu1 %v1906_v17 }
 0x211   : > { %1010 = vmatpush.bf16.msrb.mxu2 %v1912_v21  ;;  %1023 = vmatpush.bf16.msrb.mxu3 %v1917_v25 }
 0x214   : > { %985 = vmatpush.bf16.msrb.mxu0 %v1923_v29  ;;  %998 = vmatpush.bf16.msrb.mxu1 %v1930_v33 }
 0x215   : > { %1011 = vmatpush.bf16.msrb.mxu2 %v1932_v34  ;;  %1024 = vmatpush.bf16.msrb.mxu3 %v1938_v38 }
 0x218   : > { %986 = vmatpush.bf16.msrb.mxu0 %v1946_v44  ;;  %999 = vmatpush.bf16.msrb.mxu1 %v1950_v45 }
 0x219   : > { %1012 = vmatpush.bf16.msrb.mxu2 %v1952_v46  ;;  %1025 = vmatpush.bf16.msrb.mxu3 %v1958_v50 }
 0x21c   : > { %987 = vmatpush.bf16.msrb.mxu0 %v1966_v56  ;;  %1000 = vmatpush.bf16.msrb.mxu1 %v1970_v57 }
 0x21d   : > { %1013 = vmatpush.bf16.msrb.mxu2 %v1972_v58  ;;  %1026 = vmatpush.bf16.msrb.mxu3 %v1978_v62 }
 0x220   : > { %988 = vmatpush.bf16.msrb.mxu0 %v1986_v5  ;;  %1001 = vmatpush.bf16.msrb.mxu1 %v1990_v6 }
 0x221   : > { %1014 = vmatpush.bf16.msrb.mxu2 %v1992_v9  ;;  %1027 = vmatpush.bf16.msrb.mxu3 %v1998_v14 }
 0x224   : > { %989 = vmatpush.bf16.msrb.mxu0 %v2006_v23  ;;  %1002 = vmatpush.bf16.msrb.mxu1 %v2010_v24 }
 0x225   : > { %1015 = vmatpush.bf16.msrb.mxu2 %v2012_v26  ;;  %1028 = vmatpush.bf16.msrb.mxu3 %v2018_v31 }
 0x228   : > { %990 = vmatpush.bf16.msrb.mxu0 %v2026_v40  ;;  %1003 = vmatpush.bf16.msrb.mxu1 %v2030_v41 }
 0x229   : > { %1016 = vmatpush.bf16.msrb.mxu2 %v2032_v42  ;;  %1029 = vmatpush.bf16.msrb.mxu3 %v2035_v43 }
 0x287   : > { %v815_v15 = vpop.f32.mrf.mxu0  ;;  %v828_v18 = vpop.f32.mrf.mxu1 }
 0x288   : > { %v858_v19 = vadd.f32 %v815_v15, %v802_v11  ;;  %v859_v20 = vadd.f32 %v828_v18, %v803_v13 }
 0x28a   : > { %v862_v27 = vmul.f32 0.5, %v858_v19  ;;  %v866_v28 = vmul.f32 0.5, %v859_v20 }
 0x28c   : > { %1751 = vtanh.f32 %v862_v27 }
 0x28d   : > { %1753 = vtanh.f32 %v866_v28 }
 0x28e   : > { %v841_v35 = vpop.f32.mrf.mxu2  ;;  %v854_v36 = vpop.f32.mrf.mxu3 }
 0x28f   : > { %v860_v37 = vadd.f32 %v841_v35, %v804_v30  ;;  %v861_v39 = vadd.f32 %v854_v36, %v805_v32  ;;  %v817_v48 = vpop.f32.mrf.mxu0  ;;  %v830_v49 = vpop.f32.mrf.mxu1  ;;  %v889_v35 = vld [vmem:[%s887_s30 + $0x8] sm:$0xff] }
 0x290   : > { %v893_v48 = vunpack.c.h.bf16 %v889_v35 }
 0x291   : > { %1755 = vtanh.f32 %v860_v37  ;;  %v871_v51 = vmul.f32 0.5, %v861_v39  ;;  %v892_v39 = vunpack.c.l.bf16 %v889_v35 }
 0x292   : > { %v1752_v52 = vpop.eup %1751 }
 0x293   : > { %v1754_v53 = vpop.eup %1753  ;;  %v864_v55 = vmul.f32 0.5, %v1752_v52  ;;  %1757 = vtanh.f32 %v871_v51 }
 0x294   : > { %v868_v59 = vmul.f32 0.5, %v1754_v53 }
 0x295   : > { %v865_v60 = vadd.f32 0.5, %v864_v55 }
 0x296   : > { %v869_v61 = vadd.f32 0.5, %v868_v59  ;;  %v843_v63 = vpop.f32.mrf.mxu2  ;;  %v856_v0 = vpop.f32.mrf.mxu3 }
 0x297   : > { %v1756_v1 = vpop.eup %1755 }
 0x298   : > { %v875_v2 = vmul.f32 %v869_v61, %v2199_v47  ;;  %v876_v4 = vmul.f32 %v1756_v1, %v865_v60  ;;  %v888_v47 = vld [vmem:[%s887_s30] sm:$0xff] }
 0x299   : > { %v1758_v10 = vpop.eup %1757  ;;  %v890_v20 = vunpack.c.l.bf16 %v888_v47  ;;  %v891_v22 = vunpack.c.h.bf16 %v888_v47 }
 0x29a   : > { %v2239_v54 = vadd.f32 %v876_v4, %v875_v2  ;;  %v873_v11 = vmul.f32 0.5, %v1758_v10 }
 0x29c   : > { %1759 = vtanh.f32 %v2239_v54  ;;  %v874_v13 = vadd.f32 0.5, %v873_v11 }
 0x2a2   : > { %v1760_v15 = vpop.eup %1759 }
 0x2a3   : > { %v879_v18 = vmul.f32 %v1760_v15, %v874_v13 }
 0x2a5   : > { %v880_v19 = vpack.c.bf16 %v879_v18, %v879_v18 }
 0x2a7   : > { %1637 = vst [vmem:[%s1377_s26 + $0xc] sm:$0xf] %v880_v19  ;;  %902 = vmatmul.bf16.vlgmr.msra.gmra.mxu0 %v880_v19  ;;  %915 = vmatmul.bf16.vlgmr.msra.gmra.mxu1 %v880_v19  ;;  %s1654_s26 = smul.u32 4294967268, %s1815_s15 }
 0x2a8   : > { %928 = vmatmul.bf16.vlgmr.msra.gmra.mxu2 %v880_v19  ;;  %941 = vmatmul.bf16.vlgmr.msra.gmra.mxu3 %v880_v19 }
 0x2a9   : > { %1072 = vmatpush.bf16.msra.mxu0 %v1884_v3  ;;  %1085 = vmatpush.bf16.msra.mxu1 %v1889_v7  ;;  %s1405_s30 = scalar_lea.vmem %s2121_s8, %s1654_s26 }
 0x2aa   : > { %1098 = vmatpush.bf16.msra.mxu2 %v1891_v8  ;;  %1111 = vmatpush.bf16.msra.mxu3 %v1897_v12 }
 0x2ad   : > { %1073 = vmatpush.bf16.msra.mxu0 %v1904_v16  ;;  %1086 = vmatpush.bf16.msra.mxu1 %v1906_v17 }
 0x2ae   : > { %1099 = vmatpush.bf16.msra.mxu2 %v1912_v21  ;;  %1112 = vmatpush.bf16.msra.mxu3 %v1917_v25 }
 0x2b1   : > { %1074 = vmatpush.bf16.msra.mxu0 %v1923_v29  ;;  %1087 = vmatpush.bf16.msra.mxu1 %v1930_v33 }
 0x2b2   : > { %1100 = vmatpush.bf16.msra.mxu2 %v1932_v34  ;;  %1113 = vmatpush.bf16.msra.mxu3 %v1938_v38 }
 0x2b5   : > { %1075 = vmatpush.bf16.msra.mxu0 %v1946_v44  ;;  %1088 = vmatpush.bf16.msra.mxu1 %v1950_v45 }
 0x2b6   : > { %1101 = vmatpush.bf16.msra.mxu2 %v1952_v46  ;;  %1114 = vmatpush.bf16.msra.mxu3 %v1958_v50 }
 0x2b9   : > { %1076 = vmatpush.bf16.msra.mxu0 %v1966_v56  ;;  %1089 = vmatpush.bf16.msra.mxu1 %v1970_v57 }
 0x2ba   : > { %1102 = vmatpush.bf16.msra.mxu2 %v1972_v58  ;;  %1115 = vmatpush.bf16.msra.mxu3 %v1978_v62 }
 0x2bd   : > { %1077 = vmatpush.bf16.msra.mxu0 %v1986_v5  ;;  %1090 = vmatpush.bf16.msra.mxu1 %v1990_v6 }
 0x2be   : > { %1103 = vmatpush.bf16.msra.mxu2 %v1992_v9  ;;  %1116 = vmatpush.bf16.msra.mxu3 %v1998_v14 }
 0x2c1   : > { %1078 = vmatpush.bf16.msra.mxu0 %v2006_v23  ;;  %1091 = vmatpush.bf16.msra.mxu1 %v2010_v24 }
 0x2c2   : > { %1104 = vmatpush.bf16.msra.mxu2 %v2012_v26  ;;  %1117 = vmatpush.bf16.msra.mxu3 %v2018_v31 }
 0x2c5   : > { %1079 = vmatpush.bf16.msra.mxu0 %v2026_v40  ;;  %1092 = vmatpush.bf16.msra.mxu1 %v2030_v41 }
 0x2c6   : > { %1105 = vmatpush.bf16.msra.mxu2 %v2032_v42  ;;  %1118 = vmatpush.bf16.msra.mxu3 %v2035_v43 }
 0x324   : > { %v903_v27 = vpop.f32.mrf.mxu0  ;;  %v916_v28 = vpop.f32.mrf.mxu1 }
 0x325   : > { %v946_v30 = vadd.f32 %v903_v27, %v890_v20  ;;  %v947_v32 = vadd.f32 %v916_v28, %v891_v22 }
 0x327   : > { %v950_v36 = vmul.f32 0.5, %v946_v30  ;;  %v954_v37 = vmul.f32 0.5, %v947_v32 }
 0x329   : > { %1761 = vtanh.f32 %v950_v36 }
 0x32a   : > { %1763 = vtanh.f32 %v954_v37 }
 0x32b   : > { %v929_v49 = vpop.f32.mrf.mxu2  ;;  %v942_v51 = vpop.f32.mrf.mxu3 }
 0x32c   : > { %v948_v52 = vadd.f32 %v929_v49, %v892_v39  ;;  %v949_v53 = vadd.f32 %v942_v51, %v893_v48  ;;  %v905_v55 = vpop.f32.mrf.mxu0  ;;  %v918_v59 = vpop.f32.mrf.mxu1  ;;  %v1647_v39 = vld [vmem:[%s1393_s13 + $0x60] sm:$0xff] }
 0x32d   : > { %v1068_v48 = vunpack.c.l.bf16 %v1647_v39  ;;  %v1069_v49 = vunpack.c.h.bf16 %v1647_v39  ;;  %v1648_v59 = vld [vmem:[%s1393_s13 + $0x68] sm:$0xff] }
 0x32e   : > { %1765 = vtanh.f32 %v948_v52  ;;  %v959_v60 = vmul.f32 0.5, %v949_v53 }
 0x32f   : > { %v1762_v61 = vpop.eup %1761 }
 0x330   : > { %v1764_v63 = vpop.eup %1763  ;;  %v952_v0 = vmul.f32 0.5, %v1762_v61  ;;  %1767 = vtanh.f32 %v959_v60 }
 0x331   : > { %v956_v1 = vmul.f32 0.5, %v1764_v63  ;;  %v1070_v63 = vunpack.c.l.bf16 %v1648_v59 }
 0x332   : > { %v953_v2 = vadd.f32 0.5, %v952_v0  ;;  %v1071_v0 = vunpack.c.h.bf16 %v1648_v59 }
 0x333   : > { %v957_v4 = vadd.f32 0.5, %v956_v1  ;;  %v931_v10 = vpop.f32.mrf.mxu2  ;;  %v944_v11 = vpop.f32.mrf.mxu3 }
 0x334   : > { %v1766_v13 = vpop.eup %1765 }
 0x335   : > { %v963_v15 = vmul.f32 %v957_v4, %v2239_v54  ;;  %v964_v18 = vmul.f32 %v1766_v13, %v953_v2 }
 0x336   : > { %v1768_v19 = vpop.eup %1767 }
 0x337   : > { %v2281_v47 = vadd.f32 %v964_v18, %v963_v15  ;;  %v961_v20 = vmul.f32 0.5, %v1768_v19 }
 0x339   : > { %1769 = vtanh.f32 %v2281_v47  ;;  %v962_v22 = vadd.f32 0.5, %v961_v20 }
 0x33f   : > { %v1770_v27 = vpop.eup %1769 }
 0x340   : > { %v967_v28 = vmul.f32 %v1770_v27, %v962_v22 }
 0x342   : > { %v968_v30 = vpack.c.bf16 %v967_v28, %v967_v28 }
 0x344   : > { %971 = vst [vmem:[%s970_s6] sm:$0xf] %v968_v30  ;;  %991 = vmatmul.bf16.vlgmr.msrb.gmra.mxu0 %v968_v30  ;;  %1004 = vmatmul.bf16.vlgmr.msrb.gmra.mxu1 %v968_v30 }
 0x345   : > { %1017 = vmatmul.bf16.vlgmr.msrb.gmra.mxu2 %v968_v30  ;;  %1030 = vmatmul.bf16.vlgmr.msrb.gmra.mxu3 %v968_v30 }
 0x346   : > { %1161 = vmatpush.bf16.msrb.mxu0 %v1884_v3  ;;  %1174 = vmatpush.bf16.msrb.mxu1 %v1889_v7  ;;  %v1642_v3 = vld [vmem:[%s1385_s9 + $0x50] sm:$0xff] }
 0x347   : > { %1187 = vmatpush.bf16.msrb.mxu2 %v1891_v8  ;;  %1200 = vmatpush.bf16.msrb.mxu3 %v1897_v12  ;;  %v979_v7 = vunpack.c.l.bf16 %v1642_v3  ;;  %v980_v8 = vunpack.c.h.bf16 %v1642_v3 }
 0x34a   : > { %1162 = vmatpush.bf16.msrb.mxu0 %v1904_v16  ;;  %1175 = vmatpush.bf16.msrb.mxu1 %v1906_v17 }
 0x34b   : > { %1188 = vmatpush.bf16.msrb.mxu2 %v1912_v21  ;;  %1201 = vmatpush.bf16.msrb.mxu3 %v1917_v25  ;;  %v1643_v25 = vld [vmem:[%s1385_s9 + $0x58] sm:$0xff] }
 0x34e   : > { %1163 = vmatpush.bf16.msrb.mxu0 %v1923_v29  ;;  %1176 = vmatpush.bf16.msrb.mxu1 %v1930_v33 }
 0x34f   : > { %1189 = vmatpush.bf16.msrb.mxu2 %v1932_v34  ;;  %1202 = vmatpush.bf16.msrb.mxu3 %v1938_v38  ;;  %v981_v34 = vunpack.c.l.bf16 %v1643_v25  ;;  %v982_v38 = vunpack.c.h.bf16 %v1643_v25 }
 0x352   : > { %1164 = vmatpush.bf16.msrb.mxu0 %v1946_v44  ;;  %1177 = vmatpush.bf16.msrb.mxu1 %v1950_v45 }
 0x353   : > { %1190 = vmatpush.bf16.msrb.mxu2 %v1952_v46  ;;  %1203 = vmatpush.bf16.msrb.mxu3 %v1958_v50 }
 0x356   : > { %1165 = vmatpush.bf16.msrb.mxu0 %v1966_v56  ;;  %1178 = vmatpush.bf16.msrb.mxu1 %v1970_v57 }
 0x357   : > { %1191 = vmatpush.bf16.msrb.mxu2 %v1972_v58  ;;  %1204 = vmatpush.bf16.msrb.mxu3 %v1978_v62 }
 0x35a   : > { %1166 = vmatpush.bf16.msrb.mxu0 %v1986_v5  ;;  %1179 = vmatpush.bf16.msrb.mxu1 %v1990_v6 }
 0x35b   : > { %1192 = vmatpush.bf16.msrb.mxu2 %v1992_v9  ;;  %1205 = vmatpush.bf16.msrb.mxu3 %v1998_v14 }
 0x35e   : > { %1167 = vmatpush.bf16.msrb.mxu0 %v2006_v23  ;;  %1180 = vmatpush.bf16.msrb.mxu1 %v2010_v24 }
 0x35f   : > { %1193 = vmatpush.bf16.msrb.mxu2 %v2012_v26  ;;  %1206 = vmatpush.bf16.msrb.mxu3 %v2018_v31 }
 0x362   : > { %1168 = vmatpush.bf16.msrb.mxu0 %v2026_v40  ;;  %1181 = vmatpush.bf16.msrb.mxu1 %v2030_v41 }
 0x363   : > { %1194 = vmatpush.bf16.msrb.mxu2 %v2032_v42  ;;  %1207 = vmatpush.bf16.msrb.mxu3 %v2035_v43 }
 0x3c1   : > { %v992_v12 = vpop.f32.mrf.mxu0  ;;  %v1005_v16 = vpop.f32.mrf.mxu1 }
 0x3c2   : > { %v1035_v17 = vadd.f32 %v992_v12, %v979_v7  ;;  %v1036_v21 = vadd.f32 %v1005_v16, %v980_v8 }
 0x3c4   : > { %v1039_v29 = vmul.f32 0.5, %v1035_v17  ;;  %v1043_v33 = vmul.f32 0.5, %v1036_v21 }
 0x3c6   : > { %1771 = vtanh.f32 %v1039_v29 }
 0x3c7   : > { %1773 = vtanh.f32 %v1043_v33 }
 0x3c8   : > { %v1018_v44 = vpop.f32.mrf.mxu2  ;;  %v1031_v45 = vpop.f32.mrf.mxu3 }
 0x3c9   : > { %v1037_v46 = vadd.f32 %v1018_v44, %v981_v34  ;;  %v1038_v50 = vadd.f32 %v1031_v45, %v982_v38  ;;  %v994_v56 = vpop.f32.mrf.mxu0  ;;  %v1007_v57 = vpop.f32.mrf.mxu1  ;;  %v1652_v34 = vld [vmem:[%s1401_s22 + $0x70] sm:$0xff] }
 0x3ca   : > { %v1157_v38 = vunpack.c.l.bf16 %v1652_v34  ;;  %v1158_v44 = vunpack.c.h.bf16 %v1652_v34  ;;  %v1653_v57 = vld [vmem:[%s1401_s22 + $0x78] sm:$0xff] }
 0x3cb   : > { %1775 = vtanh.f32 %v1037_v46  ;;  %v1048_v58 = vmul.f32 0.5, %v1038_v50 }
 0x3cc   : > { %v1772_v62 = vpop.eup %1771 }
 0x3cd   : > { %v1774_v5 = vpop.eup %1773  ;;  %v1041_v6 = vmul.f32 0.5, %v1772_v62  ;;  %1777 = vtanh.f32 %v1048_v58 }
 0x3ce   : > { %v1045_v9 = vmul.f32 0.5, %v1774_v5  ;;  %v1159_v5 = vunpack.c.l.bf16 %v1653_v57 }
 0x3cf   : > { %v1042_v14 = vadd.f32 0.5, %v1041_v6  ;;  %v1160_v6 = vunpack.c.h.bf16 %v1653_v57 }
 0x3d0   : > { %v1046_v23 = vadd.f32 0.5, %v1045_v9  ;;  %v1020_v24 = vpop.f32.mrf.mxu2  ;;  %v1033_v26 = vpop.f32.mrf.mxu3 }
 0x3d1   : > { %v1776_v31 = vpop.eup %1775 }
 0x3d2   : > { %v1052_v40 = vmul.f32 %v1046_v23, %v2281_v47  ;;  %v1053_v41 = vmul.f32 %v1776_v31, %v1042_v14 }
 0x3d3   : > { %v1778_v42 = vpop.eup %1777 }
 0x3d4   : > { %v1054_v43 = vadd.f32 %v1053_v41, %v1052_v40  ;;  %v1050_v54 = vmul.f32 0.5, %v1778_v42 }
 0x3d6   : > { %1779 = vtanh.f32 %v1054_v43  ;;  %v1051_v32 = vadd.f32 0.5, %v1050_v54 }
 0x3dc   : > { %v1780_v35 = vpop.eup %1779 }
 0x3dd   : > { %v1056_v36 = vmul.f32 %v1780_v35, %v1051_v32 }
 0x3df   : > { %v1057_v37 = vpack.c.bf16 %v1056_v36, %v1056_v36 }
 0x3e1   : > { %1645 = vst [vmem:[%s1389_s11 + $0x14] sm:$0xf] %v1057_v37  ;;  %1080 = vmatmul.bf16.vlgmr.msra.gmra.mxu0 %v1057_v37  ;;  %1093 = vmatmul.bf16.vlgmr.msra.gmra.mxu1 %v1057_v37 }
 0x3e2   : > { %1106 = vmatmul.bf16.vlgmr.msra.gmra.mxu2 %v1057_v37  ;;  %1119 = vmatmul.bf16.vlgmr.msra.gmra.mxu3 %v1057_v37 }
 0x45e   : > { %v1081_v51 = vpop.f32.mrf.mxu0  ;;  %v1094_v52 = vpop.f32.mrf.mxu1 }
 0x45f   : > { %v1124_v53 = vadd.f32 %v1081_v51, %v1068_v48  ;;  %v1125_v55 = vadd.f32 %v1094_v52, %v1069_v49 }
 0x461   : > { %v1128_v60 = vmul.f32 0.5, %v1124_v53  ;;  %v1132_v61 = vmul.f32 0.5, %v1125_v55 }
 0x463   : > { %1781 = vtanh.f32 %v1128_v60 }
 0x464   : > { %1783 = vtanh.f32 %v1132_v61 }
 0x465   : > { %v1107_v1 = vpop.f32.mrf.mxu2  ;;  %v1120_v2 = vpop.f32.mrf.mxu3 }
 0x466   : > { %v1126_v4 = vadd.f32 %v1107_v1, %v1070_v63  ;;  %v1127_v10 = vadd.f32 %v1120_v2, %v1071_v0  ;;  %v1083_v11 = vpop.f32.mrf.mxu0  ;;  %v1096_v13 = vpop.f32.mrf.mxu1 }
 0x468   : > { %1785 = vtanh.f32 %v1126_v4  ;;  %v1137_v15 = vmul.f32 0.5, %v1127_v10 }
 0x469   : > { %v1782_v18 = vpop.eup %1781 }
 0x46a   : > { %v1784_v19 = vpop.eup %1783  ;;  %v1130_v47 = vmul.f32 0.5, %v1782_v18  ;;  %1787 = vtanh.f32 %v1137_v15 }
 0x46b   : > { %v1134_v20 = vmul.f32 0.5, %v1784_v19 }
 0x46c   : > { %v1131_v22 = vadd.f32 0.5, %v1130_v47 }
 0x46d   : > { %v1135_v27 = vadd.f32 0.5, %v1134_v20  ;;  %v1109_v28 = vpop.f32.mrf.mxu2  ;;  %v1122_v30 = vpop.f32.mrf.mxu3 }
 0x46e   : > { %v1786_v3 = vpop.eup %1785 }
 0x46f   : > { %v1141_v7 = vmul.f32 %v1135_v27, %v1054_v43  ;;  %v1142_v8 = vmul.f32 %v1786_v3, %v1131_v22 }
 0x470   : > { %v1788_v12 = vpop.eup %1787 }
 0x471   : > { %v1143_v16 = vadd.f32 %v1142_v8, %v1141_v7  ;;  %v1139_v17 = vmul.f32 0.5, %v1788_v12 }
 0x473   : > { %1789 = vtanh.f32 %v1143_v16  ;;  %v1140_v21 = vadd.f32 0.5, %v1139_v17 }
 0x479   : > { %v1790_v25 = vpop.eup %1789 }
 0x47a   : > { %v1145_v29 = vmul.f32 %v1790_v25, %v1140_v21 }
 0x47c   : > { %v1146_v33 = vpack.c.bf16 %v1145_v29, %v1145_v29 }
 0x47e   : > { %1650 = vst [vmem:[%s1397_s20 + $0x18] sm:$0xf] %v1146_v33  ;;  %1169 = vmatmul.bf16.vlgmr.msrb.gmra.mxu0 %v1146_v33  ;;  %1182 = vmatmul.bf16.vlgmr.msrb.gmra.mxu1 %v1146_v33 }
 0x47f   : > { %1195 = vmatmul.bf16.vlgmr.msrb.gmra.mxu2 %v1146_v33  ;;  %1208 = vmatmul.bf16.vlgmr.msrb.gmra.mxu3 %v1146_v33 }
 0x4fb   : > { %v1170_v45 = vpop.f32.mrf.mxu0  ;;  %v1183_v46 = vpop.f32.mrf.mxu1 }
 0x4fc   : > { %v1213_v50 = vadd.f32 %v1170_v45, %v1157_v38  ;;  %v1214_v56 = vadd.f32 %v1183_v46, %v1158_v44 }
 0x4fe   : > { %v1217_v58 = vmul.f32 0.5, %v1213_v50  ;;  %v1221_v62 = vmul.f32 0.5, %v1214_v56 }
 0x500   : > { %1791 = vtanh.f32 %v1217_v58 }
 0x501   : > { %1793 = vtanh.f32 %v1221_v62 }
 0x502   : > { %v1196_v9 = vpop.f32.mrf.mxu2  ;;  %v1209_v14 = vpop.f32.mrf.mxu3 }
 0x503   : > { %v1215_v23 = vadd.f32 %v1196_v9, %v1159_v5  ;;  %v1216_v24 = vadd.f32 %v1209_v14, %v1160_v6  ;;  %v1172_v26 = vpop.f32.mrf.mxu0  ;;  %v1185_v31 = vpop.f32.mrf.mxu1 }
 0x505   : > { %1795 = vtanh.f32 %v1215_v23  ;;  %v1226_v40 = vmul.f32 0.5, %v1216_v24 }
 0x506   : > { %v1792_v41 = vpop.eup %1791 }
 0x507   : > { %v1794_v42 = vpop.eup %1793  ;;  %v1219_v43 = vmul.f32 0.5, %v1792_v41  ;;  %1797 = vtanh.f32 %v1226_v40 }
 0x508   : > { %v1223_v54 = vmul.f32 0.5, %v1794_v42 }
 0x509   : > { %v1220_v32 = vadd.f32 0.5, %v1219_v43 }
 0x50a   : > { %v1224_v35 = vadd.f32 0.5, %v1223_v54  ;;  %v1198_v36 = vpop.f32.mrf.mxu2  ;;  %v1211_v37 = vpop.f32.mrf.mxu3 }
 0x50b   : > { %v1796_v39 = vpop.eup %1795 }
 0x50c   : > { %v1230_v48 = vmul.f32 %v1224_v35, %v1143_v16  ;;  %v1231_v49 = vmul.f32 %v1796_v39, %v1220_v32 }
 0x50d   : > { %v1798_v51 = vpop.eup %1797 }
 0x50e   : > { %v1232_v52 = vadd.f32 %v1231_v49, %v1230_v48  ;;  %v1228_v53 = vmul.f32 0.5, %v1798_v51 }
 0x510   : > { %1799 = vtanh.f32 %v1232_v52  ;;  %1245 = vst [vmem:[%s328_s25] sm:$0xff] %v1232_v52  ;;  %v1229_v55 = vadd.f32 0.5, %v1228_v53 }
 0x516   : > { %v1800_v59 = vpop.eup %1799 }
 0x517   : > { %v1234_v60 = vmul.f32 %v1800_v59, %v1229_v55 }
 0x519   : > { %v1235_v61 = vpack.c.bf16 %v1234_v60, %v1234_v60  ;;  %1244 = vst [vmem:[%s324_s29] sm:$0xff] %v1234_v60 }
 0x51b   : > { %1655 = vst [vmem:[%s1405_s30 + $0x1c] sm:$0xf] %v1235_v61 }
 0x51c PF: > { %s15_s17 = sadd.s32 1, %s1823_s17   ;;  %s2353_s15 = smov %s1819_s16 }
 0x51d   : > { %p12_p5 = scmp.ge.s32.totalorder %s15_s17, 4   ;;  %s2354_s16 = smov %s2356_s18 }
 0x51f   :  { %14 = sbr.rel (!%p12_p5) target bundleno = 2 (0x2), region = 109 }

</bundles_post_ra>
